<compile_context>
chip_gen: v5e
topology: v5e:2x2
jax: 0.10.0
libtpu: 0.0.40
codegen_flags: <defaults>
</compile_context>

<pallas_src>
import numpy as np
import jax
import jax.numpy as jnp
from jax.experimental import pallas as pl
from jax.experimental.pallas import tpu as pltpu

# ----- model hyper-parameters (module defaults) -----
NODE_NUM = 5          # sensors / nodes
NODE_DIM = 9          # per-sample channels
WINDOW = 24           # window size
CH = 8                # channel_dim
TR = 10               # time_reduce_size
HID = 128             # hid_dim
NCLASS = 17           # class_num
KSIZE = 5             # conv2 kernel size
F1 = CH * TR          # 80  (per-node feature after stage 1)
F2 = 2 * F1           # 160 (edge feature)
OUT_PAD = 128         # lane-dense padded class dim


# =====================================================================
# Fused kernel: per-sensor feature extraction + graph message passing
# + classifier, one batch tile per grid step.
# =====================================================================
def make_whar_kernel(send_idx, recv_idx):
    send_idx = tuple(int(i) for i in send_idx)
    recv_idx = tuple(int(i) for i in recv_idx)

    def kernel(x_ref, w1_ref, b1_ref, m2_ref, b2_ref,
               w3a_ref, w3b_ref, b3_ref, w4_ref, b4_ref,
               w5_ref, b5_ref, wa_ref, wb_ref, bfc_ref,
               wo_ref, bo_ref, out_ref,
               s1_scr, p_scr, q_scr, inc_scr):
        n, tb, wd = x_ref.shape

        # ---- stage 1: relu(bn1(conv1)) -> relu(bn2(conv2)) as two matmuls ----
        x = x_ref[...].reshape(n * tb, wd)                          # (N*TB, 216)
        h1 = jnp.dot(x, w1_ref[...], preferred_element_type=jnp.float32)
        h1 = jnp.maximum(h1 + b1_ref[...], 0.0)                     # (N*TB, 192)
        s1 = jnp.dot(h1, m2_ref[...], preferred_element_type=jnp.float32)
        s1 = jnp.maximum(s1 + b2_ref[...], 0.0)                     # (N*TB, 80)
        s1_scr[...] = s1.reshape(n, tb, F1)

        # ---- stacked sender / receiver projections (conv3+bn3 halves) ----
        p_scr[...] = jnp.dot(s1, w3a_ref[...],
                             preferred_element_type=jnp.float32).reshape(n, tb, F2)
        q_scr[...] = jnp.dot(s1, w3b_ref[...],
                             preferred_element_type=jnp.float32).reshape(n, tb, F2)
        inc_scr[...] = jnp.zeros_like(inc_scr)

        b3 = b3_ref[...]                                            # (1, F2)
        w4 = w4_ref[...]                                            # (1, F2)
        b4 = b4_ref[...]                                            # (1, 1)

        # ---- edge loop: one-hot relations -> static gather / scatter ----
        for e in range(len(send_idx)):
            s, r = send_idx[e], recv_idx[e]
            edge = jnp.maximum(p_scr[s] + q_scr[r] + b3, 0.0)       # (TB, F2)
            # conv4 (F2 -> 1) as VPU mul + lane reduce; sigmoid gate
            logit = jnp.sum(edge * w4, axis=-1, keepdims=True) + b4  # (TB, 1)
            gate = 1.0 / (1.0 + jnp.exp(-logit))
            xm = edge * (1.0 + gate)                                # (TB, F2)
            inc_scr[s] = inc_scr[s] + xm
            inc_scr[r] = inc_scr[r] + xm

        # ---- conv5 + bn5 + relu on node aggregates (1/N folded into w5) ----
        inc = inc_scr[...].reshape(n * tb, F2)
        s2 = jnp.dot(inc, w5_ref[...], preferred_element_type=jnp.float32)
        s2 = jnp.maximum(s2 + b5_ref[...], 0.0)                     # (N*TB, F2)
        inc_scr[...] = s2.reshape(n, tb, F2)

        # ---- msg_fc1 (per-node weight blocks) + relu, then fc_out ----
        # TODO(synk): training-mode F.dropout (p=0.6) not implemented (eval identity).
        acc = jnp.zeros((tb, HID), jnp.float32)
        for nn in range(n):
            acc = acc + jnp.dot(s1_scr[nn], wa_ref[nn],
                                preferred_element_type=jnp.float32)
            acc = acc + jnp.dot(inc_scr[nn], wb_ref[nn],
                                preferred_element_type=jnp.float32)
        hid = jnp.maximum(acc + bfc_ref[...], 0.0)                  # (TB, HID)
        out_ref[...] = (jnp.dot(hid, wo_ref[...],
                                preferred_element_type=jnp.float32)
                        + bo_ref[...])                              # (TB, 128)
    return kernel


# =====================================================================
# Parameter setup (deterministic, synthetic)
# =====================================================================
def bn_init(key, c):
    k1, k2, k3, k4 = jax.random.split(key, 4)
    gamma = jax.random.uniform(k1, (c,), jnp.float32, 0.5, 1.5)
    beta = 0.1 * jax.random.normal(k2, (c,), jnp.float32)
    mean = 0.1 * jax.random.normal(k3, (c,), jnp.float32)
    var = jax.random.uniform(k4, (c,), jnp.float32, 0.5, 1.5)
    return gamma, beta, mean, var


def init_params(key):
    ks = jax.random.split(key, 20)

    def nrm(k, shape, scale=0.1):
        return scale * jax.random.normal(k, shape, jnp.float32)

    p = {}
    p['w1'] = nrm(ks[0], (CH, NODE_DIM))        # conv1 weight (out,in,1) squeezed
    p['b1'] = nrm(ks[1], (CH,))
    p['bn1'] = bn_init(ks[2], CH)
    p['w2'] = nrm(ks[3], (TR, WINDOW, KSIZE))   # conv2 weight
    p['b2'] = nrm(ks[4], (TR,))
    p['bn2'] = bn_init(ks[5], TR)
    p['w3'] = nrm(ks[6], (F2, F2))
    p['b3'] = nrm(ks[7], (F2,))
    p['bn3'] = bn_init(ks[8], F2)
    p['w4'] = nrm(ks[9], (F2,))                 # conv4 weight (1, F2, 1) squeezed
    p['b4'] = nrm(ks[10], (1,))
    p['w5'] = nrm(ks[11], (F2, F2))
    p['b5'] = nrm(ks[12], (F2,))
    p['bn5'] = bn_init(ks[13], F2)
    p['wfc1'] = nrm(ks[14], (HID, NODE_NUM * (F1 + F2)))
    p['bfc1'] = nrm(ks[15], (HID,))
    p['wout'] = nrm(ks[16], (NCLASS, HID))
    p['bout'] = nrm(ks[17], (NCLASS,))
    return p


def fold_bn(w, b, bn, eps=1e-5):
    gamma, beta, mean, var = bn
    s = gamma / jnp.sqrt(var + eps)
    w_eff = w * s.reshape((-1,) + (1,) * (w.ndim - 1))
    b_eff = (b - mean) * s + beta
    return w_eff, b_eff


def _round_up(v, m):
    return ((v + m - 1) // m) * m


# =====================================================================
# Forward wrapper (weight folding + one fused pallas_call)
# =====================================================================
def dynamic_whar_forward(inputs, rel_rec, rel_send, params):
    B, N, W, D = inputs.shape
    assert (N, W, D) == (NODE_NUM, WINDOW, NODE_DIM)

    # Relation matrices must be concrete one-hot (standard DynamicWHAR/NRI
    # construction); close over them outside jit.
    rr = np.asarray(rel_rec, dtype=np.float32)
    rs = np.asarray(rel_send, dtype=np.float32)
    assert rr.shape[1] == N and rs.shape == rr.shape
    one_hot_ok = (np.all((rr == 0.0) | (rr == 1.0)) and np.all(rr.sum(1) == 1.0)
                  and np.all((rs == 0.0) | (rs == 1.0)) and np.all(rs.sum(1) == 1.0))
    if not one_hot_ok:
        # TODO(synk): dense (non-one-hot) relation matrices need the coefficient-plane path.
        raise NotImplementedError("rel_rec / rel_send must be one-hot")
    recv_idx = rr.argmax(1).tolist()
    send_idx = rs.argmax(1).tolist()

    # ---- BN folding ----
    w1e, b1e = fold_bn(params['w1'], params['b1'], params['bn1'])   # (CH, D)
    w2e, b2e = fold_bn(params['w2'], params['b2'], params['bn2'])   # (TR, W, K)
    w3e, b3e = fold_bn(params['w3'], params['b3'], params['bn3'])   # (F2, F2)
    w5e, b5e = fold_bn(params['w5'], params['b5'], params['bn5'])   # (F2, F2)

    # conv1 (1x1) as block-diagonal matmul on the flattened (W*D) window layout
    w1big = jnp.kron(jnp.eye(W, dtype=jnp.float32), w1e.T)          # (216, 192)
    b1rep = jnp.tile(b1e, W).reshape(1, W * CH)
    # conv2 (k=5, pad=2) as one precomputed (192, 80) matmul (padding folded in)
    m4 = jnp.zeros((W, CH, TR, CH), jnp.float32)
    for c in range(CH):
        for k in range(KSIZE):
            cp = c + k - 2
            if 0 <= cp < CH:
                m4 = m4.at[:, cp, :, c].set(w2e[:, :, k].T)         # (W, TR)
    conv2_mat = m4.reshape(W * CH, TR * CH)                         # (192, 80)
    b2rep = jnp.repeat(b2e, CH).reshape(1, TR * CH)

    # conv3 split into sender / receiver halves (node2edge concat eliminated)
    w3_top = w3e[:, :F1].T                                          # (F1, F2)
    w3_bot = w3e[:, F1:].T                                          # (F1, F2)
    b3row = b3e.reshape(1, F2)
    w4row = params['w4'].reshape(1, F2)
    b4 = params['b4'].reshape(1, 1)
    w5s = w5e.T / float(N)                                          # 1/N folded in
    b5row = b5e.reshape(1, F2)
    wfc = params['wfc1'].reshape(HID, N, F1 + F2)
    wa = jnp.transpose(wfc[:, :, :F1], (1, 2, 0))                   # (N, F1, HID)
    wb = jnp.transpose(wfc[:, :, F1:], (1, 2, 0))                   # (N, F2, HID)
    bfc = params['bfc1'].reshape(1, HID)
    # lane-dense (128-wide) classifier output, sliced back to NCLASS outside
    wo_pad = jnp.zeros((HID, OUT_PAD), jnp.float32).at[:, :NCLASS].set(params['wout'].T)
    bo_pad = jnp.zeros((1, OUT_PAD), jnp.float32).at[:, :NCLASS].set(
        params['bout'].reshape(1, NCLASS))

    # node-major input slab: (N, B, W*D)
    x_nodes = jnp.transpose(inputs.astype(jnp.float32), (1, 0, 2, 3)).reshape(N, B, W * D)

    # batch tile: >= 2 grid steps when B is large (v7x megacore), multiple of 8
    if B <= 8:
        tb = B
    else:
        tb = min(256, _round_up(pl.cdiv(B, 2), 8))

    kernel = make_whar_kernel(send_idx, recv_idx)
    out_pad = pl.pallas_call(
        kernel,
        out_shape=jax.ShapeDtypeStruct((B, OUT_PAD), jnp.float32),
        grid_spec=pltpu.PrefetchScalarGridSpec(
            num_scalar_prefetch=0,
            grid=(pl.cdiv(B, tb),),
            in_specs=[
                pl.BlockSpec((N, tb, W * D), lambda b: (0, b, 0)),
                pl.BlockSpec((W * D, W * CH), lambda b: (0, 0)),
                pl.BlockSpec((1, W * CH), lambda b: (0, 0)),
                pl.BlockSpec((W * CH, F1), lambda b: (0, 0)),
                pl.BlockSpec((1, F1), lambda b: (0, 0)),
                pl.BlockSpec((F1, F2), lambda b: (0, 0)),
                pl.BlockSpec((F1, F2), lambda b: (0, 0)),
                pl.BlockSpec((1, F2), lambda b: (0, 0)),
                pl.BlockSpec((1, F2), lambda b: (0, 0)),
                pl.BlockSpec((1, 1), lambda b: (0, 0)),
                pl.BlockSpec((F2, F2), lambda b: (0, 0)),
                pl.BlockSpec((1, F2), lambda b: (0, 0)),
                pl.BlockSpec((N, F1, HID), lambda b: (0, 0, 0)),
                pl.BlockSpec((N, F2, HID), lambda b: (0, 0, 0)),
                pl.BlockSpec((1, HID), lambda b: (0, 0)),
                pl.BlockSpec((HID, OUT_PAD), lambda b: (0, 0)),
                pl.BlockSpec((1, OUT_PAD), lambda b: (0, 0)),
            ],
            out_specs=pl.BlockSpec((tb, OUT_PAD), lambda b: (b, 0)),
            scratch_shapes=[
                pltpu.VMEM((N, tb, F1), jnp.float32),   # s1 (per-node features)
                pltpu.VMEM((N, tb, F2), jnp.float32),   # P (sender half)
                pltpu.VMEM((N, tb, F2), jnp.float32),   # Q (receiver half)
                pltpu.VMEM((N, tb, F2), jnp.float32),   # inc / s2
            ],
        ),
        compiler_params=pltpu.CompilerParams(
            dimension_semantics=("parallel",)),
    )(x_nodes, w1big, b1rep, conv2_mat, b2rep,
      w3_top, w3_bot, b3row, w4row, b4,
      w5s, b5row, wa, wb, bfc, wo_pad, bo_pad)

    return out_pad[:, :NCLASS]


# =====================================================================
# Pure-JAX reference (mirrors the PyTorch forward, eval mode)
# =====================================================================
def _bn_eval(x, bn, axis, eps=1e-5):
    gamma, beta, mean, var = bn
    shp = [1] * x.ndim
    shp[axis] = -1
    return (x - mean.reshape(shp)) / jnp.sqrt(var.reshape(shp) + eps) \
        * gamma.reshape(shp) + beta.reshape(shp)


def reference_forward(inputs, rel_rec, rel_send, p):
    B, N, W, D = inputs.shape
    x = inputs.reshape(B * N, W, D)
    h = jnp.einsum('nwd,cd->nwc', x, p['w1']) + p['b1']
    h = jax.nn.relu(_bn_eval(h, p['bn1'], axis=-1))                  # (BN, 24, 8)
    hp = jnp.pad(h, ((0, 0), (0, 0), (2, 2)))
    z = jnp.zeros((B * N, TR, CH), jnp.float32)
    for k in range(KSIZE):
        z = z + jnp.einsum('nwl,tw->ntl', hp[:, :, k:k + CH], p['w2'][:, :, k])
    z = z + p['b2'][None, :, None]
    z = jax.nn.relu(_bn_eval(z, p['bn2'], axis=1))                   # (BN, 10, 8)
    s1 = z.reshape(B, N, F1)
    senders = jnp.einsum('en,bnf->bef', rel_send, s1)
    receivers = jnp.einsum('en,bnf->bef', rel_rec, s1)
    edges = jnp.concatenate([senders, receivers], axis=-1)
    e2 = jnp.einsum('bef,cf->bec', edges, p['w3']) + p['b3']
    e2 = jax.nn.relu(_bn_eval(e2, p['bn3'], axis=-1))
    logit = jnp.einsum('bec,c->be', e2, p['w4']) + p['b4']
    gate = jax.nn.sigmoid(logit)
    xm = e2 * (1.0 + gate[..., None])
    rel = rel_rec.T + rel_send.T
    inc = jnp.einsum('ne,bec->bnc', rel, xm) / N
    s2 = jnp.einsum('bnc,dc->bnd', inc, p['w5']) + p['b5']
    s2 = jax.nn.relu(_bn_eval(s2, p['bn5'], axis=-1))
    join = jnp.concatenate([s1, s2], axis=-1).reshape(B, -1)
    hid = jax.nn.relu(join @ p['wfc1'].T + p['bfc1'])
    return hid @ p['wout'].T + p['bout']


# =====================================================================
if __name__ == "__main__":
    key = jax.random.PRNGKey(0)
    kp, kx = jax.random.split(key)
    params = init_params(kp)

    B = 2
    inputs = jax.random.normal(kx, (B, NODE_NUM, WINDOW, NODE_DIM), jnp.float32)

    # NRI-style fully-connected (no self-loop) relation one-hots
    recv, send = [], []
    for i in range(NODE_NUM):
        for j in range(NODE_NUM):
            if i != j:
                recv.append(i)
                send.append(j)
    rel_rec = jax.nn.one_hot(jnp.array(recv), NODE_NUM, dtype=jnp.float32)   # (20, 5)
    rel_send = jax.nn.one_hot(jnp.array(send), NODE_NUM, dtype=jnp.float32)  # (20, 5)

    # rel matrices are closed over (concrete at trace time -> static edge indices)
    fwd = jax.jit(lambda x, p: dynamic_whar_forward(x, rel_rec, rel_send, p))
    preds = jax.block_until_ready(fwd(inputs, params))
    assert preds.shape == (B, NCLASS)

    ref = reference_forward(inputs, rel_rec, rel_send, params)
    if not bool(jnp.allclose(preds, ref, rtol=2e-3, atol=2e-3)):
        raise AssertionError(
            f"Pallas kernel mismatch vs reference: max abs err "
            f"{float(jnp.max(jnp.abs(preds - ref)))}")

    print("KERNEL_OK")
</pallas_src>

<mosaic_0001>
module attributes {stable_mosaic.version = 11 : i64} {
  func.func @kernel(%arg0: i32, %arg1: memref<5x2x216xf32, #tpu.memory_space<vmem>>, %arg2: memref<216x192xf32, #tpu.memory_space<vmem>>, %arg3: memref<1x192xf32, #tpu.memory_space<vmem>>, %arg4: memref<192x80xf32, #tpu.memory_space<vmem>>, %arg5: memref<1x80xf32, #tpu.memory_space<vmem>>, %arg6: memref<80x160xf32, #tpu.memory_space<vmem>>, %arg7: memref<80x160xf32, #tpu.memory_space<vmem>>, %arg8: memref<1x160xf32, #tpu.memory_space<vmem>>, %arg9: memref<1x160xf32, #tpu.memory_space<vmem>>, %arg10: memref<1x1xf32, #tpu.memory_space<vmem>>, %arg11: memref<160x160xf32, #tpu.memory_space<vmem>>, %arg12: memref<1x160xf32, #tpu.memory_space<vmem>>, %arg13: memref<5x80x128xf32, #tpu.memory_space<vmem>>, %arg14: memref<5x160x128xf32, #tpu.memory_space<vmem>>, %arg15: memref<1x128xf32, #tpu.memory_space<vmem>>, %arg16: memref<128x128xf32, #tpu.memory_space<vmem>>, %arg17: memref<1x128xf32, #tpu.memory_space<vmem>>, %arg18: memref<2x128xf32, #tpu.memory_space<vmem>>, %arg19: memref<5x2x80xf32, #tpu.memory_space<vmem>>, %arg20: memref<5x2x160xf32, #tpu.memory_space<vmem>>, %arg21: memref<5x2x160xf32, #tpu.memory_space<vmem>>, %arg22: memref<5x2x160xf32, #tpu.memory_space<vmem>>) attributes {dimension_semantics = [#tpu.dimension_semantics<parallel>], iteration_bounds = array<i64: 1>, scalar_prefetch = 0 : i64, scratch_operands = 4 : i64, tpu.core_type = #tpu.core_type<tc>, window_params = [{transform_indices = @transform_0, window_bounds = array<i64: 5, 2, 216>}, {pipeline_mode = #tpu.pipeline_mode<synchronous>, transform_indices = @transform_1, window_bounds = array<i64: 216, 192>}, {pipeline_mode = #tpu.pipeline_mode<synchronous>, transform_indices = @transform_2, window_bounds = array<i64: 1, 192>}, {pipeline_mode = #tpu.pipeline_mode<synchronous>, transform_indices = @transform_3, window_bounds = array<i64: 192, 80>}, {pipeline_mode = #tpu.pipeline_mode<synchronous>, transform_indices = @transform_4, window_bounds = array<i64: 1, 80>}, {pipeline_mode = #tpu.pipeline_mode<synchronous>, transform_indices = @transform_5, window_bounds = array<i64: 80, 160>}, {pipeline_mode = #tpu.pipeline_mode<synchronous>, transform_indices = @transform_6, window_bounds = array<i64: 80, 160>}, {pipeline_mode = #tpu.pipeline_mode<synchronous>, transform_indices = @transform_7, window_bounds = array<i64: 1, 160>}, {pipeline_mode = #tpu.pipeline_mode<synchronous>, transform_indices = @transform_8, window_bounds = array<i64: 1, 160>}, {pipeline_mode = #tpu.pipeline_mode<synchronous>, transform_indices = @transform_9, window_bounds = array<i64: 1, 1>}, {pipeline_mode = #tpu.pipeline_mode<synchronous>, transform_indices = @transform_10, window_bounds = array<i64: 160, 160>}, {pipeline_mode = #tpu.pipeline_mode<synchronous>, transform_indices = @transform_11, window_bounds = array<i64: 1, 160>}, {pipeline_mode = #tpu.pipeline_mode<synchronous>, transform_indices = @transform_12, window_bounds = array<i64: 5, 80, 128>}, {pipeline_mode = #tpu.pipeline_mode<synchronous>, transform_indices = @transform_13, window_bounds = array<i64: 5, 160, 128>}, {pipeline_mode = #tpu.pipeline_mode<synchronous>, transform_indices = @transform_14, window_bounds = array<i64: 1, 128>}, {pipeline_mode = #tpu.pipeline_mode<synchronous>, transform_indices = @transform_15, window_bounds = array<i64: 128, 128>}, {pipeline_mode = #tpu.pipeline_mode<synchronous>, transform_indices = @transform_16, window_bounds = array<i64: 1, 128>}, {transform_indices = @transform_17, window_bounds = array<i64: 2, 128>}]} {
    %c0 = arith.constant 0 : index
    %c0_0 = arith.constant 0 : index
    %c0_1 = arith.constant 0 : index
    %0 = vector.load %arg1[%c0, %c0_0, %c0_1] : memref<5x2x216xf32, #tpu.memory_space<vmem>>, vector<5x2x216xf32>
    %1 = vector.shape_cast %0 : vector<5x2x216xf32> to vector<10x216xf32>
    %c0_2 = arith.constant 0 : index
    %c0_3 = arith.constant 0 : index
    %2 = vector.load %arg2[%c0_2, %c0_3] : memref<216x192xf32, #tpu.memory_space<vmem>>, vector<216x192xf32>
    %cst = arith.constant dense<0.000000e+00> : vector<10x192xf32>
    %3 = tpu.matmul %1, %2, %cst {dimension_numbers = #tpu.dot_dimension_numbers<[1], [0], [0], [1], [0, 0, 1, 1], [], []>} : vector<10x216xf32>, vector<216x192xf32>, vector<10x192xf32> -> vector<10x192xf32>
    %c0_4 = arith.constant 0 : index
    %c0_5 = arith.constant 0 : index
    %4 = vector.load %arg3[%c0_4, %c0_5] : memref<1x192xf32, #tpu.memory_space<vmem>>, vector<1x192xf32>
    %5 = vector.broadcast %4 : vector<1x192xf32> to vector<10x192xf32>
    %6 = arith.addf %3, %5 : vector<10x192xf32>
    %cst_6 = arith.constant 0.000000e+00 : f32
    %7 = vector.broadcast %cst_6 : f32 to vector<10x192xf32>
    %8 = arith.maximumf %6, %7 : vector<10x192xf32>
    %c0_7 = arith.constant 0 : index
    %c0_8 = arith.constant 0 : index
    %9 = vector.load %arg4[%c0_7, %c0_8] : memref<192x80xf32, #tpu.memory_space<vmem>>, vector<192x80xf32>
    %cst_9 = arith.constant dense<0.000000e+00> : vector<10x80xf32>
    %10 = tpu.matmul %8, %9, %cst_9 {dimension_numbers = #tpu.dot_dimension_numbers<[1], [0], [0], [1], [0, 0, 1, 1], [], []>} : vector<10x192xf32>, vector<192x80xf32>, vector<10x80xf32> -> vector<10x80xf32>
    %c0_10 = arith.constant 0 : index
    %c0_11 = arith.constant 0 : index
    %11 = vector.load %arg5[%c0_10, %c0_11] : memref<1x80xf32, #tpu.memory_space<vmem>>, vector<1x80xf32>
    %12 = vector.broadcast %11 : vector<1x80xf32> to vector<10x80xf32>
    %13 = arith.addf %10, %12 : vector<10x80xf32>
    %cst_12 = arith.constant 0.000000e+00 : f32
    %14 = vector.broadcast %cst_12 : f32 to vector<10x80xf32>
    %15 = arith.maximumf %13, %14 : vector<10x80xf32>
    %16 = vector.shape_cast %15 : vector<10x80xf32> to vector<5x2x80xf32>
    %c0_13 = arith.constant 0 : index
    %c0_14 = arith.constant 0 : index
    %c0_15 = arith.constant 0 : index
    %17 = vector.load %arg19[%c0_13, %c0_14, %c0_15] : memref<5x2x80xf32, #tpu.memory_space<vmem>>, vector<5x2x80xf32>
    tpu.vector_store %arg19[%c0_13, %c0_14, %c0_15], %16 {strides = array<i32>} : memref<5x2x80xf32, #tpu.memory_space<vmem>>, vector<5x2x80xf32>,
    %c0_16 = arith.constant 0 : index
    %c0_17 = arith.constant 0 : index
    %18 = vector.load %arg6[%c0_16, %c0_17] : memref<80x160xf32, #tpu.memory_space<vmem>>, vector<80x160xf32>
    %cst_18 = arith.constant dense<0.000000e+00> : vector<10x160xf32>
    %19 = tpu.matmul %15, %18, %cst_18 {dimension_numbers = #tpu.dot_dimension_numbers<[1], [0], [0], [1], [0, 0, 1, 1], [], []>} : vector<10x80xf32>, vector<80x160xf32>, vector<10x160xf32> -> vector<10x160xf32>
    %20 = vector.shape_cast %19 : vector<10x160xf32> to vector<5x2x160xf32>
    %c0_19 = arith.constant 0 : index
    %c0_20 = arith.constant 0 : index
    %c0_21 = arith.constant 0 : index
    %21 = vector.load %arg20[%c0_19, %c0_20, %c0_21] : memref<5x2x160xf32, #tpu.memory_space<vmem>>, vector<5x2x160xf32>
    tpu.vector_store %arg20[%c0_19, %c0_20, %c0_21], %20 {strides = array<i32>} : memref<5x2x160xf32, #tpu.memory_space<vmem>>, vector<5x2x160xf32>,
    %c0_22 = arith.constant 0 : index
    %c0_23 = arith.constant 0 : index
    %22 = vector.load %arg7[%c0_22, %c0_23] : memref<80x160xf32, #tpu.memory_space<vmem>>, vector<80x160xf32>
    %cst_24 = arith.constant dense<0.000000e+00> : vector<10x160xf32>
    %23 = tpu.matmul %15, %22, %cst_24 {dimension_numbers = #tpu.dot_dimension_numbers<[1], [0], [0], [1], [0, 0, 1, 1], [], []>} : vector<10x80xf32>, vector<80x160xf32>, vector<10x160xf32> -> vector<10x160xf32>
    %24 = vector.shape_cast %23 : vector<10x160xf32> to vector<5x2x160xf32>
    %c0_25 = arith.constant 0 : index
    %c0_26 = arith.constant 0 : index
    %c0_27 = arith.constant 0 : index
    %25 = vector.load %arg21[%c0_25, %c0_26, %c0_27] : memref<5x2x160xf32, #tpu.memory_space<vmem>>, vector<5x2x160xf32>
    tpu.vector_store %arg21[%c0_25, %c0_26, %c0_27], %24 {strides = array<i32>} : memref<5x2x160xf32, #tpu.memory_space<vmem>>, vector<5x2x160xf32>,
    %cst_28 = arith.constant 0.000000e+00 : f32
    %26 = vector.broadcast %cst_28 : f32 to vector<5x2x160xf32>
    %c0_29 = arith.constant 0 : index
    %c0_30 = arith.constant 0 : index
    %c0_31 = arith.constant 0 : index
    %27 = vector.load %arg22[%c0_29, %c0_30, %c0_31] : memref<5x2x160xf32, #tpu.memory_space<vmem>>, vector<5x2x160xf32>
    tpu.vector_store %arg22[%c0_29, %c0_30, %c0_31], %26 {strides = array<i32>} : memref<5x2x160xf32, #tpu.memory_space<vmem>>, vector<5x2x160xf32>,
    %c0_32 = arith.constant 0 : index
    %c0_33 = arith.constant 0 : index
    %28 = vector.load %arg8[%c0_32, %c0_33] : memref<1x160xf32, #tpu.memory_space<vmem>>, vector<1x160xf32>
    %c0_34 = arith.constant 0 : index
    %c0_35 = arith.constant 0 : index
    %29 = vector.load %arg9[%c0_34, %c0_35] : memref<1x160xf32, #tpu.memory_space<vmem>>, vector<1x160xf32>
    %c0_36 = arith.constant 0 : index
    %c0_37 = arith.constant 0 : index
    %30 = vector.load %arg10[%c0_36, %c0_37] : memref<1x1xf32, #tpu.memory_space<vmem>>, vector<1x1xf32>
    %c1 = arith.constant 1 : index
    %c0_38 = arith.constant 0 : index
    %c0_39 = arith.constant 0 : index
    %31 = vector.load %arg20[%c1, %c0_38, %c0_39] : memref<5x2x160xf32, #tpu.memory_space<vmem>>, vector<1x2x160xf32>
    %32 = vector.shape_cast %31 : vector<1x2x160xf32> to vector<2x160xf32>
    %c0_40 = arith.constant 0 : index
    %c0_41 = arith.constant 0 : index
    %c0_42 = arith.constant 0 : index
    %33 = vector.load %arg21[%c0_40, %c0_41, %c0_42] : memref<5x2x160xf32, #tpu.memory_space<vmem>>, vector<1x2x160xf32>
    %34 = vector.shape_cast %33 : vector<1x2x160xf32> to vector<2x160xf32>
    %35 = arith.addf %32, %34 : vector<2x160xf32>
    %36 = vector.broadcast %28 : vector<1x160xf32> to vector<2x160xf32>
    %37 = arith.addf %35, %36 : vector<2x160xf32>
    %cst_43 = arith.constant 0.000000e+00 : f32
    %38 = vector.broadcast %cst_43 : f32 to vector<2x160xf32>
    %39 = arith.maximumf %37, %38 : vector<2x160xf32>
    %40 = vector.broadcast %29 : vector<1x160xf32> to vector<2x160xf32>
    %41 = arith.mulf %39, %40 : vector<2x160xf32>
    %cst_44 = arith.constant dense<0.000000e+00> : vector<2xf32>
    %42 = vector.multi_reduction <add>, %41, %cst_44 [1] : vector<2x160xf32> to vector<2xf32>
    %43 = vector.shape_cast %42 : vector<2xf32> to vector<2x1xf32>
    %44 = vector.broadcast %30 : vector<1x1xf32> to vector<2x1xf32>
    %45 = arith.addf %43, %44 : vector<2x1xf32>
    %cst_45 = arith.constant 0.000000e+00 : f32
    %46 = vector.broadcast %cst_45 : f32 to vector<2x1xf32>
    %47 = arith.subf %46, %45 : vector<2x1xf32>
    %48 = math.exp %47 : vector<2x1xf32>
    %cst_46 = arith.constant 1.000000e+00 : f32
    %49 = vector.broadcast %cst_46 : f32 to vector<2x1xf32>
    %50 = arith.addf %49, %48 : vector<2x1xf32>
    %cst_47 = arith.constant 1.000000e+00 : f32
    %51 = vector.broadcast %cst_47 : f32 to vector<2x1xf32>
    %52 = arith.divf %51, %50 : vector<2x1xf32>
    %cst_48 = arith.constant 1.000000e+00 : f32
    %53 = vector.broadcast %cst_48 : f32 to vector<2x1xf32>
    %54 = arith.addf %53, %52 : vector<2x1xf32>
    %55 = vector.broadcast %54 : vector<2x1xf32> to vector<2x160xf32>
    %56 = arith.mulf %39, %55 : vector<2x160xf32>
    %c1_49 = arith.constant 1 : index
    %c0_50 = arith.constant 0 : index
    %c0_51 = arith.constant 0 : index
    %57 = vector.load %arg22[%c1_49, %c0_50, %c0_51] : memref<5x2x160xf32, #tpu.memory_space<vmem>>, vector<1x2x160xf32>
    %58 = vector.shape_cast %57 : vector<1x2x160xf32> to vector<2x160xf32>
    %59 = arith.addf %58, %56 : vector<2x160xf32>
    %c1_52 = arith.constant 1 : index
    %c0_53 = arith.constant 0 : index
    %c0_54 = arith.constant 0 : index
    %60 = vector.load %arg22[%c1_52, %c0_53, %c0_54] : memref<5x2x160xf32, #tpu.memory_space<vmem>>, vector<1x2x160xf32>
    %61 = vector.shape_cast %60 : vector<1x2x160xf32> to vector<2x160xf32>
    %62 = vector.shape_cast %59 : vector<2x160xf32> to vector<1x2x160xf32>
    tpu.vector_store %arg22[%c1_52, %c0_53, %c0_54], %62 {strides = array<i32>} : memref<5x2x160xf32, #tpu.memory_space<vmem>>, vector<1x2x160xf32>,
    %c0_55 = arith.constant 0 : index
    %c0_56 = arith.constant 0 : index
    %c0_57 = arith.constant 0 : index
    %63 = vector.load %arg22[%c0_55, %c0_56, %c0_57] : memref<5x2x160xf32, #tpu.memory_space<vmem>>, vector<1x2x160xf32>
    %64 = vector.shape_cast %63 : vector<1x2x160xf32> to vector<2x160xf32>
    %65 = arith.addf %64, %56 : vector<2x160xf32>
    %c0_58 = arith.constant 0 : index
    %c0_59 = arith.constant 0 : index
    %c0_60 = arith.constant 0 : index
    %66 = vector.load %arg22[%c0_58, %c0_59, %c0_60] : memref<5x2x160xf32, #tpu.memory_space<vmem>>, vector<1x2x160xf32>
    %67 = vector.shape_cast %66 : vector<1x2x160xf32> to vector<2x160xf32>
    %68 = vector.shape_cast %65 : vector<2x160xf32> to vector<1x2x160xf32>
    tpu.vector_store %arg22[%c0_58, %c0_59, %c0_60], %68 {strides = array<i32>} : memref<5x2x160xf32, #tpu.memory_space<vmem>>, vector<1x2x160xf32>,
    %c2 = arith.constant 2 : index
    %c0_61 = arith.constant 0 : index
    %c0_62 = arith.constant 0 : index
    %69 = vector.load %arg20[%c2, %c0_61, %c0_62] : memref<5x2x160xf32, #tpu.memory_space<vmem>>, vector<1x2x160xf32>
    %70 = vector.shape_cast %69 : vector<1x2x160xf32> to vector<2x160xf32>
    %c0_63 = arith.constant 0 : index
    %c0_64 = arith.constant 0 : index
    %c0_65 = arith.constant 0 : index
    %71 = vector.load %arg21[%c0_63, %c0_64, %c0_65] : memref<5x2x160xf32, #tpu.memory_space<vmem>>, vector<1x2x160xf32>
    %72 = vector.shape_cast %71 : vector<1x2x160xf32> to vector<2x160xf32>
    %73 = arith.addf %70, %72 : vector<2x160xf32>
    %74 = vector.broadcast %28 : vector<1x160xf32> to vector<2x160xf32>
    %75 = arith.addf %73, %74 : vector<2x160xf32>
    %cst_66 = arith.constant 0.000000e+00 : f32
    %76 = vector.broadcast %cst_66 : f32 to vector<2x160xf32>
    %77 = arith.maximumf %75, %76 : vector<2x160xf32>
    %78 = vector.broadcast %29 : vector<1x160xf32> to vector<2x160xf32>
    %79 = arith.mulf %77, %78 : vector<2x160xf32>
    %cst_67 = arith.constant dense<0.000000e+00> : vector<2xf32>
    %80 = vector.multi_reduction <add>, %79, %cst_67 [1] : vector<2x160xf32> to vector<2xf32>
    %81 = vector.shape_cast %80 : vector<2xf32> to vector<2x1xf32>
    %82 = vector.broadcast %30 : vector<1x1xf32> to vector<2x1xf32>
    %83 = arith.addf %81, %82 : vector<2x1xf32>
    %cst_68 = arith.constant 0.000000e+00 : f32
    %84 = vector.broadcast %cst_68 : f32 to vector<2x1xf32>
    %85 = arith.subf %84, %83 : vector<2x1xf32>
    %86 = math.exp %85 : vector<2x1xf32>
    %cst_69 = arith.constant 1.000000e+00 : f32
    %87 = vector.broadcast %cst_69 : f32 to vector<2x1xf32>
    %88 = arith.addf %87, %86 : vector<2x1xf32>
    %cst_70 = arith.constant 1.000000e+00 : f32
    %89 = vector.broadcast %cst_70 : f32 to vector<2x1xf32>
    %90 = arith.divf %89, %88 : vector<2x1xf32>
    %cst_71 = arith.constant 1.000000e+00 : f32
    %91 = vector.broadcast %cst_71 : f32 to vector<2x1xf32>
    %92 = arith.addf %91, %90 : vector<2x1xf32>
    %93 = vector.broadcast %92 : vector<2x1xf32> to vector<2x160xf32>
    %94 = arith.mulf %77, %93 : vector<2x160xf32>
    %c2_72 = arith.constant 2 : index
    %c0_73 = arith.constant 0 : index
    %c0_74 = arith.constant 0 : index
    %95 = vector.load %arg22[%c2_72, %c0_73, %c0_74] : memref<5x2x160xf32, #tpu.memory_space<vmem>>, vector<1x2x160xf32>
    %96 = vector.shape_cast %95 : vector<1x2x160xf32> to vector<2x160xf32>
    %97 = arith.addf %96, %94 : vector<2x160xf32>
    %c2_75 = arith.constant 2 : index
    %c0_76 = arith.constant 0 : index
    %c0_77 = arith.constant 0 : index
    %98 = vector.load %arg22[%c2_75, %c0_76, %c0_77] : memref<5x2x160xf32, #tpu.memory_space<vmem>>, vector<1x2x160xf32>
    %99 = vector.shape_cast %98 : vector<1x2x160xf32> to vector<2x160xf32>
    %100 = vector.shape_cast %97 : vector<2x160xf32> to vector<1x2x160xf32>
    tpu.vector_store %arg22[%c2_75, %c0_76, %c0_77], %100 {strides = array<i32>} : memref<5x2x160xf32, #tpu.memory_space<vmem>>, vector<1x2x160xf32>,
    %c0_78 = arith.constant 0 : index
    %c0_79 = arith.constant 0 : index
    %c0_80 = arith.constant 0 : index
    %101 = vector.load %arg22[%c0_78, %c0_79, %c0_80] : memref<5x2x160xf32, #tpu.memory_space<vmem>>, vector<1x2x160xf32>
    %102 = vector.shape_cast %101 : vector<1x2x160xf32> to vector<2x160xf32>
    %103 = arith.addf %102, %94 : vector<2x160xf32>
    %c0_81 = arith.constant 0 : index
    %c0_82 = arith.constant 0 : index
    %c0_83 = arith.constant 0 : index
    %104 = vector.load %arg22[%c0_81, %c0_82, %c0_83] : memref<5x2x160xf32, #tpu.memory_space<vmem>>, vector<1x2x160xf32>
    %105 = vector.shape_cast %104 : vector<1x2x160xf32> to vector<2x160xf32>
    %106 = vector.shape_cast %103 : vector<2x160xf32> to vector<1x2x160xf32>
    tpu.vector_store %arg22[%c0_81, %c0_82, %c0_83], %106 {strides = array<i32>} : memref<5x2x160xf32, #tpu.memory_space<vmem>>, vector<1x2x160xf32>,
    %c3 = arith.constant 3 : index
    %c0_84 = arith.constant 0 : index
    %c0_85 = arith.constant 0 : index
    %107 = vector.load %arg20[%c3, %c0_84, %c0_85] : memref<5x2x160xf32, #tpu.memory_space<vmem>>, vector<1x2x160xf32>
    %108 = vector.shape_cast %107 : vector<1x2x160xf32> to vector<2x160xf32>
    %c0_86 = arith.constant 0 : index
    %c0_87 = arith.constant 0 : index
    %c0_88 = arith.constant 0 : index
    %109 = vector.load %arg21[%c0_86, %c0_87, %c0_88] : memref<5x2x160xf32, #tpu.memory_space<vmem>>, vector<1x2x160xf32>
    %110 = vector.shape_cast %109 : vector<1x2x160xf32> to vector<2x160xf32>
    %111 = arith.addf %108, %110 : vector<2x160xf32>
    %112 = vector.broadcast %28 : vector<1x160xf32> to vector<2x160xf32>
    %113 = arith.addf %111, %112 : vector<2x160xf32>
    %cst_89 = arith.constant 0.000000e+00 : f32
    %114 = vector.broadcast %cst_89 : f32 to vector<2x160xf32>
    %115 = arith.maximumf %113, %114 : vector<2x160xf32>
    %116 = vector.broadcast %29 : vector<1x160xf32> to vector<2x160xf32>
    %117 = arith.mulf %115, %116 : vector<2x160xf32>
    %cst_90 = arith.constant dense<0.000000e+00> : vector<2xf32>
    %118 = vector.multi_reduction <add>, %117, %cst_90 [1] : vector<2x160xf32> to vector<2xf32>
    %119 = vector.shape_cast %118 : vector<2xf32> to vector<2x1xf32>
    %120 = vector.broadcast %30 : vector<1x1xf32> to vector<2x1xf32>
    %121 = arith.addf %119, %120 : vector<2x1xf32>
    %cst_91 = arith.constant 0.000000e+00 : f32
    %122 = vector.broadcast %cst_91 : f32 to vector<2x1xf32>
    %123 = arith.subf %122, %121 : vector<2x1xf32>
    %124 = math.exp %123 : vector<2x1xf32>
    %cst_92 = arith.constant 1.000000e+00 : f32
    %125 = vector.broadcast %cst_92 : f32 to vector<2x1xf32>
    %126 = arith.addf %125, %124 : vector<2x1xf32>
    %cst_93 = arith.constant 1.000000e+00 : f32
    %127 = vector.broadcast %cst_93 : f32 to vector<2x1xf32>
    %128 = arith.divf %127, %126 : vector<2x1xf32>
    %cst_94 = arith.constant 1.000000e+00 : f32
    %129 = vector.broadcast %cst_94 : f32 to vector<2x1xf32>
    %130 = arith.addf %129, %128 : vector<2x1xf32>
    %131 = vector.broadcast %130 : vector<2x1xf32> to vector<2x160xf32>
    %132 = arith.mulf %115, %131 : vector<2x160xf32>
    %c3_95 = arith.constant 3 : index
    %c0_96 = arith.constant 0 : index
    %c0_97 = arith.constant 0 : index
    %133 = vector.load %arg22[%c3_95, %c0_96, %c0_97] : memref<5x2x160xf32, #tpu.memory_space<vmem>>, vector<1x2x160xf32>
    %134 = vector.shape_cast %133 : vector<1x2x160xf32> to vector<2x160xf32>
    %135 = arith.addf %134, %132 : vector<2x160xf32>
    %c3_98 = arith.constant 3 : index
    %c0_99 = arith.constant 0 : index
    %c0_100 = arith.constant 0 : index
    %136 = vector.load %arg22[%c3_98, %c0_99, %c0_100] : memref<5x2x160xf32, #tpu.memory_space<vmem>>, vector<1x2x160xf32>
    %137 = vector.shape_cast %136 : vector<1x2x160xf32> to vector<2x160xf32>
    %138 = vector.shape_cast %135 : vector<2x160xf32> to vector<1x2x160xf32>
    tpu.vector_store %arg22[%c3_98, %c0_99, %c0_100], %138 {strides = array<i32>} : memref<5x2x160xf32, #tpu.memory_space<vmem>>, vector<1x2x160xf32>,
    %c0_101 = arith.constant 0 : index
    %c0_102 = arith.constant 0 : index
    %c0_103 = arith.constant 0 : index
    %139 = vector.load %arg22[%c0_101, %c0_102, %c0_103] : memref<5x2x160xf32, #tpu.memory_space<vmem>>, vector<1x2x160xf32>
    %140 = vector.shape_cast %139 : vector<1x2x160xf32> to vector<2x160xf32>
    %141 = arith.addf %140, %132 : vector<2x160xf32>
    %c0_104 = arith.constant 0 : index
    %c0_105 = arith.constant 0 : index
    %c0_106 = arith.constant 0 : index
    %142 = vector.load %arg22[%c0_104, %c0_105, %c0_106] : memref<5x2x160xf32, #tpu.memory_space<vmem>>, vector<1x2x160xf32>
    %143 = vector.shape_cast %142 : vector<1x2x160xf32> to vector<2x160xf32>
    %144 = vector.shape_cast %141 : vector<2x160xf32> to vector<1x2x160xf32>
    tpu.vector_store %arg22[%c0_104, %c0_105, %c0_106], %144 {strides = array<i32>} : memref<5x2x160xf32, #tpu.memory_space<vmem>>, vector<1x2x160xf32>,
    %c4 = arith.constant 4 : index
    %c0_107 = arith.constant 0 : index
    %c0_108 = arith.constant 0 : index
    %145 = vector.load %arg20[%c4, %c0_107, %c0_108] : memref<5x2x160xf32, #tpu.memory_space<vmem>>, vector<1x2x160xf32>
    %146 = vector.shape_cast %145 : vector<1x2x160xf32> to vector<2x160xf32>
    %c0_109 = arith.constant 0 : index
    %c0_110 = arith.constant 0 : index
    %c0_111 = arith.constant 0 : index
    %147 = vector.load %arg21[%c0_109, %c0_110, %c0_111] : memref<5x2x160xf32, #tpu.memory_space<vmem>>, vector<1x2x160xf32>
    %148 = vector.shape_cast %147 : vector<1x2x160xf32> to vector<2x160xf32>
    %149 = arith.addf %146, %148 : vector<2x160xf32>
    %150 = vector.broadcast %28 : vector<1x160xf32> to vector<2x160xf32>
    %151 = arith.addf %149, %150 : vector<2x160xf32>
    %cst_112 = arith.constant 0.000000e+00 : f32
    %152 = vector.broadcast %cst_112 : f32 to vector<2x160xf32>
    %153 = arith.maximumf %151, %152 : vector<2x160xf32>
    %154 = vector.broadcast %29 : vector<1x160xf32> to vector<2x160xf32>
    %155 = arith.mulf %153, %154 : vector<2x160xf32>
    %cst_113 = arith.constant dense<0.000000e+00> : vector<2xf32>
    %156 = vector.multi_reduction <add>, %155, %cst_113 [1] : vector<2x160xf32> to vector<2xf32>
    %157 = vector.shape_cast %156 : vector<2xf32> to vector<2x1xf32>
    %158 = vector.broadcast %30 : vector<1x1xf32> to vector<2x1xf32>
    %159 = arith.addf %157, %158 : vector<2x1xf32>
    %cst_114 = arith.constant 0.000000e+00 : f32
    %160 = vector.broadcast %cst_114 : f32 to vector<2x1xf32>
    %161 = arith.subf %160, %159 : vector<2x1xf32>
    %162 = math.exp %161 : vector<2x1xf32>
    %cst_115 = arith.constant 1.000000e+00 : f32
    %163 = vector.broadcast %cst_115 : f32 to vector<2x1xf32>
    %164 = arith.addf %163, %162 : vector<2x1xf32>
    %cst_116 = arith.constant 1.000000e+00 : f32
    %165 = vector.broadcast %cst_116 : f32 to vector<2x1xf32>
    %166 = arith.divf %165, %164 : vector<2x1xf32>
    %cst_117 = arith.constant 1.000000e+00 : f32
    %167 = vector.broadcast %cst_117 : f32 to vector<2x1xf32>
    %168 = arith.addf %167, %166 : vector<2x1xf32>
    %169 = vector.broadcast %168 : vector<2x1xf32> to vector<2x160xf32>
    %170 = arith.mulf %153, %169 : vector<2x160xf32>
    %c4_118 = arith.constant 4 : index
    %c0_119 = arith.constant 0 : index
    %c0_120 = arith.constant 0 : index
    %171 = vector.load %arg22[%c4_118, %c0_119, %c0_120] : memref<5x2x160xf32, #tpu.memory_space<vmem>>, vector<1x2x160xf32>
    %172 = vector.shape_cast %171 : vector<1x2x160xf32> to vector<2x160xf32>
    %173 = arith.addf %172, %170 : vector<2x160xf32>
    %c4_121 = arith.constant 4 : index
    %c0_122 = arith.constant 0 : index
    %c0_123 = arith.constant 0 : index
    %174 = vector.load %arg22[%c4_121, %c0_122, %c0_123] : memref<5x2x160xf32, #tpu.memory_space<vmem>>, vector<1x2x160xf32>
    %175 = vector.shape_cast %174 : vector<1x2x160xf32> to vector<2x160xf32>
    %176 = vector.shape_cast %173 : vector<2x160xf32> to vector<1x2x160xf32>
    tpu.vector_store %arg22[%c4_121, %c0_122, %c0_123], %176 {strides = array<i32>} : memref<5x2x160xf32, #tpu.memory_space<vmem>>, vector<1x2x160xf32>,
    %c0_124 = arith.constant 0 : index
    %c0_125 = arith.constant 0 : index
    %c0_126 = arith.constant 0 : index
    %177 = vector.load %arg22[%c0_124, %c0_125, %c0_126] : memref<5x2x160xf32, #tpu.memory_space<vmem>>, vector<1x2x160xf32>
    %178 = vector.shape_cast %177 : vector<1x2x160xf32> to vector<2x160xf32>
    %179 = arith.addf %178, %170 : vector<2x160xf32>
    %c0_127 = arith.constant 0 : index
    %c0_128 = arith.constant 0 : index
    %c0_129 = arith.constant 0 : index
    %180 = vector.load %arg22[%c0_127, %c0_128, %c0_129] : memref<5x2x160xf32, #tpu.memory_space<vmem>>, vector<1x2x160xf32>
    %181 = vector.shape_cast %180 : vector<1x2x160xf32> to vector<2x160xf32>
    %182 = vector.shape_cast %179 : vector<2x160xf32> to vector<1x2x160xf32>
    tpu.vector_store %arg22[%c0_127, %c0_128, %c0_129], %182 {strides = array<i32>} : memref<5x2x160xf32, #tpu.memory_space<vmem>>, vector<1x2x160xf32>,
    %c0_130 = arith.constant 0 : index
    %c0_131 = arith.constant 0 : index
    %c0_132 = arith.constant 0 : index
    %183 = vector.load %arg20[%c0_130, %c0_131, %c0_132] : memref<5x2x160xf32, #tpu.memory_space<vmem>>, vector<1x2x160xf32>
    %184 = vector.shape_cast %183 : vector<1x2x160xf32> to vector<2x160xf32>
    %c1_133 = arith.constant 1 : index
    %c0_134 = arith.constant 0 : index
    %c0_135 = arith.constant 0 : index
    %185 = vector.load %arg21[%c1_133, %c0_134, %c0_135] : memref<5x2x160xf32, #tpu.memory_space<vmem>>, vector<1x2x160xf32>
    %186 = vector.shape_cast %185 : vector<1x2x160xf32> to vector<2x160xf32>
    %187 = arith.addf %184, %186 : vector<2x160xf32>
    %188 = vector.broadcast %28 : vector<1x160xf32> to vector<2x160xf32>
    %189 = arith.addf %187, %188 : vector<2x160xf32>
    %cst_136 = arith.constant 0.000000e+00 : f32
    %190 = vector.broadcast %cst_136 : f32 to vector<2x160xf32>
    %191 = arith.maximumf %189, %190 : vector<2x160xf32>
    %192 = vector.broadcast %29 : vector<1x160xf32> to vector<2x160xf32>
    %193 = arith.mulf %191, %192 : vector<2x160xf32>
    %cst_137 = arith.constant dense<0.000000e+00> : vector<2xf32>
    %194 = vector.multi_reduction <add>, %193, %cst_137 [1] : vector<2x160xf32> to vector<2xf32>
    %195 = vector.shape_cast %194 : vector<2xf32> to vector<2x1xf32>
    %196 = vector.broadcast %30 : vector<1x1xf32> to vector<2x1xf32>
    %197 = arith.addf %195, %196 : vector<2x1xf32>
    %cst_138 = arith.constant 0.000000e+00 : f32
    %198 = vector.broadcast %cst_138 : f32 to vector<2x1xf32>
    %199 = arith.subf %198, %197 : vector<2x1xf32>
    %200 = math.exp %199 : vector<2x1xf32>
    %cst_139 = arith.constant 1.000000e+00 : f32
    %201 = vector.broadcast %cst_139 : f32 to vector<2x1xf32>
    %202 = arith.addf %201, %200 : vector<2x1xf32>
    %cst_140 = arith.constant 1.000000e+00 : f32
    %203 = vector.broadcast %cst_140 : f32 to vector<2x1xf32>
    %204 = arith.divf %203, %202 : vector<2x1xf32>
    %cst_141 = arith.constant 1.000000e+00 : f32
    %205 = vector.broadcast %cst_141 : f32 to vector<2x1xf32>
    %206 = arith.addf %205, %204 : vector<2x1xf32>
    %207 = vector.broadcast %206 : vector<2x1xf32> to vector<2x160xf32>
    %208 = arith.mulf %191, %207 : vector<2x160xf32>
    %c0_142 = arith.constant 0 : index
    %c0_143 = arith.constant 0 : index
    %c0_144 = arith.constant 0 : index
    %209 = vector.load %arg22[%c0_142, %c0_143, %c0_144] : memref<5x2x160xf32, #tpu.memory_space<vmem>>, vector<1x2x160xf32>
    %210 = vector.shape_cast %209 : vector<1x2x160xf32> to vector<2x160xf32>
    %211 = arith.addf %210, %208 : vector<2x160xf32>
    %c0_145 = arith.constant 0 : index
    %c0_146 = arith.constant 0 : index
    %c0_147 = arith.constant 0 : index
    %212 = vector.load %arg22[%c0_145, %c0_146, %c0_147] : memref<5x2x160xf32, #tpu.memory_space<vmem>>, vector<1x2x160xf32>
    %213 = vector.shape_cast %212 : vector<1x2x160xf32> to vector<2x160xf32>
    %214 = vector.shape_cast %211 : vector<2x160xf32> to vector<1x2x160xf32>
    tpu.vector_store %arg22[%c0_145, %c0_146, %c0_147], %214 {strides = array<i32>} : memref<5x2x160xf32, #tpu.memory_space<vmem>>, vector<1x2x160xf32>,
    %c1_148 = arith.constant 1 : index
    %c0_149 = arith.constant 0 : index
    %c0_150 = arith.constant 0 : index
    %215 = vector.load %arg22[%c1_148, %c0_149, %c0_150] : memref<5x2x160xf32, #tpu.memory_space<vmem>>, vector<1x2x160xf32>
    %216 = vector.shape_cast %215 : vector<1x2x160xf32> to vector<2x160xf32>
    %217 = arith.addf %216, %208 : vector<2x160xf32>
    %c1_151 = arith.constant 1 : index
    %c0_152 = arith.constant 0 : index
    %c0_153 = arith.constant 0 : index
    %218 = vector.load %arg22[%c1_151, %c0_152, %c0_153] : memref<5x2x160xf32, #tpu.memory_space<vmem>>, vector<1x2x160xf32>
    %219 = vector.shape_cast %218 : vector<1x2x160xf32> to vector<2x160xf32>
    %220 = vector.shape_cast %217 : vector<2x160xf32> to vector<1x2x160xf32>
    tpu.vector_store %arg22[%c1_151, %c0_152, %c0_153], %220 {strides = array<i32>} : memref<5x2x160xf32, #tpu.memory_space<vmem>>, vector<1x2x160xf32>,
    %c2_154 = arith.constant 2 : index
    %c0_155 = arith.constant 0 : index
    %c0_156 = arith.constant 0 : index
    %221 = vector.load %arg20[%c2_154, %c0_155, %c0_156] : memref<5x2x160xf32, #tpu.memory_space<vmem>>, vector<1x2x160xf32>
    %222 = vector.shape_cast %221 : vector<1x2x160xf32> to vector<2x160xf32>
    %c1_157 = arith.constant 1 : index
    %c0_158 = arith.constant 0 : index
    %c0_159 = arith.constant 0 : index
    %223 = vector.load %arg21[%c1_157, %c0_158, %c0_159] : memref<5x2x160xf32, #tpu.memory_space<vmem>>, vector<1x2x160xf32>
    %224 = vector.shape_cast %223 : vector<1x2x160xf32> to vector<2x160xf32>
    %225 = arith.addf %222, %224 : vector<2x160xf32>
    %226 = vector.broadcast %28 : vector<1x160xf32> to vector<2x160xf32>
    %227 = arith.addf %225, %226 : vector<2x160xf32>
    %cst_160 = arith.constant 0.000000e+00 : f32
    %228 = vector.broadcast %cst_160 : f32 to vector<2x160xf32>
    %229 = arith.maximumf %227, %228 : vector<2x160xf32>
    %230 = vector.broadcast %29 : vector<1x160xf32> to vector<2x160xf32>
    %231 = arith.mulf %229, %230 : vector<2x160xf32>
    %cst_161 = arith.constant dense<0.000000e+00> : vector<2xf32>
    %232 = vector.multi_reduction <add>, %231, %cst_161 [1] : vector<2x160xf32> to vector<2xf32>
    %233 = vector.shape_cast %232 : vector<2xf32> to vector<2x1xf32>
    %234 = vector.broadcast %30 : vector<1x1xf32> to vector<2x1xf32>
    %235 = arith.addf %233, %234 : vector<2x1xf32>
    %cst_162 = arith.constant 0.000000e+00 : f32
    %236 = vector.broadcast %cst_162 : f32 to vector<2x1xf32>
    %237 = arith.subf %236, %235 : vector<2x1xf32>
    %238 = math.exp %237 : vector<2x1xf32>
    %cst_163 = arith.constant 1.000000e+00 : f32
    %239 = vector.broadcast %cst_163 : f32 to vector<2x1xf32>
    %240 = arith.addf %239, %238 : vector<2x1xf32>
    %cst_164 = arith.constant 1.000000e+00 : f32
    %241 = vector.broadcast %cst_164 : f32 to vector<2x1xf32>
    %242 = arith.divf %241, %240 : vector<2x1xf32>
    %cst_165 = arith.constant 1.000000e+00 : f32
    %243 = vector.broadcast %cst_165 : f32 to vector<2x1xf32>
    %244 = arith.addf %243, %242 : vector<2x1xf32>
    %245 = vector.broadcast %244 : vector<2x1xf32> to vector<2x160xf32>
    %246 = arith.mulf %229, %245 : vector<2x160xf32>
    %c2_166 = arith.constant 2 : index
    %c0_167 = arith.constant 0 : index
    %c0_168 = arith.constant 0 : index
    %247 = vector.load %arg22[%c2_166, %c0_167, %c0_168] : memref<5x2x160xf32, #tpu.memory_space<vmem>>, vector<1x2x160xf32>
    %248 = vector.shape_cast %247 : vector<1x2x160xf32> to vector<2x160xf32>
    %249 = arith.addf %248, %246 : vector<2x160xf32>
    %c2_169 = arith.constant 2 : index
    %c0_170 = arith.constant 0 : index
    %c0_171 = arith.constant 0 : index
    %250 = vector.load %arg22[%c2_169, %c0_170, %c0_171] : memref<5x2x160xf32, #tpu.memory_space<vmem>>, vector<1x2x160xf32>
    %251 = vector.shape_cast %250 : vector<1x2x160xf32> to vector<2x160xf32>
    %252 = vector.shape_cast %249 : vector<2x160xf32> to vector<1x2x160xf32>
    tpu.vector_store %arg22[%c2_169, %c0_170, %c0_171], %252 {strides = array<i32>} : memref<5x2x160xf32, #tpu.memory_space<vmem>>, vector<1x2x160xf32>,
    %c1_172 = arith.constant 1 : index
    %c0_173 = arith.constant 0 : index
    %c0_174 = arith.constant 0 : index
    %253 = vector.load %arg22[%c1_172, %c0_173, %c0_174] : memref<5x2x160xf32, #tpu.memory_space<vmem>>, vector<1x2x160xf32>
    %254 = vector.shape_cast %253 : vector<1x2x160xf32> to vector<2x160xf32>
    %255 = arith.addf %254, %246 : vector<2x160xf32>
    %c1_175 = arith.constant 1 : index
    %c0_176 = arith.constant 0 : index
    %c0_177 = arith.constant 0 : index
    %256 = vector.load %arg22[%c1_175, %c0_176, %c0_177] : memref<5x2x160xf32, #tpu.memory_space<vmem>>, vector<1x2x160xf32>
    %257 = vector.shape_cast %256 : vector<1x2x160xf32> to vector<2x160xf32>
    %258 = vector.shape_cast %255 : vector<2x160xf32> to vector<1x2x160xf32>
    tpu.vector_store %arg22[%c1_175, %c0_176, %c0_177], %258 {strides = array<i32>} : memref<5x2x160xf32, #tpu.memory_space<vmem>>, vector<1x2x160xf32>,
    %c3_178 = arith.constant 3 : index
    %c0_179 = arith.constant 0 : index
    %c0_180 = arith.constant 0 : index
    %259 = vector.load %arg20[%c3_178, %c0_179, %c0_180] : memref<5x2x160xf32, #tpu.memory_space<vmem>>, vector<1x2x160xf32>
    %260 = vector.shape_cast %259 : vector<1x2x160xf32> to vector<2x160xf32>
    %c1_181 = arith.constant 1 : index
    %c0_182 = arith.constant 0 : index
    %c0_183 = arith.constant 0 : index
    %261 = vector.load %arg21[%c1_181, %c0_182, %c0_183] : memref<5x2x160xf32, #tpu.memory_space<vmem>>, vector<1x2x160xf32>
    %262 = vector.shape_cast %261 : vector<1x2x160xf32> to vector<2x160xf32>
    %263 = arith.addf %260, %262 : vector<2x160xf32>
    %264 = vector.broadcast %28 : vector<1x160xf32> to vector<2x160xf32>
    %265 = arith.addf %263, %264 : vector<2x160xf32>
    %cst_184 = arith.constant 0.000000e+00 : f32
    %266 = vector.broadcast %cst_184 : f32 to vector<2x160xf32>
    %267 = arith.maximumf %265, %266 : vector<2x160xf32>
    %268 = vector.broadcast %29 : vector<1x160xf32> to vector<2x160xf32>
    %269 = arith.mulf %267, %268 : vector<2x160xf32>
    %cst_185 = arith.constant dense<0.000000e+00> : vector<2xf32>
    %270 = vector.multi_reduction <add>, %269, %cst_185 [1] : vector<2x160xf32> to vector<2xf32>
    %271 = vector.shape_cast %270 : vector<2xf32> to vector<2x1xf32>
    %272 = vector.broadcast %30 : vector<1x1xf32> to vector<2x1xf32>
    %273 = arith.addf %271, %272 : vector<2x1xf32>
    %cst_186 = arith.constant 0.000000e+00 : f32
    %274 = vector.broadcast %cst_186 : f32 to vector<2x1xf32>
    %275 = arith.subf %274, %273 : vector<2x1xf32>
    %276 = math.exp %275 : vector<2x1xf32>
    %cst_187 = arith.constant 1.000000e+00 : f32
    %277 = vector.broadcast %cst_187 : f32 to vector<2x1xf32>
    %278 = arith.addf %277, %276 : vector<2x1xf32>
    %cst_188 = arith.constant 1.000000e+00 : f32
    %279 = vector.broadcast %cst_188 : f32 to vector<2x1xf32>
    %280 = arith.divf %279, %278 : vector<2x1xf32>
    %cst_189 = arith.constant 1.000000e+00 : f32
    %281 = vector.broadcast %cst_189 : f32 to vector<2x1xf32>
    %282 = arith.addf %281, %280 : vector<2x1xf32>
    %283 = vector.broadcast %282 : vector<2x1xf32> to vector<2x160xf32>
    %284 = arith.mulf %267, %283 : vector<2x160xf32>
    %c3_190 = arith.constant 3 : index
    %c0_191 = arith.constant 0 : index
    %c0_192 = arith.constant 0 : index
    %285 = vector.load %arg22[%c3_190, %c0_191, %c0_192] : memref<5x2x160xf32, #tpu.memory_space<vmem>>, vector<1x2x160xf32>
    %286 = vector.shape_cast %285 : vector<1x2x160xf32> to vector<2x160xf32>
    %287 = arith.addf %286, %284 : vector<2x160xf32>
    %c3_193 = arith.constant 3 : index
    %c0_194 = arith.constant 0 : index
    %c0_195 = arith.constant 0 : index
    %288 = vector.load %arg22[%c3_193, %c0_194, %c0_195] : memref<5x2x160xf32, #tpu.memory_space<vmem>>, vector<1x2x160xf32>
    %289 = vector.shape_cast %288 : vector<1x2x160xf32> to vector<2x160xf32>
    %290 = vector.shape_cast %287 : vector<2x160xf32> to vector<1x2x160xf32>
    tpu.vector_store %arg22[%c3_193, %c0_194, %c0_195], %290 {strides = array<i32>} : memref<5x2x160xf32, #tpu.memory_space<vmem>>, vector<1x2x160xf32>,
    %c1_196 = arith.constant 1 : index
    %c0_197 = arith.constant 0 : index
    %c0_198 = arith.constant 0 : index
    %291 = vector.load %arg22[%c1_196, %c0_197, %c0_198] : memref<5x2x160xf32, #tpu.memory_space<vmem>>, vector<1x2x160xf32>
    %292 = vector.shape_cast %291 : vector<1x2x160xf32> to vector<2x160xf32>
    %293 = arith.addf %292, %284 : vector<2x160xf32>
    %c1_199 = arith.constant 1 : index
    %c0_200 = arith.constant 0 : index
    %c0_201 = arith.constant 0 : index
    %294 = vector.load %arg22[%c1_199, %c0_200, %c0_201] : memref<5x2x160xf32, #tpu.memory_space<vmem>>, vector<1x2x160xf32>
    %295 = vector.shape_cast %294 : vector<1x2x160xf32> to vector<2x160xf32>
    %296 = vector.shape_cast %293 : vector<2x160xf32> to vector<1x2x160xf32>
    tpu.vector_store %arg22[%c1_199, %c0_200, %c0_201], %296 {strides = array<i32>} : memref<5x2x160xf32, #tpu.memory_space<vmem>>, vector<1x2x160xf32>,
    %c4_202 = arith.constant 4 : index
    %c0_203 = arith.constant 0 : index
    %c0_204 = arith.constant 0 : index
    %297 = vector.load %arg20[%c4_202, %c0_203, %c0_204] : memref<5x2x160xf32, #tpu.memory_space<vmem>>, vector<1x2x160xf32>
    %298 = vector.shape_cast %297 : vector<1x2x160xf32> to vector<2x160xf32>
    %c1_205 = arith.constant 1 : index
    %c0_206 = arith.constant 0 : index
    %c0_207 = arith.constant 0 : index
    %299 = vector.load %arg21[%c1_205, %c0_206, %c0_207] : memref<5x2x160xf32, #tpu.memory_space<vmem>>, vector<1x2x160xf32>
    %300 = vector.shape_cast %299 : vector<1x2x160xf32> to vector<2x160xf32>
    %301 = arith.addf %298, %300 : vector<2x160xf32>
    %302 = vector.broadcast %28 : vector<1x160xf32> to vector<2x160xf32>
    %303 = arith.addf %301, %302 : vector<2x160xf32>
    %cst_208 = arith.constant 0.000000e+00 : f32
    %304 = vector.broadcast %cst_208 : f32 to vector<2x160xf32>
    %305 = arith.maximumf %303, %304 : vector<2x160xf32>
    %306 = vector.broadcast %29 : vector<1x160xf32> to vector<2x160xf32>
    %307 = arith.mulf %305, %306 : vector<2x160xf32>
    %cst_209 = arith.constant dense<0.000000e+00> : vector<2xf32>
    %308 = vector.multi_reduction <add>, %307, %cst_209 [1] : vector<2x160xf32> to vector<2xf32>
    %309 = vector.shape_cast %308 : vector<2xf32> to vector<2x1xf32>
    %310 = vector.broadcast %30 : vector<1x1xf32> to vector<2x1xf32>
    %311 = arith.addf %309, %310 : vector<2x1xf32>
    %cst_210 = arith.constant 0.000000e+00 : f32
    %312 = vector.broadcast %cst_210 : f32 to vector<2x1xf32>
    %313 = arith.subf %312, %311 : vector<2x1xf32>
    %314 = math.exp %313 : vector<2x1xf32>
    %cst_211 = arith.constant 1.000000e+00 : f32
    %315 = vector.broadcast %cst_211 : f32 to vector<2x1xf32>
    %316 = arith.addf %315, %314 : vector<2x1xf32>
    %cst_212 = arith.constant 1.000000e+00 : f32
    %317 = vector.broadcast %cst_212 : f32 to vector<2x1xf32>
    %318 = arith.divf %317, %316 : vector<2x1xf32>
    %cst_213 = arith.constant 1.000000e+00 : f32
    %319 = vector.broadcast %cst_213 : f32 to vector<2x1xf32>
    %320 = arith.addf %319, %318 : vector<2x1xf32>
    %321 = vector.broadcast %320 : vector<2x1xf32> to vector<2x160xf32>
    %322 = arith.mulf %305, %321 : vector<2x160xf32>
    %c4_214 = arith.constant 4 : index
    %c0_215 = arith.constant 0 : index
    %c0_216 = arith.constant 0 : index
    %323 = vector.load %arg22[%c4_214, %c0_215, %c0_216] : memref<5x2x160xf32, #tpu.memory_space<vmem>>, vector<1x2x160xf32>
    %324 = vector.shape_cast %323 : vector<1x2x160xf32> to vector<2x160xf32>
    %325 = arith.addf %324, %322 : vector<2x160xf32>
    %c4_217 = arith.constant 4 : index
    %c0_218 = arith.constant 0 : index
    %c0_219 = arith.constant 0 : index
    %326 = vector.load %arg22[%c4_217, %c0_218, %c0_219] : memref<5x2x160xf32, #tpu.memory_space<vmem>>, vector<1x2x160xf32>
    %327 = vector.shape_cast %326 : vector<1x2x160xf32> to vector<2x160xf32>
    %328 = vector.shape_cast %325 : vector<2x160xf32> to vector<1x2x160xf32>
    tpu.vector_store %arg22[%c4_217, %c0_218, %c0_219], %328 {strides = array<i32>} : memref<5x2x160xf32, #tpu.memory_space<vmem>>, vector<1x2x160xf32>,
    %c1_220 = arith.constant 1 : index
    %c0_221 = arith.constant 0 : index
    %c0_222 = arith.constant 0 : index
    %329 = vector.load %arg22[%c1_220, %c0_221, %c0_222] : memref<5x2x160xf32, #tpu.memory_space<vmem>>, vector<1x2x160xf32>
    %330 = vector.shape_cast %329 : vector<1x2x160xf32> to vector<2x160xf32>
    %331 = arith.addf %330, %322 : vector<2x160xf32>
    %c1_223 = arith.constant 1 : index
    %c0_224 = arith.constant 0 : index
    %c0_225 = arith.constant 0 : index
    %332 = vector.load %arg22[%c1_223, %c0_224, %c0_225] : memref<5x2x160xf32, #tpu.memory_space<vmem>>, vector<1x2x160xf32>
    %333 = vector.shape_cast %332 : vector<1x2x160xf32> to vector<2x160xf32>
    %334 = vector.shape_cast %331 : vector<2x160xf32> to vector<1x2x160xf32>
    tpu.vector_store %arg22[%c1_223, %c0_224, %c0_225], %334 {strides = array<i32>} : memref<5x2x160xf32, #tpu.memory_space<vmem>>, vector<1x2x160xf32>,
    %c0_226 = arith.constant 0 : index
    %c0_227 = arith.constant 0 : index
    %c0_228 = arith.constant 0 : index
    %335 = vector.load %arg20[%c0_226, %c0_227, %c0_228] : memref<5x2x160xf32, #tpu.memory_space<vmem>>, vector<1x2x160xf32>
    %336 = vector.shape_cast %335 : vector<1x2x160xf32> to vector<2x160xf32>
    %c2_229 = arith.constant 2 : index
    %c0_230 = arith.constant 0 : index
    %c0_231 = arith.constant 0 : index
    %337 = vector.load %arg21[%c2_229, %c0_230, %c0_231] : memref<5x2x160xf32, #tpu.memory_space<vmem>>, vector<1x2x160xf32>
    %338 = vector.shape_cast %337 : vector<1x2x160xf32> to vector<2x160xf32>
    %339 = arith.addf %336, %338 : vector<2x160xf32>
    %340 = vector.broadcast %28 : vector<1x160xf32> to vector<2x160xf32>
    %341 = arith.addf %339, %340 : vector<2x160xf32>
    %cst_232 = arith.constant 0.000000e+00 : f32
    %342 = vector.broadcast %cst_232 : f32 to vector<2x160xf32>
    %343 = arith.maximumf %341, %342 : vector<2x160xf32>
    %344 = vector.broadcast %29 : vector<1x160xf32> to vector<2x160xf32>
    %345 = arith.mulf %343, %344 : vector<2x160xf32>
    %cst_233 = arith.constant dense<0.000000e+00> : vector<2xf32>
    %346 = vector.multi_reduction <add>, %345, %cst_233 [1] : vector<2x160xf32> to vector<2xf32>
    %347 = vector.shape_cast %346 : vector<2xf32> to vector<2x1xf32>
    %348 = vector.broadcast %30 : vector<1x1xf32> to vector<2x1xf32>
    %349 = arith.addf %347, %348 : vector<2x1xf32>
    %cst_234 = arith.constant 0.000000e+00 : f32
    %350 = vector.broadcast %cst_234 : f32 to vector<2x1xf32>
    %351 = arith.subf %350, %349 : vector<2x1xf32>
    %352 = math.exp %351 : vector<2x1xf32>
    %cst_235 = arith.constant 1.000000e+00 : f32
    %353 = vector.broadcast %cst_235 : f32 to vector<2x1xf32>
    %354 = arith.addf %353, %352 : vector<2x1xf32>
    %cst_236 = arith.constant 1.000000e+00 : f32
    %355 = vector.broadcast %cst_236 : f32 to vector<2x1xf32>
    %356 = arith.divf %355, %354 : vector<2x1xf32>
    %cst_237 = arith.constant 1.000000e+00 : f32
    %357 = vector.broadcast %cst_237 : f32 to vector<2x1xf32>
    %358 = arith.addf %357, %356 : vector<2x1xf32>
    %359 = vector.broadcast %358 : vector<2x1xf32> to vector<2x160xf32>
    %360 = arith.mulf %343, %359 : vector<2x160xf32>
    %c0_238 = arith.constant 0 : index
    %c0_239 = arith.constant 0 : index
    %c0_240 = arith.constant 0 : index
    %361 = vector.load %arg22[%c0_238, %c0_239, %c0_240] : memref<5x2x160xf32, #tpu.memory_space<vmem>>, vector<1x2x160xf32>
    %362 = vector.shape_cast %361 : vector<1x2x160xf32> to vector<2x160xf32>
    %363 = arith.addf %362, %360 : vector<2x160xf32>
    %c0_241 = arith.constant 0 : index
    %c0_242 = arith.constant 0 : index
    %c0_243 = arith.constant 0 : index
    %364 = vector.load %arg22[%c0_241, %c0_242, %c0_243] : memref<5x2x160xf32, #tpu.memory_space<vmem>>, vector<1x2x160xf32>
    %365 = vector.shape_cast %364 : vector<1x2x160xf32> to vector<2x160xf32>
    %366 = vector.shape_cast %363 : vector<2x160xf32> to vector<1x2x160xf32>
    tpu.vector_store %arg22[%c0_241, %c0_242, %c0_243], %366 {strides = array<i32>} : memref<5x2x160xf32, #tpu.memory_space<vmem>>, vector<1x2x160xf32>,
    %c2_244 = arith.constant 2 : index
    %c0_245 = arith.constant 0 : index
    %c0_246 = arith.constant 0 : index
    %367 = vector.load %arg22[%c2_244, %c0_245, %c0_246] : memref<5x2x160xf32, #tpu.memory_space<vmem>>, vector<1x2x160xf32>
    %368 = vector.shape_cast %367 : vector<1x2x160xf32> to vector<2x160xf32>
    %369 = arith.addf %368, %360 : vector<2x160xf32>
    %c2_247 = arith.constant 2 : index
    %c0_248 = arith.constant 0 : index
    %c0_249 = arith.constant 0 : index
    %370 = vector.load %arg22[%c2_247, %c0_248, %c0_249] : memref<5x2x160xf32, #tpu.memory_space<vmem>>, vector<1x2x160xf32>
    %371 = vector.shape_cast %370 : vector<1x2x160xf32> to vector<2x160xf32>
    %372 = vector.shape_cast %369 : vector<2x160xf32> to vector<1x2x160xf32>
    tpu.vector_store %arg22[%c2_247, %c0_248, %c0_249], %372 {strides = array<i32>} : memref<5x2x160xf32, #tpu.memory_space<vmem>>, vector<1x2x160xf32>,
    %c1_250 = arith.constant 1 : index
    %c0_251 = arith.constant 0 : index
    %c0_252 = arith.constant 0 : index
    %373 = vector.load %arg20[%c1_250, %c0_251, %c0_252] : memref<5x2x160xf32, #tpu.memory_space<vmem>>, vector<1x2x160xf32>
    %374 = vector.shape_cast %373 : vector<1x2x160xf32> to vector<2x160xf32>
    %c2_253 = arith.constant 2 : index
    %c0_254 = arith.constant 0 : index
    %c0_255 = arith.constant 0 : index
    %375 = vector.load %arg21[%c2_253, %c0_254, %c0_255] : memref<5x2x160xf32, #tpu.memory_space<vmem>>, vector<1x2x160xf32>
    %376 = vector.shape_cast %375 : vector<1x2x160xf32> to vector<2x160xf32>
    %377 = arith.addf %374, %376 : vector<2x160xf32>
    %378 = vector.broadcast %28 : vector<1x160xf32> to vector<2x160xf32>
    %379 = arith.addf %377, %378 : vector<2x160xf32>
    %cst_256 = arith.constant 0.000000e+00 : f32
    %380 = vector.broadcast %cst_256 : f32 to vector<2x160xf32>
    %381 = arith.maximumf %379, %380 : vector<2x160xf32>
    %382 = vector.broadcast %29 : vector<1x160xf32> to vector<2x160xf32>
    %383 = arith.mulf %381, %382 : vector<2x160xf32>
    %cst_257 = arith.constant dense<0.000000e+00> : vector<2xf32>
    %384 = vector.multi_reduction <add>, %383, %cst_257 [1] : vector<2x160xf32> to vector<2xf32>
    %385 = vector.shape_cast %384 : vector<2xf32> to vector<2x1xf32>
    %386 = vector.broadcast %30 : vector<1x1xf32> to vector<2x1xf32>
    %387 = arith.addf %385, %386 : vector<2x1xf32>
    %cst_258 = arith.constant 0.000000e+00 : f32
    %388 = vector.broadcast %cst_258 : f32 to vector<2x1xf32>
    %389 = arith.subf %388, %387 : vector<2x1xf32>
    %390 = math.exp %389 : vector<2x1xf32>
    %cst_259 = arith.constant 1.000000e+00 : f32
    %391 = vector.broadcast %cst_259 : f32 to vector<2x1xf32>
    %392 = arith.addf %391, %390 : vector<2x1xf32>
    %cst_260 = arith.constant 1.000000e+00 : f32
    %393 = vector.broadcast %cst_260 : f32 to vector<2x1xf32>
    %394 = arith.divf %393, %392 : vector<2x1xf32>
    %cst_261 = arith.constant 1.000000e+00 : f32
    %395 = vector.broadcast %cst_261 : f32 to vector<2x1xf32>
    %396 = arith.addf %395, %394 : vector<2x1xf32>
    %397 = vector.broadcast %396 : vector<2x1xf32> to vector<2x160xf32>
    %398 = arith.mulf %381, %397 : vector<2x160xf32>
    %c1_262 = arith.constant 1 : index
    %c0_263 = arith.constant 0 : index
    %c0_264 = arith.constant 0 : index
    %399 = vector.load %arg22[%c1_262, %c0_263, %c0_264] : memref<5x2x160xf32, #tpu.memory_space<vmem>>, vector<1x2x160xf32>
    %400 = vector.shape_cast %399 : vector<1x2x160xf32> to vector<2x160xf32>
    %401 = arith.addf %400, %398 : vector<2x160xf32>
    %c1_265 = arith.constant 1 : index
    %c0_266 = arith.constant 0 : index
    %c0_267 = arith.constant 0 : index
    %402 = vector.load %arg22[%c1_265, %c0_266, %c0_267] : memref<5x2x160xf32, #tpu.memory_space<vmem>>, vector<1x2x160xf32>
    %403 = vector.shape_cast %402 : vector<1x2x160xf32> to vector<2x160xf32>
    %404 = vector.shape_cast %401 : vector<2x160xf32> to vector<1x2x160xf32>
    tpu.vector_store %arg22[%c1_265, %c0_266, %c0_267], %404 {strides = array<i32>} : memref<5x2x160xf32, #tpu.memory_space<vmem>>, vector<1x2x160xf32>,
    %c2_268 = arith.constant 2 : index
    %c0_269 = arith.constant 0 : index
    %c0_270 = arith.constant 0 : index
    %405 = vector.load %arg22[%c2_268, %c0_269, %c0_270] : memref<5x2x160xf32, #tpu.memory_space<vmem>>, vector<1x2x160xf32>
    %406 = vector.shape_cast %405 : vector<1x2x160xf32> to vector<2x160xf32>
    %407 = arith.addf %406, %398 : vector<2x160xf32>
    %c2_271 = arith.constant 2 : index
    %c0_272 = arith.constant 0 : index
    %c0_273 = arith.constant 0 : index
    %408 = vector.load %arg22[%c2_271, %c0_272, %c0_273] : memref<5x2x160xf32, #tpu.memory_space<vmem>>, vector<1x2x160xf32>
    %409 = vector.shape_cast %408 : vector<1x2x160xf32> to vector<2x160xf32>
    %410 = vector.shape_cast %407 : vector<2x160xf32> to vector<1x2x160xf32>
    tpu.vector_store %arg22[%c2_271, %c0_272, %c0_273], %410 {strides = array<i32>} : memref<5x2x160xf32, #tpu.memory_space<vmem>>, vector<1x2x160xf32>,
    %c3_274 = arith.constant 3 : index
    %c0_275 = arith.constant 0 : index
    %c0_276 = arith.constant 0 : index
    %411 = vector.load %arg20[%c3_274, %c0_275, %c0_276] : memref<5x2x160xf32, #tpu.memory_space<vmem>>, vector<1x2x160xf32>
    %412 = vector.shape_cast %411 : vector<1x2x160xf32> to vector<2x160xf32>
    %c2_277 = arith.constant 2 : index
    %c0_278 = arith.constant 0 : index
    %c0_279 = arith.constant 0 : index
    %413 = vector.load %arg21[%c2_277, %c0_278, %c0_279] : memref<5x2x160xf32, #tpu.memory_space<vmem>>, vector<1x2x160xf32>
    %414 = vector.shape_cast %413 : vector<1x2x160xf32> to vector<2x160xf32>
    %415 = arith.addf %412, %414 : vector<2x160xf32>
    %416 = vector.broadcast %28 : vector<1x160xf32> to vector<2x160xf32>
    %417 = arith.addf %415, %416 : vector<2x160xf32>
    %cst_280 = arith.constant 0.000000e+00 : f32
    %418 = vector.broadcast %cst_280 : f32 to vector<2x160xf32>
    %419 = arith.maximumf %417, %418 : vector<2x160xf32>
    %420 = vector.broadcast %29 : vector<1x160xf32> to vector<2x160xf32>
    %421 = arith.mulf %419, %420 : vector<2x160xf32>
    %cst_281 = arith.constant dense<0.000000e+00> : vector<2xf32>
    %422 = vector.multi_reduction <add>, %421, %cst_281 [1] : vector<2x160xf32> to vector<2xf32>
    %423 = vector.shape_cast %422 : vector<2xf32> to vector<2x1xf32>
    %424 = vector.broadcast %30 : vector<1x1xf32> to vector<2x1xf32>
    %425 = arith.addf %423, %424 : vector<2x1xf32>
    %cst_282 = arith.constant 0.000000e+00 : f32
    %426 = vector.broadcast %cst_282 : f32 to vector<2x1xf32>
    %427 = arith.subf %426, %425 : vector<2x1xf32>
    %428 = math.exp %427 : vector<2x1xf32>
    %cst_283 = arith.constant 1.000000e+00 : f32
    %429 = vector.broadcast %cst_283 : f32 to vector<2x1xf32>
    %430 = arith.addf %429, %428 : vector<2x1xf32>
    %cst_284 = arith.constant 1.000000e+00 : f32
    %431 = vector.broadcast %cst_284 : f32 to vector<2x1xf32>
    %432 = arith.divf %431, %430 : vector<2x1xf32>
    %cst_285 = arith.constant 1.000000e+00 : f32
    %433 = vector.broadcast %cst_285 : f32 to vector<2x1xf32>
    %434 = arith.addf %433, %432 : vector<2x1xf32>
    %435 = vector.broadcast %434 : vector<2x1xf32> to vector<2x160xf32>
    %436 = arith.mulf %419, %435 : vector<2x160xf32>
    %c3_286 = arith.constant 3 : index
    %c0_287 = arith.constant 0 : index
    %c0_288 = arith.constant 0 : index
    %437 = vector.load %arg22[%c3_286, %c0_287, %c0_288] : memref<5x2x160xf32, #tpu.memory_space<vmem>>, vector<1x2x160xf32>
    %438 = vector.shape_cast %437 : vector<1x2x160xf32> to vector<2x160xf32>
    %439 = arith.addf %438, %436 : vector<2x160xf32>
    %c3_289 = arith.constant 3 : index
    %c0_290 = arith.constant 0 : index
    %c0_291 = arith.constant 0 : index
    %440 = vector.load %arg22[%c3_289, %c0_290, %c0_291] : memref<5x2x160xf32, #tpu.memory_space<vmem>>, vector<1x2x160xf32>
    %441 = vector.shape_cast %440 : vector<1x2x160xf32> to vector<2x160xf32>
    %442 = vector.shape_cast %439 : vector<2x160xf32> to vector<1x2x160xf32>
    tpu.vector_store %arg22[%c3_289, %c0_290, %c0_291], %442 {strides = array<i32>} : memref<5x2x160xf32, #tpu.memory_space<vmem>>, vector<1x2x160xf32>,
    %c2_292 = arith.constant 2 : index
    %c0_293 = arith.constant 0 : index
    %c0_294 = arith.constant 0 : index
    %443 = vector.load %arg22[%c2_292, %c0_293, %c0_294] : memref<5x2x160xf32, #tpu.memory_space<vmem>>, vector<1x2x160xf32>
    %444 = vector.shape_cast %443 : vector<1x2x160xf32> to vector<2x160xf32>
    %445 = arith.addf %444, %436 : vector<2x160xf32>
    %c2_295 = arith.constant 2 : index
    %c0_296 = arith.constant 0 : index
    %c0_297 = arith.constant 0 : index
    %446 = vector.load %arg22[%c2_295, %c0_296, %c0_297] : memref<5x2x160xf32, #tpu.memory_space<vmem>>, vector<1x2x160xf32>
    %447 = vector.shape_cast %446 : vector<1x2x160xf32> to vector<2x160xf32>
    %448 = vector.shape_cast %445 : vector<2x160xf32> to vector<1x2x160xf32>
    tpu.vector_store %arg22[%c2_295, %c0_296, %c0_297], %448 {strides = array<i32>} : memref<5x2x160xf32, #tpu.memory_space<vmem>>, vector<1x2x160xf32>,
    %c4_298 = arith.constant 4 : index
    %c0_299 = arith.constant 0 : index
    %c0_300 = arith.constant 0 : index
    %449 = vector.load %arg20[%c4_298, %c0_299, %c0_300] : memref<5x2x160xf32, #tpu.memory_space<vmem>>, vector<1x2x160xf32>
    %450 = vector.shape_cast %449 : vector<1x2x160xf32> to vector<2x160xf32>
    %c2_301 = arith.constant 2 : index
    %c0_302 = arith.constant 0 : index
    %c0_303 = arith.constant 0 : index
    %451 = vector.load %arg21[%c2_301, %c0_302, %c0_303] : memref<5x2x160xf32, #tpu.memory_space<vmem>>, vector<1x2x160xf32>
    %452 = vector.shape_cast %451 : vector<1x2x160xf32> to vector<2x160xf32>
    %453 = arith.addf %450, %452 : vector<2x160xf32>
    %454 = vector.broadcast %28 : vector<1x160xf32> to vector<2x160xf32>
    %455 = arith.addf %453, %454 : vector<2x160xf32>
    %cst_304 = arith.constant 0.000000e+00 : f32
    %456 = vector.broadcast %cst_304 : f32 to vector<2x160xf32>
    %457 = arith.maximumf %455, %456 : vector<2x160xf32>
    %458 = vector.broadcast %29 : vector<1x160xf32> to vector<2x160xf32>
    %459 = arith.mulf %457, %458 : vector<2x160xf32>
    %cst_305 = arith.constant dense<0.000000e+00> : vector<2xf32>
    %460 = vector.multi_reduction <add>, %459, %cst_305 [1] : vector<2x160xf32> to vector<2xf32>
    %461 = vector.shape_cast %460 : vector<2xf32> to vector<2x1xf32>
    %462 = vector.broadcast %30 : vector<1x1xf32> to vector<2x1xf32>
    %463 = arith.addf %461, %462 : vector<2x1xf32>
    %cst_306 = arith.constant 0.000000e+00 : f32
    %464 = vector.broadcast %cst_306 : f32 to vector<2x1xf32>
    %465 = arith.subf %464, %463 : vector<2x1xf32>
    %466 = math.exp %465 : vector<2x1xf32>
    %cst_307 = arith.constant 1.000000e+00 : f32
    %467 = vector.broadcast %cst_307 : f32 to vector<2x1xf32>
    %468 = arith.addf %467, %466 : vector<2x1xf32>
    %cst_308 = arith.constant 1.000000e+00 : f32
    %469 = vector.broadcast %cst_308 : f32 to vector<2x1xf32>
    %470 = arith.divf %469, %468 : vector<2x1xf32>
    %cst_309 = arith.constant 1.000000e+00 : f32
    %471 = vector.broadcast %cst_309 : f32 to vector<2x1xf32>
    %472 = arith.addf %471, %470 : vector<2x1xf32>
    %473 = vector.broadcast %472 : vector<2x1xf32> to vector<2x160xf32>
    %474 = arith.mulf %457, %473 : vector<2x160xf32>
    %c4_310 = arith.constant 4 : index
    %c0_311 = arith.constant 0 : index
    %c0_312 = arith.constant 0 : index
    %475 = vector.load %arg22[%c4_310, %c0_311, %c0_312] : memref<5x2x160xf32, #tpu.memory_space<vmem>>, vector<1x2x160xf32>
    %476 = vector.shape_cast %475 : vector<1x2x160xf32> to vector<2x160xf32>
    %477 = arith.addf %476, %474 : vector<2x160xf32>
    %c4_313 = arith.constant 4 : index
    %c0_314 = arith.constant 0 : index
    %c0_315 = arith.constant 0 : index
    %478 = vector.load %arg22[%c4_313, %c0_314, %c0_315] : memref<5x2x160xf32, #tpu.memory_space<vmem>>, vector<1x2x160xf32>
    %479 = vector.shape_cast %478 : vector<1x2x160xf32> to vector<2x160xf32>
    %480 = vector.shape_cast %477 : vector<2x160xf32> to vector<1x2x160xf32>
    tpu.vector_store %arg22[%c4_313, %c0_314, %c0_315], %480 {strides = array<i32>} : memref<5x2x160xf32, #tpu.memory_space<vmem>>, vector<1x2x160xf32>,
    %c2_316 = arith.constant 2 : index
    %c0_317 = arith.constant 0 : index
    %c0_318 = arith.constant 0 : index
    %481 = vector.load %arg22[%c2_316, %c0_317, %c0_318] : memref<5x2x160xf32, #tpu.memory_space<vmem>>, vector<1x2x160xf32>
    %482 = vector.shape_cast %481 : vector<1x2x160xf32> to vector<2x160xf32>
    %483 = arith.addf %482, %474 : vector<2x160xf32>
    %c2_319 = arith.constant 2 : index
    %c0_320 = arith.constant 0 : index
    %c0_321 = arith.constant 0 : index
    %484 = vector.load %arg22[%c2_319, %c0_320, %c0_321] : memref<5x2x160xf32, #tpu.memory_space<vmem>>, vector<1x2x160xf32>
    %485 = vector.shape_cast %484 : vector<1x2x160xf32> to vector<2x160xf32>
    %486 = vector.shape_cast %483 : vector<2x160xf32> to vector<1x2x160xf32>
    tpu.vector_store %arg22[%c2_319, %c0_320, %c0_321], %486 {strides = array<i32>} : memref<5x2x160xf32, #tpu.memory_space<vmem>>, vector<1x2x160xf32>,
    %c0_322 = arith.constant 0 : index
    %c0_323 = arith.constant 0 : index
    %c0_324 = arith.constant 0 : index
    %487 = vector.load %arg20[%c0_322, %c0_323, %c0_324] : memref<5x2x160xf32, #tpu.memory_space<vmem>>, vector<1x2x160xf32>
    %488 = vector.shape_cast %487 : vector<1x2x160xf32> to vector<2x160xf32>
    %c3_325 = arith.constant 3 : index
    %c0_326 = arith.constant 0 : index
    %c0_327 = arith.constant 0 : index
    %489 = vector.load %arg21[%c3_325, %c0_326, %c0_327] : memref<5x2x160xf32, #tpu.memory_space<vmem>>, vector<1x2x160xf32>
    %490 = vector.shape_cast %489 : vector<1x2x160xf32> to vector<2x160xf32>
    %491 = arith.addf %488, %490 : vector<2x160xf32>
    %492 = vector.broadcast %28 : vector<1x160xf32> to vector<2x160xf32>
    %493 = arith.addf %491, %492 : vector<2x160xf32>
    %cst_328 = arith.constant 0.000000e+00 : f32
    %494 = vector.broadcast %cst_328 : f32 to vector<2x160xf32>
    %495 = arith.maximumf %493, %494 : vector<2x160xf32>
    %496 = vector.broadcast %29 : vector<1x160xf32> to vector<2x160xf32>
    %497 = arith.mulf %495, %496 : vector<2x160xf32>
    %cst_329 = arith.constant dense<0.000000e+00> : vector<2xf32>
    %498 = vector.multi_reduction <add>, %497, %cst_329 [1] : vector<2x160xf32> to vector<2xf32>
    %499 = vector.shape_cast %498 : vector<2xf32> to vector<2x1xf32>
    %500 = vector.broadcast %30 : vector<1x1xf32> to vector<2x1xf32>
    %501 = arith.addf %499, %500 : vector<2x1xf32>
    %cst_330 = arith.constant 0.000000e+00 : f32
    %502 = vector.broadcast %cst_330 : f32 to vector<2x1xf32>
    %503 = arith.subf %502, %501 : vector<2x1xf32>
    %504 = math.exp %503 : vector<2x1xf32>
    %cst_331 = arith.constant 1.000000e+00 : f32
    %505 = vector.broadcast %cst_331 : f32 to vector<2x1xf32>
    %506 = arith.addf %505, %504 : vector<2x1xf32>
    %cst_332 = arith.constant 1.000000e+00 : f32
    %507 = vector.broadcast %cst_332 : f32 to vector<2x1xf32>
    %508 = arith.divf %507, %506 : vector<2x1xf32>
    %cst_333 = arith.constant 1.000000e+00 : f32
    %509 = vector.broadcast %cst_333 : f32 to vector<2x1xf32>
    %510 = arith.addf %509, %508 : vector<2x1xf32>
    %511 = vector.broadcast %510 : vector<2x1xf32> to vector<2x160xf32>
    %512 = arith.mulf %495, %511 : vector<2x160xf32>
    %c0_334 = arith.constant 0 : index
    %c0_335 = arith.constant 0 : index
    %c0_336 = arith.constant 0 : index
    %513 = vector.load %arg22[%c0_334, %c0_335, %c0_336] : memref<5x2x160xf32, #tpu.memory_space<vmem>>, vector<1x2x160xf32>
    %514 = vector.shape_cast %513 : vector<1x2x160xf32> to vector<2x160xf32>
    %515 = arith.addf %514, %512 : vector<2x160xf32>
    %c0_337 = arith.constant 0 : index
    %c0_338 = arith.constant 0 : index
    %c0_339 = arith.constant 0 : index
    %516 = vector.load %arg22[%c0_337, %c0_338, %c0_339] : memref<5x2x160xf32, #tpu.memory_space<vmem>>, vector<1x2x160xf32>
    %517 = vector.shape_cast %516 : vector<1x2x160xf32> to vector<2x160xf32>
    %518 = vector.shape_cast %515 : vector<2x160xf32> to vector<1x2x160xf32>
    tpu.vector_store %arg22[%c0_337, %c0_338, %c0_339], %518 {strides = array<i32>} : memref<5x2x160xf32, #tpu.memory_space<vmem>>, vector<1x2x160xf32>,
    %c3_340 = arith.constant 3 : index
    %c0_341 = arith.constant 0 : index
    %c0_342 = arith.constant 0 : index
    %519 = vector.load %arg22[%c3_340, %c0_341, %c0_342] : memref<5x2x160xf32, #tpu.memory_space<vmem>>, vector<1x2x160xf32>
    %520 = vector.shape_cast %519 : vector<1x2x160xf32> to vector<2x160xf32>
    %521 = arith.addf %520, %512 : vector<2x160xf32>
    %c3_343 = arith.constant 3 : index
    %c0_344 = arith.constant 0 : index
    %c0_345 = arith.constant 0 : index
    %522 = vector.load %arg22[%c3_343, %c0_344, %c0_345] : memref<5x2x160xf32, #tpu.memory_space<vmem>>, vector<1x2x160xf32>
    %523 = vector.shape_cast %522 : vector<1x2x160xf32> to vector<2x160xf32>
    %524 = vector.shape_cast %521 : vector<2x160xf32> to vector<1x2x160xf32>
    tpu.vector_store %arg22[%c3_343, %c0_344, %c0_345], %524 {strides = array<i32>} : memref<5x2x160xf32, #tpu.memory_space<vmem>>, vector<1x2x160xf32>,
    %c1_346 = arith.constant 1 : index
    %c0_347 = arith.constant 0 : index
    %c0_348 = arith.constant 0 : index
    %525 = vector.load %arg20[%c1_346, %c0_347, %c0_348] : memref<5x2x160xf32, #tpu.memory_space<vmem>>, vector<1x2x160xf32>
    %526 = vector.shape_cast %525 : vector<1x2x160xf32> to vector<2x160xf32>
    %c3_349 = arith.constant 3 : index
    %c0_350 = arith.constant 0 : index
    %c0_351 = arith.constant 0 : index
    %527 = vector.load %arg21[%c3_349, %c0_350, %c0_351] : memref<5x2x160xf32, #tpu.memory_space<vmem>>, vector<1x2x160xf32>
    %528 = vector.shape_cast %527 : vector<1x2x160xf32> to vector<2x160xf32>
    %529 = arith.addf %526, %528 : vector<2x160xf32>
    %530 = vector.broadcast %28 : vector<1x160xf32> to vector<2x160xf32>
    %531 = arith.addf %529, %530 : vector<2x160xf32>
    %cst_352 = arith.constant 0.000000e+00 : f32
    %532 = vector.broadcast %cst_352 : f32 to vector<2x160xf32>
    %533 = arith.maximumf %531, %532 : vector<2x160xf32>
    %534 = vector.broadcast %29 : vector<1x160xf32> to vector<2x160xf32>
    %535 = arith.mulf %533, %534 : vector<2x160xf32>
    %cst_353 = arith.constant dense<0.000000e+00> : vector<2xf32>
    %536 = vector.multi_reduction <add>, %535, %cst_353 [1] : vector<2x160xf32> to vector<2xf32>
    %537 = vector.shape_cast %536 : vector<2xf32> to vector<2x1xf32>
    %538 = vector.broadcast %30 : vector<1x1xf32> to vector<2x1xf32>
    %539 = arith.addf %537, %538 : vector<2x1xf32>
    %cst_354 = arith.constant 0.000000e+00 : f32
    %540 = vector.broadcast %cst_354 : f32 to vector<2x1xf32>
    %541 = arith.subf %540, %539 : vector<2x1xf32>
    %542 = math.exp %541 : vector<2x1xf32>
    %cst_355 = arith.constant 1.000000e+00 : f32
    %543 = vector.broadcast %cst_355 : f32 to vector<2x1xf32>
    %544 = arith.addf %543, %542 : vector<2x1xf32>
    %cst_356 = arith.constant 1.000000e+00 : f32
    %545 = vector.broadcast %cst_356 : f32 to vector<2x1xf32>
    %546 = arith.divf %545, %544 : vector<2x1xf32>
    %cst_357 = arith.constant 1.000000e+00 : f32
    %547 = vector.broadcast %cst_357 : f32 to vector<2x1xf32>
    %548 = arith.addf %547, %546 : vector<2x1xf32>
    %549 = vector.broadcast %548 : vector<2x1xf32> to vector<2x160xf32>
    %550 = arith.mulf %533, %549 : vector<2x160xf32>
    %c1_358 = arith.constant 1 : index
    %c0_359 = arith.constant 0 : index
    %c0_360 = arith.constant 0 : index
    %551 = vector.load %arg22[%c1_358, %c0_359, %c0_360] : memref<5x2x160xf32, #tpu.memory_space<vmem>>, vector<1x2x160xf32>
    %552 = vector.shape_cast %551 : vector<1x2x160xf32> to vector<2x160xf32>
    %553 = arith.addf %552, %550 : vector<2x160xf32>
    %c1_361 = arith.constant 1 : index
    %c0_362 = arith.constant 0 : index
    %c0_363 = arith.constant 0 : index
    %554 = vector.load %arg22[%c1_361, %c0_362, %c0_363] : memref<5x2x160xf32, #tpu.memory_space<vmem>>, vector<1x2x160xf32>
    %555 = vector.shape_cast %554 : vector<1x2x160xf32> to vector<2x160xf32>
    %556 = vector.shape_cast %553 : vector<2x160xf32> to vector<1x2x160xf32>
    tpu.vector_store %arg22[%c1_361, %c0_362, %c0_363], %556 {strides = array<i32>} : memref<5x2x160xf32, #tpu.memory_space<vmem>>, vector<1x2x160xf32>,
    %c3_364 = arith.constant 3 : index
    %c0_365 = arith.constant 0 : index
    %c0_366 = arith.constant 0 : index
    %557 = vector.load %arg22[%c3_364, %c0_365, %c0_366] : memref<5x2x160xf32, #tpu.memory_space<vmem>>, vector<1x2x160xf32>
    %558 = vector.shape_cast %557 : vector<1x2x160xf32> to vector<2x160xf32>
    %559 = arith.addf %558, %550 : vector<2x160xf32>
    %c3_367 = arith.constant 3 : index
    %c0_368 = arith.constant 0 : index
    %c0_369 = arith.constant 0 : index
    %560 = vector.load %arg22[%c3_367, %c0_368, %c0_369] : memref<5x2x160xf32, #tpu.memory_space<vmem>>, vector<1x2x160xf32>
    %561 = vector.shape_cast %560 : vector<1x2x160xf32> to vector<2x160xf32>
    %562 = vector.shape_cast %559 : vector<2x160xf32> to vector<1x2x160xf32>
    tpu.vector_store %arg22[%c3_367, %c0_368, %c0_369], %562 {strides = array<i32>} : memref<5x2x160xf32, #tpu.memory_space<vmem>>, vector<1x2x160xf32>,
    %c2_370 = arith.constant 2 : index
    %c0_371 = arith.constant 0 : index
    %c0_372 = arith.constant 0 : index
    %563 = vector.load %arg20[%c2_370, %c0_371, %c0_372] : memref<5x2x160xf32, #tpu.memory_space<vmem>>, vector<1x2x160xf32>
    %564 = vector.shape_cast %563 : vector<1x2x160xf32> to vector<2x160xf32>
    %c3_373 = arith.constant 3 : index
    %c0_374 = arith.constant 0 : index
    %c0_375 = arith.constant 0 : index
    %565 = vector.load %arg21[%c3_373, %c0_374, %c0_375] : memref<5x2x160xf32, #tpu.memory_space<vmem>>, vector<1x2x160xf32>
    %566 = vector.shape_cast %565 : vector<1x2x160xf32> to vector<2x160xf32>
    %567 = arith.addf %564, %566 : vector<2x160xf32>
    %568 = vector.broadcast %28 : vector<1x160xf32> to vector<2x160xf32>
    %569 = arith.addf %567, %568 : vector<2x160xf32>
    %cst_376 = arith.constant 0.000000e+00 : f32
    %570 = vector.broadcast %cst_376 : f32 to vector<2x160xf32>
    %571 = arith.maximumf %569, %570 : vector<2x160xf32>
    %572 = vector.broadcast %29 : vector<1x160xf32> to vector<2x160xf32>
    %573 = arith.mulf %571, %572 : vector<2x160xf32>
    %cst_377 = arith.constant dense<0.000000e+00> : vector<2xf32>
    %574 = vector.multi_reduction <add>, %573, %cst_377 [1] : vector<2x160xf32> to vector<2xf32>
    %575 = vector.shape_cast %574 : vector<2xf32> to vector<2x1xf32>
    %576 = vector.broadcast %30 : vector<1x1xf32> to vector<2x1xf32>
    %577 = arith.addf %575, %576 : vector<2x1xf32>
    %cst_378 = arith.constant 0.000000e+00 : f32
    %578 = vector.broadcast %cst_378 : f32 to vector<2x1xf32>
    %579 = arith.subf %578, %577 : vector<2x1xf32>
    %580 = math.exp %579 : vector<2x1xf32>
    %cst_379 = arith.constant 1.000000e+00 : f32
    %581 = vector.broadcast %cst_379 : f32 to vector<2x1xf32>
    %582 = arith.addf %581, %580 : vector<2x1xf32>
    %cst_380 = arith.constant 1.000000e+00 : f32
    %583 = vector.broadcast %cst_380 : f32 to vector<2x1xf32>
    %584 = arith.divf %583, %582 : vector<2x1xf32>
    %cst_381 = arith.constant 1.000000e+00 : f32
    %585 = vector.broadcast %cst_381 : f32 to vector<2x1xf32>
    %586 = arith.addf %585, %584 : vector<2x1xf32>
    %587 = vector.broadcast %586 : vector<2x1xf32> to vector<2x160xf32>
    %588 = arith.mulf %571, %587 : vector<2x160xf32>
    %c2_382 = arith.constant 2 : index
    %c0_383 = arith.constant 0 : index
    %c0_384 = arith.constant 0 : index
    %589 = vector.load %arg22[%c2_382, %c0_383, %c0_384] : memref<5x2x160xf32, #tpu.memory_space<vmem>>, vector<1x2x160xf32>
    %590 = vector.shape_cast %589 : vector<1x2x160xf32> to vector<2x160xf32>
    %591 = arith.addf %590, %588 : vector<2x160xf32>
    %c2_385 = arith.constant 2 : index
    %c0_386 = arith.constant 0 : index
    %c0_387 = arith.constant 0 : index
    %592 = vector.load %arg22[%c2_385, %c0_386, %c0_387] : memref<5x2x160xf32, #tpu.memory_space<vmem>>, vector<1x2x160xf32>
    %593 = vector.shape_cast %592 : vector<1x2x160xf32> to vector<2x160xf32>
    %594 = vector.shape_cast %591 : vector<2x160xf32> to vector<1x2x160xf32>
    tpu.vector_store %arg22[%c2_385, %c0_386, %c0_387], %594 {strides = array<i32>} : memref<5x2x160xf32, #tpu.memory_space<vmem>>, vector<1x2x160xf32>,
    %c3_388 = arith.constant 3 : index
    %c0_389 = arith.constant 0 : index
    %c0_390 = arith.constant 0 : index
    %595 = vector.load %arg22[%c3_388, %c0_389, %c0_390] : memref<5x2x160xf32, #tpu.memory_space<vmem>>, vector<1x2x160xf32>
    %596 = vector.shape_cast %595 : vector<1x2x160xf32> to vector<2x160xf32>
    %597 = arith.addf %596, %588 : vector<2x160xf32>
    %c3_391 = arith.constant 3 : index
    %c0_392 = arith.constant 0 : index
    %c0_393 = arith.constant 0 : index
    %598 = vector.load %arg22[%c3_391, %c0_392, %c0_393] : memref<5x2x160xf32, #tpu.memory_space<vmem>>, vector<1x2x160xf32>
    %599 = vector.shape_cast %598 : vector<1x2x160xf32> to vector<2x160xf32>
    %600 = vector.shape_cast %597 : vector<2x160xf32> to vector<1x2x160xf32>
    tpu.vector_store %arg22[%c3_391, %c0_392, %c0_393], %600 {strides = array<i32>} : memref<5x2x160xf32, #tpu.memory_space<vmem>>, vector<1x2x160xf32>,
    %c4_394 = arith.constant 4 : index
    %c0_395 = arith.constant 0 : index
    %c0_396 = arith.constant 0 : index
    %601 = vector.load %arg20[%c4_394, %c0_395, %c0_396] : memref<5x2x160xf32, #tpu.memory_space<vmem>>, vector<1x2x160xf32>
    %602 = vector.shape_cast %601 : vector<1x2x160xf32> to vector<2x160xf32>
    %c3_397 = arith.constant 3 : index
    %c0_398 = arith.constant 0 : index
    %c0_399 = arith.constant 0 : index
    %603 = vector.load %arg21[%c3_397, %c0_398, %c0_399] : memref<5x2x160xf32, #tpu.memory_space<vmem>>, vector<1x2x160xf32>
    %604 = vector.shape_cast %603 : vector<1x2x160xf32> to vector<2x160xf32>
    %605 = arith.addf %602, %604 : vector<2x160xf32>
    %606 = vector.broadcast %28 : vector<1x160xf32> to vector<2x160xf32>
    %607 = arith.addf %605, %606 : vector<2x160xf32>
    %cst_400 = arith.constant 0.000000e+00 : f32
    %608 = vector.broadcast %cst_400 : f32 to vector<2x160xf32>
    %609 = arith.maximumf %607, %608 : vector<2x160xf32>
    %610 = vector.broadcast %29 : vector<1x160xf32> to vector<2x160xf32>
    %611 = arith.mulf %609, %610 : vector<2x160xf32>
    %cst_401 = arith.constant dense<0.000000e+00> : vector<2xf32>
    %612 = vector.multi_reduction <add>, %611, %cst_401 [1] : vector<2x160xf32> to vector<2xf32>
    %613 = vector.shape_cast %612 : vector<2xf32> to vector<2x1xf32>
    %614 = vector.broadcast %30 : vector<1x1xf32> to vector<2x1xf32>
    %615 = arith.addf %613, %614 : vector<2x1xf32>
    %cst_402 = arith.constant 0.000000e+00 : f32
    %616 = vector.broadcast %cst_402 : f32 to vector<2x1xf32>
    %617 = arith.subf %616, %615 : vector<2x1xf32>
    %618 = math.exp %617 : vector<2x1xf32>
    %cst_403 = arith.constant 1.000000e+00 : f32
    %619 = vector.broadcast %cst_403 : f32 to vector<2x1xf32>
    %620 = arith.addf %619, %618 : vector<2x1xf32>
    %cst_404 = arith.constant 1.000000e+00 : f32
    %621 = vector.broadcast %cst_404 : f32 to vector<2x1xf32>
    %622 = arith.divf %621, %620 : vector<2x1xf32>
    %cst_405 = arith.constant 1.000000e+00 : f32
    %623 = vector.broadcast %cst_405 : f32 to vector<2x1xf32>
    %624 = arith.addf %623, %622 : vector<2x1xf32>
    %625 = vector.broadcast %624 : vector<2x1xf32> to vector<2x160xf32>
    %626 = arith.mulf %609, %625 : vector<2x160xf32>
    %c4_406 = arith.constant 4 : index
    %c0_407 = arith.constant 0 : index
    %c0_408 = arith.constant 0 : index
    %627 = vector.load %arg22[%c4_406, %c0_407, %c0_408] : memref<5x2x160xf32, #tpu.memory_space<vmem>>, vector<1x2x160xf32>
    %628 = vector.shape_cast %627 : vector<1x2x160xf32> to vector<2x160xf32>
    %629 = arith.addf %628, %626 : vector<2x160xf32>
    %c4_409 = arith.constant 4 : index
    %c0_410 = arith.constant 0 : index
    %c0_411 = arith.constant 0 : index
    %630 = vector.load %arg22[%c4_409, %c0_410, %c0_411] : memref<5x2x160xf32, #tpu.memory_space<vmem>>, vector<1x2x160xf32>
    %631 = vector.shape_cast %630 : vector<1x2x160xf32> to vector<2x160xf32>
    %632 = vector.shape_cast %629 : vector<2x160xf32> to vector<1x2x160xf32>
    tpu.vector_store %arg22[%c4_409, %c0_410, %c0_411], %632 {strides = array<i32>} : memref<5x2x160xf32, #tpu.memory_space<vmem>>, vector<1x2x160xf32>,
    %c3_412 = arith.constant 3 : index
    %c0_413 = arith.constant 0 : index
    %c0_414 = arith.constant 0 : index
    %633 = vector.load %arg22[%c3_412, %c0_413, %c0_414] : memref<5x2x160xf32, #tpu.memory_space<vmem>>, vector<1x2x160xf32>
    %634 = vector.shape_cast %633 : vector<1x2x160xf32> to vector<2x160xf32>
    %635 = arith.addf %634, %626 : vector<2x160xf32>
    %c3_415 = arith.constant 3 : index
    %c0_416 = arith.constant 0 : index
    %c0_417 = arith.constant 0 : index
    %636 = vector.load %arg22[%c3_415, %c0_416, %c0_417] : memref<5x2x160xf32, #tpu.memory_space<vmem>>, vector<1x2x160xf32>
    %637 = vector.shape_cast %636 : vector<1x2x160xf32> to vector<2x160xf32>
    %638 = vector.shape_cast %635 : vector<2x160xf32> to vector<1x2x160xf32>
    tpu.vector_store %arg22[%c3_415, %c0_416, %c0_417], %638 {strides = array<i32>} : memref<5x2x160xf32, #tpu.memory_space<vmem>>, vector<1x2x160xf32>,
    %c0_418 = arith.constant 0 : index
    %c0_419 = arith.constant 0 : index
    %c0_420 = arith.constant 0 : index
    %639 = vector.load %arg20[%c0_418, %c0_419, %c0_420] : memref<5x2x160xf32, #tpu.memory_space<vmem>>, vector<1x2x160xf32>
    %640 = vector.shape_cast %639 : vector<1x2x160xf32> to vector<2x160xf32>
    %c4_421 = arith.constant 4 : index
    %c0_422 = arith.constant 0 : index
    %c0_423 = arith.constant 0 : index
    %641 = vector.load %arg21[%c4_421, %c0_422, %c0_423] : memref<5x2x160xf32, #tpu.memory_space<vmem>>, vector<1x2x160xf32>
    %642 = vector.shape_cast %641 : vector<1x2x160xf32> to vector<2x160xf32>
    %643 = arith.addf %640, %642 : vector<2x160xf32>
    %644 = vector.broadcast %28 : vector<1x160xf32> to vector<2x160xf32>
    %645 = arith.addf %643, %644 : vector<2x160xf32>
    %cst_424 = arith.constant 0.000000e+00 : f32
    %646 = vector.broadcast %cst_424 : f32 to vector<2x160xf32>
    %647 = arith.maximumf %645, %646 : vector<2x160xf32>
    %648 = vector.broadcast %29 : vector<1x160xf32> to vector<2x160xf32>
    %649 = arith.mulf %647, %648 : vector<2x160xf32>
    %cst_425 = arith.constant dense<0.000000e+00> : vector<2xf32>
    %650 = vector.multi_reduction <add>, %649, %cst_425 [1] : vector<2x160xf32> to vector<2xf32>
    %651 = vector.shape_cast %650 : vector<2xf32> to vector<2x1xf32>
    %652 = vector.broadcast %30 : vector<1x1xf32> to vector<2x1xf32>
    %653 = arith.addf %651, %652 : vector<2x1xf32>
    %cst_426 = arith.constant 0.000000e+00 : f32
    %654 = vector.broadcast %cst_426 : f32 to vector<2x1xf32>
    %655 = arith.subf %654, %653 : vector<2x1xf32>
    %656 = math.exp %655 : vector<2x1xf32>
    %cst_427 = arith.constant 1.000000e+00 : f32
    %657 = vector.broadcast %cst_427 : f32 to vector<2x1xf32>
    %658 = arith.addf %657, %656 : vector<2x1xf32>
    %cst_428 = arith.constant 1.000000e+00 : f32
    %659 = vector.broadcast %cst_428 : f32 to vector<2x1xf32>
    %660 = arith.divf %659, %658 : vector<2x1xf32>
    %cst_429 = arith.constant 1.000000e+00 : f32
    %661 = vector.broadcast %cst_429 : f32 to vector<2x1xf32>
    %662 = arith.addf %661, %660 : vector<2x1xf32>
    %663 = vector.broadcast %662 : vector<2x1xf32> to vector<2x160xf32>
    %664 = arith.mulf %647, %663 : vector<2x160xf32>
    %c0_430 = arith.constant 0 : index
    %c0_431 = arith.constant 0 : index
    %c0_432 = arith.constant 0 : index
    %665 = vector.load %arg22[%c0_430, %c0_431, %c0_432] : memref<5x2x160xf32, #tpu.memory_space<vmem>>, vector<1x2x160xf32>
    %666 = vector.shape_cast %665 : vector<1x2x160xf32> to vector<2x160xf32>
    %667 = arith.addf %666, %664 : vector<2x160xf32>
    %c0_433 = arith.constant 0 : index
    %c0_434 = arith.constant 0 : index
    %c0_435 = arith.constant 0 : index
    %668 = vector.load %arg22[%c0_433, %c0_434, %c0_435] : memref<5x2x160xf32, #tpu.memory_space<vmem>>, vector<1x2x160xf32>
    %669 = vector.shape_cast %668 : vector<1x2x160xf32> to vector<2x160xf32>
    %670 = vector.shape_cast %667 : vector<2x160xf32> to vector<1x2x160xf32>
    tpu.vector_store %arg22[%c0_433, %c0_434, %c0_435], %670 {strides = array<i32>} : memref<5x2x160xf32, #tpu.memory_space<vmem>>, vector<1x2x160xf32>,
    %c4_436 = arith.constant 4 : index
    %c0_437 = arith.constant 0 : index
    %c0_438 = arith.constant 0 : index
    %671 = vector.load %arg22[%c4_436, %c0_437, %c0_438] : memref<5x2x160xf32, #tpu.memory_space<vmem>>, vector<1x2x160xf32>
    %672 = vector.shape_cast %671 : vector<1x2x160xf32> to vector<2x160xf32>
    %673 = arith.addf %672, %664 : vector<2x160xf32>
    %c4_439 = arith.constant 4 : index
    %c0_440 = arith.constant 0 : index
    %c0_441 = arith.constant 0 : index
    %674 = vector.load %arg22[%c4_439, %c0_440, %c0_441] : memref<5x2x160xf32, #tpu.memory_space<vmem>>, vector<1x2x160xf32>
    %675 = vector.shape_cast %674 : vector<1x2x160xf32> to vector<2x160xf32>
    %676 = vector.shape_cast %673 : vector<2x160xf32> to vector<1x2x160xf32>
    tpu.vector_store %arg22[%c4_439, %c0_440, %c0_441], %676 {strides = array<i32>} : memref<5x2x160xf32, #tpu.memory_space<vmem>>, vector<1x2x160xf32>,
    %c1_442 = arith.constant 1 : index
    %c0_443 = arith.constant 0 : index
    %c0_444 = arith.constant 0 : index
    %677 = vector.load %arg20[%c1_442, %c0_443, %c0_444] : memref<5x2x160xf32, #tpu.memory_space<vmem>>, vector<1x2x160xf32>
    %678 = vector.shape_cast %677 : vector<1x2x160xf32> to vector<2x160xf32>
    %c4_445 = arith.constant 4 : index
    %c0_446 = arith.constant 0 : index
    %c0_447 = arith.constant 0 : index
    %679 = vector.load %arg21[%c4_445, %c0_446, %c0_447] : memref<5x2x160xf32, #tpu.memory_space<vmem>>, vector<1x2x160xf32>
    %680 = vector.shape_cast %679 : vector<1x2x160xf32> to vector<2x160xf32>
    %681 = arith.addf %678, %680 : vector<2x160xf32>
    %682 = vector.broadcast %28 : vector<1x160xf32> to vector<2x160xf32>
    %683 = arith.addf %681, %682 : vector<2x160xf32>
    %cst_448 = arith.constant 0.000000e+00 : f32
    %684 = vector.broadcast %cst_448 : f32 to vector<2x160xf32>
    %685 = arith.maximumf %683, %684 : vector<2x160xf32>
    %686 = vector.broadcast %29 : vector<1x160xf32> to vector<2x160xf32>
    %687 = arith.mulf %685, %686 : vector<2x160xf32>
    %cst_449 = arith.constant dense<0.000000e+00> : vector<2xf32>
    %688 = vector.multi_reduction <add>, %687, %cst_449 [1] : vector<2x160xf32> to vector<2xf32>
    %689 = vector.shape_cast %688 : vector<2xf32> to vector<2x1xf32>
    %690 = vector.broadcast %30 : vector<1x1xf32> to vector<2x1xf32>
    %691 = arith.addf %689, %690 : vector<2x1xf32>
    %cst_450 = arith.constant 0.000000e+00 : f32
    %692 = vector.broadcast %cst_450 : f32 to vector<2x1xf32>
    %693 = arith.subf %692, %691 : vector<2x1xf32>
    %694 = math.exp %693 : vector<2x1xf32>
    %cst_451 = arith.constant 1.000000e+00 : f32
    %695 = vector.broadcast %cst_451 : f32 to vector<2x1xf32>
    %696 = arith.addf %695, %694 : vector<2x1xf32>
    %cst_452 = arith.constant 1.000000e+00 : f32
    %697 = vector.broadcast %cst_452 : f32 to vector<2x1xf32>
    %698 = arith.divf %697, %696 : vector<2x1xf32>
    %cst_453 = arith.constant 1.000000e+00 : f32
    %699 = vector.broadcast %cst_453 : f32 to vector<2x1xf32>
    %700 = arith.addf %699, %698 : vector<2x1xf32>
    %701 = vector.broadcast %700 : vector<2x1xf32> to vector<2x160xf32>
    %702 = arith.mulf %685, %701 : vector<2x160xf32>
    %c1_454 = arith.constant 1 : index
    %c0_455 = arith.constant 0 : index
    %c0_456 = arith.constant 0 : index
    %703 = vector.load %arg22[%c1_454, %c0_455, %c0_456] : memref<5x2x160xf32, #tpu.memory_space<vmem>>, vector<1x2x160xf32>
    %704 = vector.shape_cast %703 : vector<1x2x160xf32> to vector<2x160xf32>
    %705 = arith.addf %704, %702 : vector<2x160xf32>
    %c1_457 = arith.constant 1 : index
    %c0_458 = arith.constant 0 : index
    %c0_459 = arith.constant 0 : index
    %706 = vector.load %arg22[%c1_457, %c0_458, %c0_459] : memref<5x2x160xf32, #tpu.memory_space<vmem>>, vector<1x2x160xf32>
    %707 = vector.shape_cast %706 : vector<1x2x160xf32> to vector<2x160xf32>
    %708 = vector.shape_cast %705 : vector<2x160xf32> to vector<1x2x160xf32>
    tpu.vector_store %arg22[%c1_457, %c0_458, %c0_459], %708 {strides = array<i32>} : memref<5x2x160xf32, #tpu.memory_space<vmem>>, vector<1x2x160xf32>,
    %c4_460 = arith.constant 4 : index
    %c0_461 = arith.constant 0 : index
    %c0_462 = arith.constant 0 : index
    %709 = vector.load %arg22[%c4_460, %c0_461, %c0_462] : memref<5x2x160xf32, #tpu.memory_space<vmem>>, vector<1x2x160xf32>
    %710 = vector.shape_cast %709 : vector<1x2x160xf32> to vector<2x160xf32>
    %711 = arith.addf %710, %702 : vector<2x160xf32>
    %c4_463 = arith.constant 4 : index
    %c0_464 = arith.constant 0 : index
    %c0_465 = arith.constant 0 : index
    %712 = vector.load %arg22[%c4_463, %c0_464, %c0_465] : memref<5x2x160xf32, #tpu.memory_space<vmem>>, vector<1x2x160xf32>
    %713 = vector.shape_cast %712 : vector<1x2x160xf32> to vector<2x160xf32>
    %714 = vector.shape_cast %711 : vector<2x160xf32> to vector<1x2x160xf32>
    tpu.vector_store %arg22[%c4_463, %c0_464, %c0_465], %714 {strides = array<i32>} : memref<5x2x160xf32, #tpu.memory_space<vmem>>, vector<1x2x160xf32>,
    %c2_466 = arith.constant 2 : index
    %c0_467 = arith.constant 0 : index
    %c0_468 = arith.constant 0 : index
    %715 = vector.load %arg20[%c2_466, %c0_467, %c0_468] : memref<5x2x160xf32, #tpu.memory_space<vmem>>, vector<1x2x160xf32>
    %716 = vector.shape_cast %715 : vector<1x2x160xf32> to vector<2x160xf32>
    %c4_469 = arith.constant 4 : index
    %c0_470 = arith.constant 0 : index
    %c0_471 = arith.constant 0 : index
    %717 = vector.load %arg21[%c4_469, %c0_470, %c0_471] : memref<5x2x160xf32, #tpu.memory_space<vmem>>, vector<1x2x160xf32>
    %718 = vector.shape_cast %717 : vector<1x2x160xf32> to vector<2x160xf32>
    %719 = arith.addf %716, %718 : vector<2x160xf32>
    %720 = vector.broadcast %28 : vector<1x160xf32> to vector<2x160xf32>
    %721 = arith.addf %719, %720 : vector<2x160xf32>
    %cst_472 = arith.constant 0.000000e+00 : f32
    %722 = vector.broadcast %cst_472 : f32 to vector<2x160xf32>
    %723 = arith.maximumf %721, %722 : vector<2x160xf32>
    %724 = vector.broadcast %29 : vector<1x160xf32> to vector<2x160xf32>
    %725 = arith.mulf %723, %724 : vector<2x160xf32>
    %cst_473 = arith.constant dense<0.000000e+00> : vector<2xf32>
    %726 = vector.multi_reduction <add>, %725, %cst_473 [1] : vector<2x160xf32> to vector<2xf32>
    %727 = vector.shape_cast %726 : vector<2xf32> to vector<2x1xf32>
    %728 = vector.broadcast %30 : vector<1x1xf32> to vector<2x1xf32>
    %729 = arith.addf %727, %728 : vector<2x1xf32>
    %cst_474 = arith.constant 0.000000e+00 : f32
    %730 = vector.broadcast %cst_474 : f32 to vector<2x1xf32>
    %731 = arith.subf %730, %729 : vector<2x1xf32>
    %732 = math.exp %731 : vector<2x1xf32>
    %cst_475 = arith.constant 1.000000e+00 : f32
    %733 = vector.broadcast %cst_475 : f32 to vector<2x1xf32>
    %734 = arith.addf %733, %732 : vector<2x1xf32>
    %cst_476 = arith.constant 1.000000e+00 : f32
    %735 = vector.broadcast %cst_476 : f32 to vector<2x1xf32>
    %736 = arith.divf %735, %734 : vector<2x1xf32>
    %cst_477 = arith.constant 1.000000e+00 : f32
    %737 = vector.broadcast %cst_477 : f32 to vector<2x1xf32>
    %738 = arith.addf %737, %736 : vector<2x1xf32>
    %739 = vector.broadcast %738 : vector<2x1xf32> to vector<2x160xf32>
    %740 = arith.mulf %723, %739 : vector<2x160xf32>
    %c2_478 = arith.constant 2 : index
    %c0_479 = arith.constant 0 : index
    %c0_480 = arith.constant 0 : index
    %741 = vector.load %arg22[%c2_478, %c0_479, %c0_480] : memref<5x2x160xf32, #tpu.memory_space<vmem>>, vector<1x2x160xf32>
    %742 = vector.shape_cast %741 : vector<1x2x160xf32> to vector<2x160xf32>
    %743 = arith.addf %742, %740 : vector<2x160xf32>
    %c2_481 = arith.constant 2 : index
    %c0_482 = arith.constant 0 : index
    %c0_483 = arith.constant 0 : index
    %744 = vector.load %arg22[%c2_481, %c0_482, %c0_483] : memref<5x2x160xf32, #tpu.memory_space<vmem>>, vector<1x2x160xf32>
    %745 = vector.shape_cast %744 : vector<1x2x160xf32> to vector<2x160xf32>
    %746 = vector.shape_cast %743 : vector<2x160xf32> to vector<1x2x160xf32>
    tpu.vector_store %arg22[%c2_481, %c0_482, %c0_483], %746 {strides = array<i32>} : memref<5x2x160xf32, #tpu.memory_space<vmem>>, vector<1x2x160xf32>,
    %c4_484 = arith.constant 4 : index
    %c0_485 = arith.constant 0 : index
    %c0_486 = arith.constant 0 : index
    %747 = vector.load %arg22[%c4_484, %c0_485, %c0_486] : memref<5x2x160xf32, #tpu.memory_space<vmem>>, vector<1x2x160xf32>
    %748 = vector.shape_cast %747 : vector<1x2x160xf32> to vector<2x160xf32>
    %749 = arith.addf %748, %740 : vector<2x160xf32>
    %c4_487 = arith.constant 4 : index
    %c0_488 = arith.constant 0 : index
    %c0_489 = arith.constant 0 : index
    %750 = vector.load %arg22[%c4_487, %c0_488, %c0_489] : memref<5x2x160xf32, #tpu.memory_space<vmem>>, vector<1x2x160xf32>
    %751 = vector.shape_cast %750 : vector<1x2x160xf32> to vector<2x160xf32>
    %752 = vector.shape_cast %749 : vector<2x160xf32> to vector<1x2x160xf32>
    tpu.vector_store %arg22[%c4_487, %c0_488, %c0_489], %752 {strides = array<i32>} : memref<5x2x160xf32, #tpu.memory_space<vmem>>, vector<1x2x160xf32>,
    %c3_490 = arith.constant 3 : index
    %c0_491 = arith.constant 0 : index
    %c0_492 = arith.constant 0 : index
    %753 = vector.load %arg20[%c3_490, %c0_491, %c0_492] : memref<5x2x160xf32, #tpu.memory_space<vmem>>, vector<1x2x160xf32>
    %754 = vector.shape_cast %753 : vector<1x2x160xf32> to vector<2x160xf32>
    %c4_493 = arith.constant 4 : index
    %c0_494 = arith.constant 0 : index
    %c0_495 = arith.constant 0 : index
    %755 = vector.load %arg21[%c4_493, %c0_494, %c0_495] : memref<5x2x160xf32, #tpu.memory_space<vmem>>, vector<1x2x160xf32>
    %756 = vector.shape_cast %755 : vector<1x2x160xf32> to vector<2x160xf32>
    %757 = arith.addf %754, %756 : vector<2x160xf32>
    %758 = vector.broadcast %28 : vector<1x160xf32> to vector<2x160xf32>
    %759 = arith.addf %757, %758 : vector<2x160xf32>
    %cst_496 = arith.constant 0.000000e+00 : f32
    %760 = vector.broadcast %cst_496 : f32 to vector<2x160xf32>
    %761 = arith.maximumf %759, %760 : vector<2x160xf32>
    %762 = vector.broadcast %29 : vector<1x160xf32> to vector<2x160xf32>
    %763 = arith.mulf %761, %762 : vector<2x160xf32>
    %cst_497 = arith.constant dense<0.000000e+00> : vector<2xf32>
    %764 = vector.multi_reduction <add>, %763, %cst_497 [1] : vector<2x160xf32> to vector<2xf32>
    %765 = vector.shape_cast %764 : vector<2xf32> to vector<2x1xf32>
    %766 = vector.broadcast %30 : vector<1x1xf32> to vector<2x1xf32>
    %767 = arith.addf %765, %766 : vector<2x1xf32>
    %cst_498 = arith.constant 0.000000e+00 : f32
    %768 = vector.broadcast %cst_498 : f32 to vector<2x1xf32>
    %769 = arith.subf %768, %767 : vector<2x1xf32>
    %770 = math.exp %769 : vector<2x1xf32>
    %cst_499 = arith.constant 1.000000e+00 : f32
    %771 = vector.broadcast %cst_499 : f32 to vector<2x1xf32>
    %772 = arith.addf %771, %770 : vector<2x1xf32>
    %cst_500 = arith.constant 1.000000e+00 : f32
    %773 = vector.broadcast %cst_500 : f32 to vector<2x1xf32>
    %774 = arith.divf %773, %772 : vector<2x1xf32>
    %cst_501 = arith.constant 1.000000e+00 : f32
    %775 = vector.broadcast %cst_501 : f32 to vector<2x1xf32>
    %776 = arith.addf %775, %774 : vector<2x1xf32>
    %777 = vector.broadcast %776 : vector<2x1xf32> to vector<2x160xf32>
    %778 = arith.mulf %761, %777 : vector<2x160xf32>
    %c3_502 = arith.constant 3 : index
    %c0_503 = arith.constant 0 : index
    %c0_504 = arith.constant 0 : index
    %779 = vector.load %arg22[%c3_502, %c0_503, %c0_504] : memref<5x2x160xf32, #tpu.memory_space<vmem>>, vector<1x2x160xf32>
    %780 = vector.shape_cast %779 : vector<1x2x160xf32> to vector<2x160xf32>
    %781 = arith.addf %780, %778 : vector<2x160xf32>
    %c3_505 = arith.constant 3 : index
    %c0_506 = arith.constant 0 : index
    %c0_507 = arith.constant 0 : index
    %782 = vector.load %arg22[%c3_505, %c0_506, %c0_507] : memref<5x2x160xf32, #tpu.memory_space<vmem>>, vector<1x2x160xf32>
    %783 = vector.shape_cast %782 : vector<1x2x160xf32> to vector<2x160xf32>
    %784 = vector.shape_cast %781 : vector<2x160xf32> to vector<1x2x160xf32>
    tpu.vector_store %arg22[%c3_505, %c0_506, %c0_507], %784 {strides = array<i32>} : memref<5x2x160xf32, #tpu.memory_space<vmem>>, vector<1x2x160xf32>,
    %c4_508 = arith.constant 4 : index
    %c0_509 = arith.constant 0 : index
    %c0_510 = arith.constant 0 : index
    %785 = vector.load %arg22[%c4_508, %c0_509, %c0_510] : memref<5x2x160xf32, #tpu.memory_space<vmem>>, vector<1x2x160xf32>
    %786 = vector.shape_cast %785 : vector<1x2x160xf32> to vector<2x160xf32>
    %787 = arith.addf %786, %778 : vector<2x160xf32>
    %c4_511 = arith.constant 4 : index
    %c0_512 = arith.constant 0 : index
    %c0_513 = arith.constant 0 : index
    %788 = vector.load %arg22[%c4_511, %c0_512, %c0_513] : memref<5x2x160xf32, #tpu.memory_space<vmem>>, vector<1x2x160xf32>
    %789 = vector.shape_cast %788 : vector<1x2x160xf32> to vector<2x160xf32>
    %790 = vector.shape_cast %787 : vector<2x160xf32> to vector<1x2x160xf32>
    tpu.vector_store %arg22[%c4_511, %c0_512, %c0_513], %790 {strides = array<i32>} : memref<5x2x160xf32, #tpu.memory_space<vmem>>, vector<1x2x160xf32>,
    %c0_514 = arith.constant 0 : index
    %c0_515 = arith.constant 0 : index
    %c0_516 = arith.constant 0 : index
    %791 = vector.load %arg22[%c0_514, %c0_515, %c0_516] : memref<5x2x160xf32, #tpu.memory_space<vmem>>, vector<5x2x160xf32>
    %792 = vector.shape_cast %791 : vector<5x2x160xf32> to vector<10x160xf32>
    %c0_517 = arith.constant 0 : index
    %c0_518 = arith.constant 0 : index
    %793 = vector.load %arg11[%c0_517, %c0_518] : memref<160x160xf32, #tpu.memory_space<vmem>>, vector<160x160xf32>
    %cst_519 = arith.constant dense<0.000000e+00> : vector<10x160xf32>
    %794 = tpu.matmul %792, %793, %cst_519 {dimension_numbers = #tpu.dot_dimension_numbers<[1], [0], [0], [1], [0, 0, 1, 1], [], []>} : vector<10x160xf32>, vector<160x160xf32>, vector<10x160xf32> -> vector<10x160xf32>
    %c0_520 = arith.constant 0 : index
    %c0_521 = arith.constant 0 : index
    %795 = vector.load %arg12[%c0_520, %c0_521] : memref<1x160xf32, #tpu.memory_space<vmem>>, vector<1x160xf32>
    %796 = vector.broadcast %795 : vector<1x160xf32> to vector<10x160xf32>
    %797 = arith.addf %794, %796 : vector<10x160xf32>
    %cst_522 = arith.constant 0.000000e+00 : f32
    %798 = vector.broadcast %cst_522 : f32 to vector<10x160xf32>
    %799 = arith.maximumf %797, %798 : vector<10x160xf32>
    %800 = vector.shape_cast %799 : vector<10x160xf32> to vector<5x2x160xf32>
    %c0_523 = arith.constant 0 : index
    %c0_524 = arith.constant 0 : index
    %c0_525 = arith.constant 0 : index
    %801 = vector.load %arg22[%c0_523, %c0_524, %c0_525] : memref<5x2x160xf32, #tpu.memory_space<vmem>>, vector<5x2x160xf32>
    tpu.vector_store %arg22[%c0_523, %c0_524, %c0_525], %800 {strides = array<i32>} : memref<5x2x160xf32, #tpu.memory_space<vmem>>, vector<5x2x160xf32>,
    %cst_526 = arith.constant 0.000000e+00 : f32
    %802 = vector.broadcast %cst_526 : f32 to vector<2x128xf32>
    %c0_527 = arith.constant 0 : index
    %c0_528 = arith.constant 0 : index
    %c0_529 = arith.constant 0 : index
    %803 = vector.load %arg19[%c0_527, %c0_528, %c0_529] : memref<5x2x80xf32, #tpu.memory_space<vmem>>, vector<1x2x80xf32>
    %804 = vector.shape_cast %803 : vector<1x2x80xf32> to vector<2x80xf32>
    %c0_530 = arith.constant 0 : index
    %c0_531 = arith.constant 0 : index
    %c0_532 = arith.constant 0 : index
    %805 = vector.load %arg13[%c0_530, %c0_531, %c0_532] : memref<5x80x128xf32, #tpu.memory_space<vmem>>, vector<1x80x128xf32>
    %806 = vector.shape_cast %805 : vector<1x80x128xf32> to vector<80x128xf32>
    %cst_533 = arith.constant dense<0.000000e+00> : vector<2x128xf32>
    %807 = tpu.matmul %804, %806, %cst_533 {dimension_numbers = #tpu.dot_dimension_numbers<[1], [0], [0], [1], [0, 0, 1, 1], [], []>} : vector<2x80xf32>, vector<80x128xf32>, vector<2x128xf32> -> vector<2x128xf32>
    %808 = arith.addf %802, %807 : vector<2x128xf32>
    %c0_534 = arith.constant 0 : index
    %c0_535 = arith.constant 0 : index
    %c0_536 = arith.constant 0 : index
    %809 = vector.load %arg22[%c0_534, %c0_535, %c0_536] : memref<5x2x160xf32, #tpu.memory_space<vmem>>, vector<1x2x160xf32>
    %810 = vector.shape_cast %809 : vector<1x2x160xf32> to vector<2x160xf32>
    %c0_537 = arith.constant 0 : index
    %c0_538 = arith.constant 0 : index
    %c0_539 = arith.constant 0 : index
    %811 = vector.load %arg14[%c0_537, %c0_538, %c0_539] : memref<5x160x128xf32, #tpu.memory_space<vmem>>, vector<1x160x128xf32>
    %812 = vector.shape_cast %811 : vector<1x160x128xf32> to vector<160x128xf32>
    %cst_540 = arith.constant dense<0.000000e+00> : vector<2x128xf32>
    %813 = tpu.matmul %810, %812, %cst_540 {dimension_numbers = #tpu.dot_dimension_numbers<[1], [0], [0], [1], [0, 0, 1, 1], [], []>} : vector<2x160xf32>, vector<160x128xf32>, vector<2x128xf32> -> vector<2x128xf32>
    %814 = arith.addf %808, %813 : vector<2x128xf32>
    %c1_541 = arith.constant 1 : index
    %c0_542 = arith.constant 0 : index
    %c0_543 = arith.constant 0 : index
    %815 = vector.load %arg19[%c1_541, %c0_542, %c0_543] : memref<5x2x80xf32, #tpu.memory_space<vmem>>, vector<1x2x80xf32>
    %816 = vector.shape_cast %815 : vector<1x2x80xf32> to vector<2x80xf32>
    %c1_544 = arith.constant 1 : index
    %c0_545 = arith.constant 0 : index
    %c0_546 = arith.constant 0 : index
    %817 = vector.load %arg13[%c1_544, %c0_545, %c0_546] : memref<5x80x128xf32, #tpu.memory_space<vmem>>, vector<1x80x128xf32>
    %818 = vector.shape_cast %817 : vector<1x80x128xf32> to vector<80x128xf32>
    %cst_547 = arith.constant dense<0.000000e+00> : vector<2x128xf32>
    %819 = tpu.matmul %816, %818, %cst_547 {dimension_numbers = #tpu.dot_dimension_numbers<[1], [0], [0], [1], [0, 0, 1, 1], [], []>} : vector<2x80xf32>, vector<80x128xf32>, vector<2x128xf32> -> vector<2x128xf32>
    %820 = arith.addf %814, %819 : vector<2x128xf32>
    %c1_548 = arith.constant 1 : index
    %c0_549 = arith.constant 0 : index
    %c0_550 = arith.constant 0 : index
    %821 = vector.load %arg22[%c1_548, %c0_549, %c0_550] : memref<5x2x160xf32, #tpu.memory_space<vmem>>, vector<1x2x160xf32>
    %822 = vector.shape_cast %821 : vector<1x2x160xf32> to vector<2x160xf32>
    %c1_551 = arith.constant 1 : index
    %c0_552 = arith.constant 0 : index
    %c0_553 = arith.constant 0 : index
    %823 = vector.load %arg14[%c1_551, %c0_552, %c0_553] : memref<5x160x128xf32, #tpu.memory_space<vmem>>, vector<1x160x128xf32>
    %824 = vector.shape_cast %823 : vector<1x160x128xf32> to vector<160x128xf32>
    %cst_554 = arith.constant dense<0.000000e+00> : vector<2x128xf32>
    %825 = tpu.matmul %822, %824, %cst_554 {dimension_numbers = #tpu.dot_dimension_numbers<[1], [0], [0], [1], [0, 0, 1, 1], [], []>} : vector<2x160xf32>, vector<160x128xf32>, vector<2x128xf32> -> vector<2x128xf32>
    %826 = arith.addf %820, %825 : vector<2x128xf32>
    %c2_555 = arith.constant 2 : index
    %c0_556 = arith.constant 0 : index
    %c0_557 = arith.constant 0 : index
    %827 = vector.load %arg19[%c2_555, %c0_556, %c0_557] : memref<5x2x80xf32, #tpu.memory_space<vmem>>, vector<1x2x80xf32>
    %828 = vector.shape_cast %827 : vector<1x2x80xf32> to vector<2x80xf32>
    %c2_558 = arith.constant 2 : index
    %c0_559 = arith.constant 0 : index
    %c0_560 = arith.constant 0 : index
    %829 = vector.load %arg13[%c2_558, %c0_559, %c0_560] : memref<5x80x128xf32, #tpu.memory_space<vmem>>, vector<1x80x128xf32>
    %830 = vector.shape_cast %829 : vector<1x80x128xf32> to vector<80x128xf32>
    %cst_561 = arith.constant dense<0.000000e+00> : vector<2x128xf32>
    %831 = tpu.matmul %828, %830, %cst_561 {dimension_numbers = #tpu.dot_dimension_numbers<[1], [0], [0], [1], [0, 0, 1, 1], [], []>} : vector<2x80xf32>, vector<80x128xf32>, vector<2x128xf32> -> vector<2x128xf32>
    %832 = arith.addf %826, %831 : vector<2x128xf32>
    %c2_562 = arith.constant 2 : index
    %c0_563 = arith.constant 0 : index
    %c0_564 = arith.constant 0 : index
    %833 = vector.load %arg22[%c2_562, %c0_563, %c0_564] : memref<5x2x160xf32, #tpu.memory_space<vmem>>, vector<1x2x160xf32>
    %834 = vector.shape_cast %833 : vector<1x2x160xf32> to vector<2x160xf32>
    %c2_565 = arith.constant 2 : index
    %c0_566 = arith.constant 0 : index
    %c0_567 = arith.constant 0 : index
    %835 = vector.load %arg14[%c2_565, %c0_566, %c0_567] : memref<5x160x128xf32, #tpu.memory_space<vmem>>, vector<1x160x128xf32>
    %836 = vector.shape_cast %835 : vector<1x160x128xf32> to vector<160x128xf32>
    %cst_568 = arith.constant dense<0.000000e+00> : vector<2x128xf32>
    %837 = tpu.matmul %834, %836, %cst_568 {dimension_numbers = #tpu.dot_dimension_numbers<[1], [0], [0], [1], [0, 0, 1, 1], [], []>} : vector<2x160xf32>, vector<160x128xf32>, vector<2x128xf32> -> vector<2x128xf32>
    %838 = arith.addf %832, %837 : vector<2x128xf32>
    %c3_569 = arith.constant 3 : index
    %c0_570 = arith.constant 0 : index
    %c0_571 = arith.constant 0 : index
    %839 = vector.load %arg19[%c3_569, %c0_570, %c0_571] : memref<5x2x80xf32, #tpu.memory_space<vmem>>, vector<1x2x80xf32>
    %840 = vector.shape_cast %839 : vector<1x2x80xf32> to vector<2x80xf32>
    %c3_572 = arith.constant 3 : index
    %c0_573 = arith.constant 0 : index
    %c0_574 = arith.constant 0 : index
    %841 = vector.load %arg13[%c3_572, %c0_573, %c0_574] : memref<5x80x128xf32, #tpu.memory_space<vmem>>, vector<1x80x128xf32>
    %842 = vector.shape_cast %841 : vector<1x80x128xf32> to vector<80x128xf32>
    %cst_575 = arith.constant dense<0.000000e+00> : vector<2x128xf32>
    %843 = tpu.matmul %840, %842, %cst_575 {dimension_numbers = #tpu.dot_dimension_numbers<[1], [0], [0], [1], [0, 0, 1, 1], [], []>} : vector<2x80xf32>, vector<80x128xf32>, vector<2x128xf32> -> vector<2x128xf32>
    %844 = arith.addf %838, %843 : vector<2x128xf32>
    %c3_576 = arith.constant 3 : index
    %c0_577 = arith.constant 0 : index
    %c0_578 = arith.constant 0 : index
    %845 = vector.load %arg22[%c3_576, %c0_577, %c0_578] : memref<5x2x160xf32, #tpu.memory_space<vmem>>, vector<1x2x160xf32>
    %846 = vector.shape_cast %845 : vector<1x2x160xf32> to vector<2x160xf32>
    %c3_579 = arith.constant 3 : index
    %c0_580 = arith.constant 0 : index
    %c0_581 = arith.constant 0 : index
    %847 = vector.load %arg14[%c3_579, %c0_580, %c0_581] : memref<5x160x128xf32, #tpu.memory_space<vmem>>, vector<1x160x128xf32>
    %848 = vector.shape_cast %847 : vector<1x160x128xf32> to vector<160x128xf32>
    %cst_582 = arith.constant dense<0.000000e+00> : vector<2x128xf32>
    %849 = tpu.matmul %846, %848, %cst_582 {dimension_numbers = #tpu.dot_dimension_numbers<[1], [0], [0], [1], [0, 0, 1, 1], [], []>} : vector<2x160xf32>, vector<160x128xf32>, vector<2x128xf32> -> vector<2x128xf32>
    %850 = arith.addf %844, %849 : vector<2x128xf32>
    %c4_583 = arith.constant 4 : index
    %c0_584 = arith.constant 0 : index
    %c0_585 = arith.constant 0 : index
    %851 = vector.load %arg19[%c4_583, %c0_584, %c0_585] : memref<5x2x80xf32, #tpu.memory_space<vmem>>, vector<1x2x80xf32>
    %852 = vector.shape_cast %851 : vector<1x2x80xf32> to vector<2x80xf32>
    %c4_586 = arith.constant 4 : index
    %c0_587 = arith.constant 0 : index
    %c0_588 = arith.constant 0 : index
    %853 = vector.load %arg13[%c4_586, %c0_587, %c0_588] : memref<5x80x128xf32, #tpu.memory_space<vmem>>, vector<1x80x128xf32>
    %854 = vector.shape_cast %853 : vector<1x80x128xf32> to vector<80x128xf32>
    %cst_589 = arith.constant dense<0.000000e+00> : vector<2x128xf32>
    %855 = tpu.matmul %852, %854, %cst_589 {dimension_numbers = #tpu.dot_dimension_numbers<[1], [0], [0], [1], [0, 0, 1, 1], [], []>} : vector<2x80xf32>, vector<80x128xf32>, vector<2x128xf32> -> vector<2x128xf32>
    %856 = arith.addf %850, %855 : vector<2x128xf32>
    %c4_590 = arith.constant 4 : index
    %c0_591 = arith.constant 0 : index
    %c0_592 = arith.constant 0 : index
    %857 = vector.load %arg22[%c4_590, %c0_591, %c0_592] : memref<5x2x160xf32, #tpu.memory_space<vmem>>, vector<1x2x160xf32>
    %858 = vector.shape_cast %857 : vector<1x2x160xf32> to vector<2x160xf32>
    %c4_593 = arith.constant 4 : index
    %c0_594 = arith.constant 0 : index
    %c0_595 = arith.constant 0 : index
    %859 = vector.load %arg14[%c4_593, %c0_594, %c0_595] : memref<5x160x128xf32, #tpu.memory_space<vmem>>, vector<1x160x128xf32>
    %860 = vector.shape_cast %859 : vector<1x160x128xf32> to vector<160x128xf32>
    %cst_596 = arith.constant dense<0.000000e+00> : vector<2x128xf32>
    %861 = tpu.matmul %858, %860, %cst_596 {dimension_numbers = #tpu.dot_dimension_numbers<[1], [0], [0], [1], [0, 0, 1, 1], [], []>} : vector<2x160xf32>, vector<160x128xf32>, vector<2x128xf32> -> vector<2x128xf32>
    %862 = arith.addf %856, %861 : vector<2x128xf32>
    %c0_597 = arith.constant 0 : index
    %c0_598 = arith.constant 0 : index
    %863 = vector.load %arg15[%c0_597, %c0_598] : memref<1x128xf32, #tpu.memory_space<vmem>>, vector<1x128xf32>
    %864 = vector.broadcast %863 : vector<1x128xf32> to vector<2x128xf32>
    %865 = arith.addf %862, %864 : vector<2x128xf32>
    %cst_599 = arith.constant 0.000000e+00 : f32
    %866 = vector.broadcast %cst_599 : f32 to vector<2x128xf32>
    %867 = arith.maximumf %865, %866 : vector<2x128xf32>
    %c0_600 = arith.constant 0 : index
    %c0_601 = arith.constant 0 : index
    %868 = vector.load %arg16[%c0_600, %c0_601] : memref<128x128xf32, #tpu.memory_space<vmem>>, vector<128x128xf32>
    %cst_602 = arith.constant dense<0.000000e+00> : vector<2x128xf32>
    %869 = tpu.matmul %867, %868, %cst_602 {dimension_numbers = #tpu.dot_dimension_numbers<[1], [0], [0], [1], [0, 0, 1, 1], [], []>} : vector<2x128xf32>, vector<128x128xf32>, vector<2x128xf32> -> vector<2x128xf32>
    %c0_603 = arith.constant 0 : index
    %c0_604 = arith.constant 0 : index
    %870 = vector.load %arg17[%c0_603, %c0_604] : memref<1x128xf32, #tpu.memory_space<vmem>>, vector<1x128xf32>
    %871 = vector.broadcast %870 : vector<1x128xf32> to vector<2x128xf32>
    %872 = arith.addf %869, %871 : vector<2x128xf32>
    %c0_605 = arith.constant 0 : index
    %c0_606 = arith.constant 0 : index
    %873 = vector.load %arg18[%c0_605, %c0_606] : memref<2x128xf32, #tpu.memory_space<vmem>>, vector<2x128xf32>
    tpu.vector_store %arg18[%c0_605, %c0_606], %872 {strides = array<i32>} : memref<2x128xf32, #tpu.memory_space<vmem>>, vector<2x128xf32>,
    return
  }
  func.func @transform_0(%arg0: i32) -> (i32, i32, i32) {
    %c0_i32 = arith.constant 0 : i32
    %c0_i32_0 = arith.constant 0 : i32
    %c0_i32_1 = arith.constant 0 : i32
    return %c0_i32, %arg0, %c0_i32_0 : i32, i32, i32
  }
  func.func @transform_1(%arg0: i32) -> (i32, i32) {
    %c0_i32 = arith.constant 0 : i32
    %c0_i32_0 = arith.constant 0 : i32
    %c0_i32_1 = arith.constant 0 : i32
    return %c0_i32, %c0_i32_0 : i32, i32
  }
  func.func @transform_2(%arg0: i32) -> (i32, i32) {
    %c0_i32 = arith.constant 0 : i32
    %c0_i32_0 = arith.constant 0 : i32
    %c0_i32_1 = arith.constant 0 : i32
    return %c0_i32, %c0_i32_0 : i32, i32
  }
  func.func @transform_3(%arg0: i32) -> (i32, i32) {
    %c0_i32 = arith.constant 0 : i32
    %c0_i32_0 = arith.constant 0 : i32
    %c0_i32_1 = arith.constant 0 : i32
    return %c0_i32, %c0_i32_0 : i32, i32
  }
  func.func @transform_4(%arg0: i32) -> (i32, i32) {
    %c0_i32 = arith.constant 0 : i32
    %c0_i32_0 = arith.constant 0 : i32
    %c0_i32_1 = arith.constant 0 : i32
    return %c0_i32, %c0_i32_0 : i32, i32
  }
  func.func @transform_5(%arg0: i32) -> (i32, i32) {
    %c0_i32 = arith.constant 0 : i32
    %c0_i32_0 = arith.constant 0 : i32
    %c0_i32_1 = arith.constant 0 : i32
    return %c0_i32, %c0_i32_0 : i32, i32
  }
  func.func @transform_6(%arg0: i32) -> (i32, i32) {
    %c0_i32 = arith.constant 0 : i32
    %c0_i32_0 = arith.constant 0 : i32
    %c0_i32_1 = arith.constant 0 : i32
    return %c0_i32, %c0_i32_0 : i32, i32
  }
  func.func @transform_7(%arg0: i32) -> (i32, i32) {
    %c0_i32 = arith.constant 0 : i32
    %c0_i32_0 = arith.constant 0 : i32
    %c0_i32_1 = arith.constant 0 : i32
    return %c0_i32, %c0_i32_0 : i32, i32
  }
  func.func @transform_8(%arg0: i32) -> (i32, i32) {
    %c0_i32 = arith.constant 0 : i32
    %c0_i32_0 = arith.constant 0 : i32
    %c0_i32_1 = arith.constant 0 : i32
    return %c0_i32, %c0_i32_0 : i32, i32
  }
  func.func @transform_9(%arg0: i32) -> (i32, i32) {
    %c0_i32 = arith.constant 0 : i32
    %c0_i32_0 = arith.constant 0 : i32
    %c0_i32_1 = arith.constant 0 : i32
    return %c0_i32, %c0_i32_0 : i32, i32
  }
  func.func @transform_10(%arg0: i32) -> (i32, i32) {
    %c0_i32 = arith.constant 0 : i32
    %c0_i32_0 = arith.constant 0 : i32
    %c0_i32_1 = arith.constant 0 : i32
    return %c0_i32, %c0_i32_0 : i32, i32
  }
  func.func @transform_11(%arg0: i32) -> (i32, i32) {
    %c0_i32 = arith.constant 0 : i32
    %c0_i32_0 = arith.constant 0 : i32
    %c0_i32_1 = arith.constant 0 : i32
    return %c0_i32, %c0_i32_0 : i32, i32
  }
  func.func @transform_12(%arg0: i32) -> (i32, i32, i32) {
    %c0_i32 = arith.constant 0 : i32
    %c0_i32_0 = arith.constant 0 : i32
    %c0_i32_1 = arith.constant 0 : i32
    %c0_i32_2 = arith.constant 0 : i32
    return %c0_i32, %c0_i32_0, %c0_i32_1 : i32, i32, i32
  }
  func.func @transform_13(%arg0: i32) -> (i32, i32, i32) {
    %c0_i32 = arith.constant 0 : i32
    %c0_i32_0 = arith.constant 0 : i32
    %c0_i32_1 = arith.constant 0 : i32
    %c0_i32_2 = arith.constant 0 : i32
    return %c0_i32, %c0_i32_0, %c0_i32_1 : i32, i32, i32
  }
  func.func @transform_14(%arg0: i32) -> (i32, i32) {
    %c0_i32 = arith.constant 0 : i32
    %c0_i32_0 = arith.constant 0 : i32
    %c0_i32_1 = arith.constant 0 : i32
    return %c0_i32, %c0_i32_0 : i32, i32
  }
  func.func @transform_15(%arg0: i32) -> (i32, i32) {
    %c0_i32 = arith.constant 0 : i32
    %c0_i32_0 = arith.constant 0 : i32
    %c0_i32_1 = arith.constant 0 : i32
    return %c0_i32, %c0_i32_0 : i32, i32
  }
  func.func @transform_16(%arg0: i32) -> (i32, i32) {
    %c0_i32 = arith.constant 0 : i32
    %c0_i32_0 = arith.constant 0 : i32
    %c0_i32_1 = arith.constant 0 : i32
    return %c0_i32, %c0_i32_0 : i32, i32
  }
  func.func @transform_17(%arg0: i32) -> (i32, i32) {
    %c0_i32 = arith.constant 0 : i32
    %c0_i32_0 = arith.constant 0 : i32
    return %arg0, %c0_i32 : i32, i32
  }
}

</mosaic_0001>

<bundles_post_ra>
// kernel: tile.8
= control target key start
LH: loop header
LB: loop body
LE: loop exit
PB: predicated region body
PF: predicated region fallthrough
CT: control target
= control target key end

     0   :  { %s34_s0 = inlined_call_operand.vmem [shape: f32[8], index: 0, kind: input, shape index: {}]   ;;  %s35_s1 = inlined_call_operand.vmem [shape: f32[24,8], index: 1, kind: output, shape index: {}]  }
   0x1   :  { %v4_v0 = vld [vmem:[%s34_s0] ss:$0 sm:$0xff] }
   0x2   :  { %5 = vst [vmem:[%s35_s1] sm:$0xff] %v4_v0 }
   0x3   :  { %10 = vst [vmem:[%s35_s1 + $0x8] sm:$0xff] %v4_v0 }
   0x4   :  { %11 = vst [vmem:[%s35_s1 + $0x10] sm:$0xff] %v4_v0 }

// kernel: tile.9
= control target key start
LH: loop header
LB: loop body
LE: loop exit
PB: predicated region body
PF: predicated region fallthrough
CT: control target
= control target key end

     0   :  { %s146_s10 = smov 120   ;;  %s147_s11 = smov 104   ;;  %vm4_vm0 = vcmask 64512   ;;  %vm10_vm1 = vcmask 1048512   ;;  %vm16_vm2 = vcmask 982912   ;;  %vm22_vm3 = vcmask 917312   ;;  %s225_s0 = inlined_call_operand.vmem [shape: f32[24,8], index: 0, kind: input, shape index: {}]   ;;  %s226_s1 = inlined_call_operand.vmem [shape: f32[1,192], index: 1, kind: output, shape index: {}]  }
   0x1   :  { %v115_v0 = vld [vmem:[%s225_s0 + $0xf] sm:$0x1]   ;;  %v117_v1 = vld [vmem:[%s225_s0 + $0xd] sm:$0x1]   ;;  %v119_v2 = vld [vmem:[%s225_s0 + $0xb] sm:$0x1]  }
   0x2   :  { %8 = vrot.lane.b32.xlu0 %v115_v0, %s146_s10  ;;  %20 = vrot.lane.b32.xlu1 %v117_v1, %s147_s11  ;;  %v116_v3 = vld [vmem:[%s225_s0 + $0xe] sm:$0x1]   ;;  %v118_v4 = vld [vmem:[%s225_s0 + $0xc] sm:$0x1]   ;;  %s148_s18 = smov 88   ;;  %s149_s19 = smov 112  }
   0x3   :  { %32 = vrot.lane.b32.xlu2 %v119_v2, %s148_s18  ;;  %s150_s20 = smov 96   ;;  %v120_v5 = vld [vmem:[%s225_s0 + $0xa] sm:$0x1]   ;;  %v121_v6 = vld [vmem:[%s225_s0 + $0x9] sm:$0x1]   ;;  %s151_s27 = smov 80  }
   0x4   :  { %v122_v7 = vld [vmem:[%s225_s0 + $0x8] sm:$0x1]   ;;  %s55_s28 = smov 3  ;;  %s152_s29 = smov 72   ;;  %vm28_vm4 = vcmask 851712   ;;  %vm34_vm5 = vcmask 786112  }
   0x5   :  { %s153_s30 = smov 64   ;;  %s62_s2 = smov 3  ;;  %v123_v8 = vld [vmem:[%s225_s0 + $0x7] ss:$16 sm:%s55_s28]   ;;  %vm40_vm6 = vcmask 720512   ;;  %vm46_vm7 = vcmask 654912  }
   0x6   :  { %s69_s3 = smov 3  ;;  %v124_v9 = vld [vmem:[%s225_s0 + $0x6] ss:$16 sm:%s62_s2]   ;;  %s154_s10 = smov 56   ;;  %vm52_vm8 = vcmask 589312   ;;  %vm59_vm9 = vcmask 523712  }
   0x7   :  { %v125_v10 = vld [vmem:[%s225_s0 + $0x5] ss:$16 sm:%s69_s3]   ;;  %s76_s11 = smov 3  ;;  %s155_s12 = smov 48   ;;  %vm66_vm10 = vcmask 458112   ;;  %vm73_vm11 = vcmask 392512  }
   0x8   :  { %s156_s13 = smov 40   ;;  %s83_s14 = smov 3  ;;  %v126_v11 = vld [vmem:[%s225_s0 + $0x4] ss:$16 sm:%s76_s11]   ;;  %vm80_vm12 = vcmask 326912   ;;  %vm87_vm13 = vcmask 261312  }
   0x9   :  { %s90_s15 = smov 3  ;;  %v127_v12 = vld [vmem:[%s225_s0 + $0x3] ss:$16 sm:%s83_s14]   ;;  %s157_s22 = smov 32   ;;  %vm94_vm14 = vcmask 195712   ;;  %vm101_vm15 = vcmask 130112  }
   0xa   :  { %14 = vrot.lane.b32.xlu0 %v116_v3, %s149_s19  ;;  %26 = vrot.lane.b32.xlu1 %v118_v4, %s150_s20  ;;  %v128_v13 = vld [vmem:[%s225_s0 + $0x2] ss:$16 sm:%s90_s15]   ;;  %s97_s23 = smov 3  ;;  %s158_s24 = smov 24  }
   0xb   :  { %38 = vrot.lane.b32.xlu2 %v120_v5, %s151_s27  ;;  %s159_s25 = smov 16   ;;  %v129_v14 = vld [vmem:[%s225_s0 + $0x1] ss:$16 sm:%s97_s23]   ;;  %s160_s28 = smov 8  }
  0x12   :  { %44 = vrot.lane.b32.xlu0 %v121_v6, %s152_s29  ;;  %50 = vrot.lane.b32.xlu1 %v122_v7, %s153_s30  ;;  %s2_s29 = smov 3 }
  0x13   :  { %57 = vrot.lane.b32.xlu2 %v123_v8, %s154_s10  ;;  %v3_v15 = vld [vmem:[%s225_s0] ss:$16 sm:%s2_s29]  }
  0x14   :  { %5 = vst.msk [vmem:[#allocation0] ss:$8 sm:$0x3] %vm4_vm0, %v3_v15  }
  0x1a   :  { %64 = vrot.lane.b32.xlu0 %v124_v9, %s155_s12  ;;  %71 = vrot.lane.b32.xlu1 %v125_v10, %s156_s13 }
  0x1b   :  { %78 = vrot.lane.b32.xlu2 %v126_v11, %s157_s22 }
  0x22   :  { %85 = vrot.lane.b32.xlu0 %v127_v12, %s158_s24  ;;  %92 = vrot.lane.b32.xlu1 %v128_v13, %s159_s25 }
  0x23   :  { %99 = vrot.lane.b32.xlu2 %v129_v14, %s160_s28 }
  0x5d   :  { %v33_v16 = vpop.permute.xlu2 %32  }
  0x65   :  { %v39_v17 = vpop.permute.xlu2 %38  }
  0x6d   :  { %v58_v18 = vpop.permute.xlu2 %57  }
  0x74   :  { %v9_v19 = vpop.permute.xlu0 %8   ;;  %v21_v20 = vpop.permute.xlu1 %20  }
  0x75   :  { %11 = vst.msk [vmem:[#allocation0] sm:$0x1] %vm10_vm1, %v9_v19   ;;  %v79_v21 = vpop.permute.xlu2 %78  }
  0x7c   :  { %v15_v22 = vpop.permute.xlu0 %14   ;;  %v27_v23 = vpop.permute.xlu1 %26  }
  0x7d   :  { %17 = vst.msk [vmem:[#allocation0] sm:$0x1] %vm16_vm2, %v15_v22   ;;  %v100_v24 = vpop.permute.xlu2 %99  }
  0x7e   :  { %23 = vst.msk [vmem:[#allocation0] sm:$0x1] %vm22_vm3, %v21_v20  }
  0x7f   :  { %29 = vst.msk [vmem:[#allocation0] sm:$0x1] %vm28_vm4, %v27_v23  }
  0x80   :  { %35 = vst.msk [vmem:[#allocation0] sm:$0x1] %vm34_vm5, %v33_v16  }
  0x81   :  { %41 = vst.msk [vmem:[#allocation0] sm:$0x1] %vm40_vm6, %v39_v17  }
  0x84   :  { %v45_v25 = vpop.permute.xlu0 %44   ;;  %v51_v26 = vpop.permute.xlu1 %50  }
  0x85   :  { %47 = vst.msk [vmem:[#allocation0] sm:$0x1] %vm46_vm7, %v45_v25  }
  0x86   :  { %53 = vst.msk [vmem:[#allocation0] sm:$0x1] %vm52_vm8, %v51_v26  }
  0x87   :  { %60 = vst.msk [vmem:[#allocation0] ss:$8 sm:$0x3] %vm59_vm9, %v58_v18  }
  0x8c   :  { %v65_v27 = vpop.permute.xlu0 %64   ;;  %v72_v28 = vpop.permute.xlu1 %71  }
  0x8d   :  { %67 = vst.msk [vmem:[#allocation0] ss:$8 sm:$0x3] %vm66_vm10, %v65_v27  }
  0x8e   :  { %74 = vst.msk [vmem:[#allocation0] ss:$8 sm:$0x3] %vm73_vm11, %v72_v28  }
  0x8f   :  { %81 = vst.msk [vmem:[#allocation0] ss:$8 sm:$0x3] %vm80_vm12, %v79_v21  }
  0x94   :  { %v86_v29 = vpop.permute.xlu0 %85   ;;  %v93_v30 = vpop.permute.xlu1 %92  }
  0x95   :  { %88 = vst.msk [vmem:[#allocation0] ss:$8 sm:$0x3] %vm87_vm13, %v86_v29  }
  0x96   :  { %95 = vst.msk [vmem:[#allocation0] ss:$8 sm:$0x3] %vm94_vm14, %v93_v30  }
  0x97   :  { %102 = vst.msk [vmem:[#allocation0] ss:$8 sm:$0x3] %vm101_vm15, %v100_v24  }
  0x9e   :  { %v105_v31 = vld [vmem:[#allocation0] sm:$0x1]  ;;  %v110_v32 = vld [vmem:[#allocation0 + $0x8] sm:$0x1] }
  0x9f   :  { %108 = vst [vmem:[%s226_s1] sm:$0x1] %v105_v31 }
  0xa0   :  { %130 = vst [vmem:[%s226_s1 + $0x1] sm:$0x1] %v110_v32 }

// kernel: _lambda_.1
= control target key start
LH: loop header
LB: loop body
LE: loop exit
PB: predicated region body
PF: predicated region fallthrough
CT: control target
= control target key end

     0   :  { %s4338_s0 = inlined_call_operand.vmem [shape: f32[5,2,216], index: 0, kind: input, shape index: {}]   ;;  %s4339_s1 = inlined_call_operand.vmem [shape: f32[216,192], index: 1, kind: input, shape index: {}]   ;;  %s4340_s2 = inlined_call_operand.vmem [shape: f32[1,192], index: 2, kind: input, shape index: {}]   ;;  %s4341_s3 = inlined_call_operand.vmem [shape: f32[192,80], index: 3, kind: input, shape index: {}]   ;;  %s4342_s4 = inlined_call_operand.vmem [shape: f32[1,80], index: 4, kind: input, shape index: {}]   ;;  %s4343_s5 = inlined_call_operand.vmem [shape: f32[80,160], index: 5, kind: input, shape index: {}]   ;;  %s4344_s6 = inlined_call_operand.vmem [shape: f32[80,160], index: 6, kind: input, shape index: {}]   ;;  %s4345_s7 = inlined_call_operand.vmem [shape: f32[1,160], index: 7, kind: input, shape index: {}]   ;;  %s4346_s8 = inlined_call_operand.vmem [shape: f32[1,160], index: 8, kind: input, shape index: {}]   ;;  %s4347_s9 = inlined_call_operand.<no memory space> [shape: f32[1,1], index: 9, kind: input, shape index: {}]   ;;  %s4348_s10 = inlined_call_operand.vmem [shape: f32[160,160], index: 10, kind: input, shape index: {}]   ;;  %s4349_s11 = inlined_call_operand.vmem [shape: f32[1,160], index: 11, kind: input, shape index: {}]   ;;  %s4350_s12 = inlined_call_operand.vmem [shape: f32[5,80,128], index: 12, kind: input, shape index: {}]   ;;  %s4351_s13 = inlined_call_operand.vmem [shape: f32[5,160,128], index: 13, kind: input, shape index: {}]   ;;  %s4352_s14 = inlined_call_operand.vmem [shape: f32[1,128], index: 14, kind: input, shape index: {}]   ;;  %s4353_s15 = inlined_call_operand.vmem [shape: f32[128,128], index: 15, kind: input, shape index: {}]   ;;  %s4354_s16 = inlined_call_operand.vmem [shape: f32[1,128], index: 16, kind: input, shape index: {}]   ;;  %s4355_s17 = inlined_call_operand.hbm [shape: f32[2,128], index: 17, kind: output, shape index: {}]  }
   0x1   :  { %4362 = sst [smem:[#allocation10_spill]] %s4338_s0  ;;  %v22_v0 = vstv %s4347_s9 }
   0x2   :  { %4363 = sst [smem:[#allocation11_spill]] %s4339_s1  ;;  %23 = vst [vmem:[#allocation6] sm:$0x1] %v22_v0 }
   0x3   :  { %s4364_s28 = sld [smem:[#allocation11_spill]]  ;;  %vm144_vm0 = vcmask 719872   ;;  %v260_v56 = vld [vmem:[%s4341_s3 + $0x78] sm:$0xff]  ;;  %v259_v59 = vld [vmem:[%s4341_s3 + $0x70] sm:$0xff] }
   0x4   :  { %s4365_s24 = sld [smem:[#allocation10_spill]] }
   0x9   :  { %v94_v1 = vld [vmem:[%s4364_s28 + $0xf0] sm:$0xff]  ;;  %v92_v2 = vld [vmem:[%s4364_s28 + $0xe0] sm:$0xff]  ;;  %v95_v4 = vld [vmem:[%s4364_s28 + $0xf8] sm:$0xff] }
   0xa   :  { %149 = vmatpush.msra.mxu0 %v94_v1  ;;  %v90_v3 = vld [vmem:[%s4364_s28 + $0xd0] sm:$0xff]  ;;  %v116_v5 = vld [vmem:[%s4364_s28 + $0x1a0] sm:$0xff]  ;;  %195 = vmatpush.msra.mxu2 %v95_v4  ;;  %v93_v6 = vld [vmem:[%s4364_s28 + $0xe8] sm:$0xff] }
   0xb   :  { %v114_v7 = vld [vmem:[%s4364_s28 + $0x190] sm:$0xff]  ;;  %v88_v8 = vld [vmem:[%s4364_s28 + $0xc0] sm:$0xff]  ;;  %177 = vmatpush.msra.mxu1 %v116_v5  ;;  %v91_v9 = vld [vmem:[%s4364_s28 + $0xd8] sm:$0xff] }
   0xc   :  { %150 = vmatpush.msra.mxu0 %v92_v2  ;;  %196 = vmatpush.msra.mxu2 %v93_v6  ;;  %v112_v10 = vld [vmem:[%s4364_s28 + $0x180] sm:$0xff]  ;;  %v86_v11 = vld [vmem:[%s4364_s28 + $0xb0] sm:$0xff]  ;;  %v89_v12 = vld [vmem:[%s4364_s28 + $0xc8] sm:$0xff] }
   0xd   :  { %178 = vmatpush.msra.mxu1 %v114_v7  ;;  %v110_v13 = vld [vmem:[%s4364_s28 + $0x170] sm:$0xff]  ;;  %v84_v14 = vld [vmem:[%s4364_s28 + $0xa0] sm:$0xff]  ;;  %v87_v15 = vld [vmem:[%s4364_s28 + $0xb8] sm:$0xff] }
   0xe   :  { %151 = vmatpush.msra.mxu0 %v90_v3  ;;  %197 = vmatpush.msra.mxu2 %v91_v9  ;;  %v117_v16 = vld [vmem:[%s4364_s28 + $0x1a8] sm:$0xff]  ;;  %v108_v17 = vld [vmem:[%s4364_s28 + $0x160] sm:$0xff]  ;;  %v115_v18 = vld [vmem:[%s4364_s28 + $0x198] sm:$0xff] }
   0xf   :  { %179 = vmatpush.msra.mxu1 %v112_v10  ;;  %v82_v19 = vld [vmem:[%s4364_s28 + $0x90] sm:$0xff]  ;;  %v85_v20 = vld [vmem:[%s4364_s28 + $0xa8] sm:$0xff]  ;;  %223 = vmatpush.msra.mxu3 %v117_v16  ;;  %v80_v23 = vld [vmem:[%s4364_s28 + $0x80] sm:$0xff] }
  0x10   :  { %152 = vmatpush.msra.mxu0 %v88_v8  ;;  %198 = vmatpush.msra.mxu2 %v89_v12  ;;  %v106_v21 = vld [vmem:[%s4364_s28 + $0x150] sm:$0xff]  ;;  %v113_v22 = vld [vmem:[%s4364_s28 + $0x188] sm:$0xff]  ;;  %v83_v25 = vld [vmem:[%s4364_s28 + $0x98] sm:$0xff] }
  0x11   :  { %180 = vmatpush.msra.mxu1 %v110_v13  ;;  %v78_v24 = vld [vmem:[%s4364_s28 + $0x70] sm:$0xff]  ;;  %224 = vmatpush.msra.mxu3 %v115_v18  ;;  %v104_v26 = vld [vmem:[%s4364_s28 + $0x140] sm:$0xff]  ;;  %v81_v27 = vld [vmem:[%s4364_s28 + $0x88] sm:$0xff] }
  0x12   :  { %153 = vmatpush.msra.mxu0 %v86_v11  ;;  %199 = vmatpush.msra.mxu2 %v87_v15  ;;  %v111_v28 = vld [vmem:[%s4364_s28 + $0x178] sm:$0xff]  ;;  %v59_v29 = vld [vmem:[%s4365_s24] sm:$0xf]  ;;  %v60_v30 = vld [vmem:[%s4365_s24 + $0x4] sm:$0xf] }
  0x13   :  { %181 = vmatpush.msra.mxu1 %v108_v17  ;;  %225 = vmatpush.msra.mxu3 %v113_v22  ;;  %v61_v31 = vld [vmem:[%s4365_s24 + $0x8] sm:$0xf]  ;;  %v102_v32 = vld [vmem:[%s4364_s28 + $0x130] sm:$0xff]  ;;  %v62_v34 = vld [vmem:[%s4365_s24 + $0xc] sm:$0xf] }
  0x14   :  { %154 = vmatpush.msra.mxu0 %v84_v14  ;;  %200 = vmatpush.msra.mxu2 %v85_v20  ;;  %v109_v33 = vld [vmem:[%s4364_s28 + $0x168] sm:$0xff]  ;;  %129 = vst [vmem:[#allocation1] ss:$4 sm:$0xff] %v59_v29  ;;  %v76_v35 = vld [vmem:[%s4364_s28 + $0x60] sm:$0xff]  ;;  %v79_v36 = vld [vmem:[%s4364_s28 + $0x78] sm:$0xff] }
  0x15   :  { %182 = vmatpush.msra.mxu1 %v106_v21  ;;  %226 = vmatpush.msra.mxu3 %v111_v28  ;;  %131 = vst [vmem:[#allocation1 + $0x1] ss:$4 sm:$0xff] %v60_v30  ;;  %v100_v37 = vld [vmem:[%s4364_s28 + $0x120] sm:$0xff]  ;;  %v107_v38 = vld [vmem:[%s4364_s28 + $0x158] sm:$0xff]  ;;  %v74_v39 = vld [vmem:[%s4364_s28 + $0x50] sm:$0xff] }
  0x16   :  { %155 = vmatpush.msra.mxu0 %v82_v19  ;;  %201 = vmatpush.msra.mxu2 %v83_v25  ;;  %133 = vst [vmem:[#allocation1 + $0x2] ss:$4 sm:$0xff] %v61_v31  ;;  %v77_v40 = vld [vmem:[%s4364_s28 + $0x68] sm:$0xff]  ;;  %v63_v41 = vld [vmem:[%s4365_s24 + $0x10] sm:$0xf]  ;;  %v72_v44 = vld [vmem:[%s4364_s28 + $0x40] sm:$0xff] }
  0x17   :  { %183 = vmatpush.msra.mxu1 %v104_v26  ;;  %227 = vmatpush.msra.mxu3 %v109_v33  ;;  %135 = vst [vmem:[#allocation1 + $0x3] ss:$4 sm:$0xff] %v62_v34  ;;  %v98_v42 = vld [vmem:[%s4364_s28 + $0x110] sm:$0xff]  ;;  %v105_v43 = vld [vmem:[%s4364_s28 + $0x148] sm:$0xff]  ;;  %v75_v45 = vld [vmem:[%s4364_s28 + $0x58] sm:$0xff] }
  0x18   :  { %156 = vmatpush.msra.mxu0 %v80_v23  ;;  %202 = vmatpush.msra.mxu2 %v81_v27  ;;  %137 = vst [vmem:[#allocation1 + $0x20] ss:$4 sm:$0xff] %v63_v41  ;;  %v96_v46 = vld [vmem:[%s4364_s28 + $0x100] sm:$0xff]  ;;  %v103_v47 = vld [vmem:[%s4364_s28 + $0x138] sm:$0xff]  ;;  %v70_v48 = vld [vmem:[%s4364_s28 + $0x30] sm:$0xff] }
  0x19   :  { %184 = vmatpush.msra.mxu1 %v102_v32  ;;  %228 = vmatpush.msra.mxu3 %v107_v38  ;;  %v73_v49 = vld [vmem:[%s4364_s28 + $0x48] sm:$0xff]  ;;  %v68_v50 = vld [vmem:[%s4364_s28 + $0x20] sm:$0xff]  ;;  %v66_v52 = vld [vmem:[%s4364_s28 + $0x10] sm:$0xff] }
  0x1a   :  { %157 = vmatpush.msra.mxu0 %v78_v24  ;;  %203 = vmatpush.msra.mxu2 %v79_v36  ;;  %v101_v51 = vld [vmem:[%s4364_s28 + $0x128] sm:$0xff]  ;;  %v71_v53 = vld [vmem:[%s4364_s28 + $0x38] sm:$0xff] }
  0x1b   :  { %185 = vmatpush.msra.mxu1 %v100_v37  ;;  %229 = vmatpush.msra.mxu3 %v105_v43  ;;  %v99_v55 = vld [vmem:[%s4364_s28 + $0x118] sm:$0xff]  ;;  %v69_v57 = vld [vmem:[%s4364_s28 + $0x28] sm:$0xff] }
  0x1c   :  { %158 = vmatpush.msra.mxu0 %v76_v35  ;;  %204 = vmatpush.msra.mxu2 %v77_v40  ;;  %v97_v58 = vld [vmem:[%s4364_s28 + $0x108] sm:$0xff] }
  0x1d   :  { %186 = vmatpush.msra.mxu1 %v98_v42  ;;  %230 = vmatpush.msra.mxu3 %v103_v47 }
  0x1e   :  { %159 = vmatpush.msra.mxu0 %v74_v39  ;;  %205 = vmatpush.msra.mxu2 %v75_v45  ;;  %v139_v54 = vld.sshfl [vmem:[#allocation1 + $0x8] sm:$0xff pattern:$0x73625140] }
  0x1f   :  { %187 = vmatpush.msra.mxu1 %v96_v46  ;;  %231 = vmatpush.msra.mxu3 %v101_v51 }
  0x20   :  { %160 = vmatpush.msra.mxu0 %v72_v44  ;;  %206 = vmatpush.msra.mxu2 %v73_v49 }
  0x21   :  { %2438 = vmatmul.msk.f32.vlgmr.msra.gmra.mxu1 %vm144_vm0, %v139_v54 }
  0x22   :  { %161 = vmatpush.msra.mxu0 %v70_v48  ;;  %207 = vmatpush.msra.mxu2 %v71_v53 }
  0x24   :  { %162 = vmatpush.msra.mxu0 %v68_v50 }
  0x25   :  { %24 = vsyncpa [#allocation8], 0  ;;  %v64_v60 = vld [vmem:[%s4364_s28] sm:$0xff]  ;;  %v67_v61 = vld [vmem:[%s4364_s28 + $0x18] sm:$0xff]  ;;  %232 = vmatpush.msra.mxu3 %v99_v55  ;;  %280 = vmatpush.msrb.mxu1 %v260_v56  ;;  %vm273_vm1 = vcmask 523264   ;;  %vm361_vm2 = vcmask 654336  }
  0x26   :  { %163 = vmatpush.msra.mxu0 %v66_v52  ;;  %v138_v62 = vld.sshfl [vmem:[#allocation1] sm:$0xff pattern:$0x73625140]  ;;  %208 = vmatpush.msra.mxu2 %v69_v57  ;;  %v65_v63 = vld [vmem:[%s4364_s28 + $0x8] sm:$0xff]  ;;  %v256_v3 = vld [vmem:[%s4341_s3 + $0x58] sm:$0xff]  ;;  %vm335_vm3 = vcmask 648192  }
  0x27   :  { %233 = vmatpush.msra.mxu3 %v97_v58  ;;  %281 = vmatpush.msrb.mxu1 %v259_v59  ;;  %v258_v0 = vld [vmem:[%s4341_s3 + $0x68] sm:$0xff]  ;;  %v257_v2 = vld [vmem:[%s4341_s3 + $0x60] sm:$0xff]  ;;  %v255_v4 = vld [vmem:[%s4341_s3 + $0x50] sm:$0xff]  ;;  %vm419_vm4 = vcmask 1041408   ;;  %vm436_vm5 = vcmask 257026   ;;  %vm421_vm6 = vcmask 1043458  }
  0x28   :  { %164 = vmatpush.msra.mxu0 %v64_v60  ;;  %209 = vmatpush.msra.mxu2 %v67_v61  ;;  %v141_v1 = vld.sshfl [vmem:[#allocation1 + $0x28] sm:$0xff pattern:$0x73625140]  ;;  %v140_v5 = vld.sshfl [vmem:[#allocation1 + $0x20] sm:$0xff pattern:$0x73625140]  ;;  %vm3193_vm9 = vmor %vm436_vm5, %vm419_vm4 }
  0x29   :  { %165 = vmatmul.f32.vlgmr.msra.gmra.mxu0 %v138_v62  ;;  %2440 = vmatmul.msk.f32.vlgmr.msra.gmra.mxu3 %vm144_vm0, %v139_v54  ;;  %v254_v6 = vld [vmem:[%s4341_s3 + $0x48] sm:$0xff]  ;;  %v253_v7 = vld [vmem:[%s4341_s3 + $0x40] sm:$0xff]  ;;  %v252_v8 = vld [vmem:[%s4341_s3 + $0x38] sm:$0xff]  ;;  %vm424_vm7 = vcmask 1045508   ;;  %vm427_vm8 = vcmask 1045504   ;;  %vm567_vm10 = vcmask 254976  }
  0x2a   :  { %210 = vmatpush.msra.mxu2 %v65_v63  ;;  %282 = vmatpush.msrb.mxu1 %v258_v0  ;;  %v251_v9 = vld [vmem:[%s4341_s3 + $0x30] sm:$0xff]  ;;  %v250_v10 = vld [vmem:[%s4341_s3 + $0x28] sm:$0xff]  ;;  %v249_v11 = vld [vmem:[%s4341_s3 + $0x20] sm:$0xff]  ;;  %s2706_s9 = smov [#allocation7]   ;;  %s2429_s22 = sshll.u32 %s4355_s17, 4  ;;  %s2430_s22 = int_to_ptr.hbm [resolvable:$true] %s2429_s22 }
  0x2b   :  { %2439 = vmatmul.msk.f32.gmra.mxu1 %vm144_vm0, %v141_v1  ;;  %211 = vmatmul.f32.vlgmr.msra.gmra.mxu2 %v138_v62  ;;  %v248_v12 = vld [vmem:[%s4341_s3 + $0x18] sm:$0xff]  ;;  %v247_v13 = vld [vmem:[%s4341_s3 + $0x10] sm:$0xff]  ;;  %v246_v14 = vld [vmem:[%s4341_s3 + $0x8] sm:$0xff] }
  0x2c   :  { %283 = vmatpush.msrb.mxu1 %v257_v2  ;;  %v245_v15 = vld [vmem:[%s4341_s3] sm:$0xff]  ;;  %v268_v16 = vld [vmem:[%s4341_s3 + $0xb8] sm:$0xff]  ;;  %v267_v17 = vld [vmem:[%s4341_s3 + $0xb0] sm:$0xff] }
  0x2d   :  { %v266_v18 = vld [vmem:[%s4341_s3 + $0xa8] sm:$0xff]  ;;  %v265_v19 = vld [vmem:[%s4341_s3 + $0xa0] sm:$0xff]  ;;  %v264_v20 = vld [vmem:[%s4341_s3 + $0x98] sm:$0xff] }
  0x2e   :  { %284 = vmatpush.msrb.mxu1 %v256_v3  ;;  %v263_v21 = vld [vmem:[%s4341_s3 + $0x90] sm:$0xff]  ;;  %v262_v22 = vld [vmem:[%s4341_s3 + $0x88] sm:$0xff]  ;;  %v261_v23 = vld [vmem:[%s4341_s3 + $0x80] sm:$0xff] }
  0x2f   :  { %v118_v24 = vld [vmem:[%s4340_s2] sm:$0x3]  ;;  %v359_v27 = vld [vmem:[%s4343_s5 + $0x90] sm:$0xff]  ;;  %v360_v49 = vld [vmem:[%s4343_s5 + $0x98] sm:$0xff] }
  0x30   :  { %285 = vmatpush.msrb.mxu1 %v255_v4  ;;  %v120_v25 = vperm.slane %v118_v24, 0  ;;  %373 = vmatpush.msrb.mxu0 %v359_v27  ;;  %v121_v33 = vperm.slane %v118_v24, 1  ;;  %v357_v48 = vld [vmem:[%s4343_s5 + $0x80] sm:$0xff]  ;;  %v461_v50 = vld [vmem:[%s4344_s6 + $0x90] sm:$0xff]  ;;  %v358_v52 = vld [vmem:[%s4343_s5 + $0x88] sm:$0xff] }
  0x31   :  { %168 = vmatmul.f32.gmra.mxu0 %v140_v5  ;;  %2441 = vmatmul.msk.f32.gmra.mxu3 %vm144_vm0, %v141_v1  ;;  %v355_v51 = vld [vmem:[%s4343_s5 + $0x70] sm:$0xff]  ;;  %v459_v53 = vld [vmem:[%s4344_s6 + $0x80] sm:$0xff]  ;;  %v356_v55 = vld [vmem:[%s4343_s5 + $0x78] sm:$0xff] }
  0x32   :  { %286 = vmatpush.msrb.mxu1 %v254_v6  ;;  %374 = vmatpush.msrb.mxu0 %v357_v48  ;;  %v353_v54 = vld [vmem:[%s4343_s5 + $0x60] sm:$0xff]  ;;  %v457_v56 = vld [vmem:[%s4344_s6 + $0x70] sm:$0xff]  ;;  %v354_v58 = vld [vmem:[%s4343_s5 + $0x68] sm:$0xff] }
  0x33   :  { %214 = vmatmul.f32.gmra.mxu2 %v140_v5  ;;  %469 = vmatpush.msrb.mxu3 %v461_v50  ;;  %v351_v57 = vld [vmem:[%s4343_s5 + $0x50] sm:$0xff]  ;;  %v455_v59 = vld [vmem:[%s4344_s6 + $0x60] sm:$0xff]  ;;  %v352_v61 = vld [vmem:[%s4343_s5 + $0x58] sm:$0xff] }
  0x34   :  { %287 = vmatpush.msrb.mxu1 %v253_v7  ;;  %396 = vmatpush.msrb.mxu2 %v360_v49  ;;  %v349_v60 = vld [vmem:[%s4343_s5 + $0x40] sm:$0xff]  ;;  %v453_v62 = vld [vmem:[%s4344_s6 + $0x50] sm:$0xff]  ;;  %v350_v0 = vld [vmem:[%s4343_s5 + $0x48] sm:$0xff] }
  0x35   :  { %375 = vmatpush.msrb.mxu0 %v355_v51  ;;  %470 = vmatpush.msrb.mxu3 %v459_v53  ;;  %v347_v63 = vld [vmem:[%s4343_s5 + $0x30] sm:$0xff]  ;;  %v451_v1 = vld [vmem:[%s4344_s6 + $0x40] sm:$0xff]  ;;  %v348_v3 = vld [vmem:[%s4343_s5 + $0x38] sm:$0xff] }
  0x36   :  { %288 = vmatpush.msrb.mxu1 %v252_v8  ;;  %397 = vmatpush.msrb.mxu2 %v358_v52  ;;  %v345_v2 = vld [vmem:[%s4343_s5 + $0x20] sm:$0xff]  ;;  %v449_v4 = vld [vmem:[%s4344_s6 + $0x30] sm:$0xff]  ;;  %v346_v6 = vld [vmem:[%s4343_s5 + $0x28] sm:$0xff] }
  0x37   :  { %376 = vmatpush.msrb.mxu0 %v353_v54  ;;  %471 = vmatpush.msrb.mxu3 %v457_v56  ;;  %v343_v5 = vld [vmem:[%s4343_s5 + $0x10] sm:$0xff]  ;;  %v447_v7 = vld [vmem:[%s4344_s6 + $0x20] sm:$0xff] }
  0x38   :  { %289 = vmatpush.msrb.mxu1 %v251_v9  ;;  %398 = vmatpush.msrb.mxu2 %v356_v55  ;;  %v341_v8 = vld [vmem:[%s4343_s5] sm:$0xff]  ;;  %v344_v9 = vld [vmem:[%s4343_s5 + $0x18] sm:$0xff] }
  0x39   :  { %377 = vmatpush.msrb.mxu0 %v351_v57  ;;  %472 = vmatpush.msrb.mxu3 %v455_v59  ;;  %v538_v55 = vld [vmem:[%s4345_s7] sm:$0x3]  ;;  %s2427_s7 = sshll.u32 %s2706_s9, 4  ;;  %s2428_s7 = int_to_ptr.vmem [resolvable:$true] %s2427_s7 }
  0x3a   :  { %290 = vmatpush.msrb.mxu1 %v250_v10  ;;  %399 = vmatpush.msrb.mxu2 %v354_v58  ;;  %v445_v10 = vld [vmem:[%s4344_s6 + $0x10] sm:$0xff] }
  0x3b   :  { %378 = vmatpush.msrb.mxu0 %v349_v60  ;;  %473 = vmatpush.msrb.mxu3 %v453_v62  ;;  %v539_v60 = vld [vmem:[%s4346_s8] sm:$0x3] }
  0x3c   :  { %291 = vmatpush.msrb.mxu1 %v249_v11  ;;  %400 = vmatpush.msrb.mxu2 %v352_v61  ;;  %v462_v11 = vld [vmem:[%s4344_s6 + $0x98] sm:$0xff]  ;;  %v547_v61 = vperm.slane %v538_v55, 1 }
  0x3d   :  { %379 = vmatpush.msrb.mxu0 %v347_v63  ;;  %474 = vmatpush.msrb.mxu3 %v451_v1  ;;  %v555_v1 = vperm.slane %v539_v60, 1 }
  0x3e   :  { %292 = vmatpush.msrb.mxu1 %v248_v12  ;;  %401 = vmatpush.msrb.mxu2 %v350_v0  ;;  %v342_v12 = vld [vmem:[%s4343_s5 + $0x8] sm:$0xff] }
  0x3f   :  { %380 = vmatpush.msrb.mxu0 %v345_v2  ;;  %475 = vmatpush.msrb.mxu3 %v449_v4  ;;  %v548_v4 = vrot.slane %v547_v61, 6 }
  0x40   :  { %293 = vmatpush.msrb.mxu1 %v247_v13  ;;  %402 = vmatpush.msrb.mxu2 %v348_v3  ;;  %v443_v13 = vld [vmem:[%s4344_s6] sm:$0xff]  ;;  %v546_v3 = vperm.slane %v538_v55, 0 }
  0x41   :  { %381 = vmatpush.msrb.mxu0 %v343_v5  ;;  %476 = vmatpush.msrb.mxu3 %v447_v7  ;;  %v554_v7 = vperm.slane %v539_v60, 0 }
  0x42   :  { %294 = vmatpush.msrb.mxu1 %v246_v14  ;;  %403 = vmatpush.msrb.mxu2 %v346_v6  ;;  %v460_v14 = vld [vmem:[%s4344_s6 + $0x88] sm:$0xff] }
  0x43   :  { %382 = vmatpush.msrb.mxu0 %v341_v8  ;;  %477 = vmatpush.msrb.mxu3 %v445_v10  ;;  %v556_v8 = vrot.slane %v555_v1, 6 }
  0x44   :  { %295 = vmatpush.msrb.mxu1 %v245_v15  ;;  %404 = vmatpush.msrb.mxu2 %v344_v9  ;;  %v458_v15 = vld [vmem:[%s4344_s6 + $0x78] sm:$0xff] }
  0x45   :  { %492 = vmatpush.msra.mxu0 %v462_v11  ;;  %478 = vmatpush.msrb.mxu3 %v443_v13 }
  0x46   :  { %311 = vmatpush.msra.mxu1 %v268_v16  ;;  %405 = vmatpush.msrb.mxu2 %v342_v12  ;;  %v456_v16 = vld [vmem:[%s4344_s6 + $0x68] sm:$0xff]  ;;  %v3232_v12 = vsel %vm419_vm4, %v546_v3, %v548_v4 }
  0x47   :  { %493 = vmatpush.msra.mxu0 %v460_v14 }
  0x48   :  { %312 = vmatpush.msra.mxu1 %v267_v17  ;;  %v454_v17 = vld [vmem:[%s4344_s6 + $0x58] sm:$0xff] }
  0x49   :  { %494 = vmatpush.msra.mxu0 %v458_v15 }
  0x4a   :  { %313 = vmatpush.msra.mxu1 %v266_v18  ;;  %v452_v18 = vld [vmem:[%s4344_s6 + $0x48] sm:$0xff] }
  0x4b   :  { %495 = vmatpush.msra.mxu0 %v456_v16 }
  0x4c   :  { %314 = vmatpush.msra.mxu1 %v265_v19  ;;  %v450_v19 = vld [vmem:[%s4344_s6 + $0x38] sm:$0xff] }
  0x4d   :  { %496 = vmatpush.msra.mxu0 %v454_v17 }
  0x4e   :  { %315 = vmatpush.msra.mxu1 %v264_v20  ;;  %v448_v20 = vld [vmem:[%s4344_s6 + $0x28] sm:$0xff] }
  0x4f   :  { %497 = vmatpush.msra.mxu0 %v452_v18  ;;  %v3240_v18 = vsel %vm419_vm4, %v554_v7, %v556_v8 }
  0x50   :  { %316 = vmatpush.msra.mxu1 %v263_v21 }
  0x51   :  { %498 = vmatpush.msra.mxu0 %v450_v19 }
  0x52   :  { %317 = vmatpush.msra.mxu1 %v262_v22  ;;  %v446_v22 = vld [vmem:[%s4344_s6 + $0x18] sm:$0xff] }
  0x53   :  { %499 = vmatpush.msra.mxu0 %v448_v20 }
  0x54   :  { %318 = vmatpush.msra.mxu1 %v261_v23  ;;  %v444_v23 = vld [vmem:[%s4344_s6 + $0x8] sm:$0xff] }
  0x55   :  { %500 = vmatpush.msra.mxu0 %v446_v22 }
  0x57   :  { %501 = vmatpush.msra.mxu0 %v444_v23 }
  0x9e   :  { %v189_v26 = vpop.f32.mrf.mxu1 }
  0xa6   :  { %v166_v28 = vpop.f32.mrf.mxu0 }
  0xa7   :  { %v167_v29 = vadd.f32 %v166_v28, %v120_v25 }
  0xa8   :  { %v192_v32 = vpop.f32.mrf.mxu1 }
  0xa9   :  { %v190_v30 = vadd.f32 %v189_v26, %v167_v29 }
  0xab   :  { %v241_v31 = vmax.f32 %v190_v30, 0.0 }
  0xac   :  { %v235_v37 = vpop.f32.mrf.mxu3 }
  0xad   :  { %296 = vmatmul.f32.vlgmr.msrb.gmra.mxu1 %v241_v31 }
  0xae   :  { %v169_v34 = vpop.f32.mrf.mxu0  ;;  %v212_v35 = vpop.f32.mrf.mxu2 }
  0xaf   :  { %v170_v36 = vadd.f32 %v169_v34, %v120_v25  ;;  %v213_v39 = vadd.f32 %v212_v35, %v121_v33  ;;  %v2593_v25 = vld [vmem:[%s4342_s4] ss:$0 sm:$0xff] }
  0xb1   :  { %v193_v38 = vadd.f32 %v192_v32, %v170_v36  ;;  %v236_v41 = vadd.f32 %v235_v37, %v213_v39 }
  0xb3   :  { %v243_v40 = vmax.f32 %v193_v38, 0.0  ;;  %v242_v43 = vmax.f32 %v236_v41, 0.0 }
  0xb4   :  { %v238_v45 = vpop.f32.mrf.mxu3 }
  0xb5   :  { %299 = vmatmul.f32.gmra.mxu1 %v243_v40  ;;  %v2520_v40 = vld [vmem:[%s4351_s13 + $0x1d8] sm:$0xff] }
  0xb6   :  { %v215_v42 = vpop.f32.mrf.mxu2 }
  0xb7   :  { %v216_v44 = vadd.f32 %v215_v42, %v121_v33 }
  0xb9   :  { %v239_v46 = vadd.f32 %v238_v45, %v216_v44 }
  0xbb   :  { %v244_v47 = vmax.f32 %v239_v46, 0.0 }
  0xbd   :  { %2442 = vmatmul.msk.f32.vlgmr.msra.gmra.mxu1 %vm273_vm1, %v242_v43 }
  0xc5   :  { %2443 = vmatmul.msk.f32.gmra.mxu1 %vm273_vm1, %v244_v47 }
 0x12a   :  { %v297_v21 = vpop.f32.mrf.mxu1 }
 0x12b   :  { %v298_v26 = vadd.f32 %v2593_v25, %v297_v21 }
 0x132   :  { %v300_v24 = vpop.f32.mrf.mxu1 }
 0x133   :  { %v301_v33 = vadd.f32 %v2593_v25, %v300_v24 }
 0x13a   :  { %v320_v27 = vpop.f32.mrf.mxu1 }
 0x13b   :  { %v321_v28 = vadd.f32 %v320_v27, %v298_v26 }
 0x13d   :  { %v326_v29 = vmax.f32 %v321_v28, 0.0 }
 0x13f   :  { %2444 = vmatmul.msk.f32.vlgmr.msrb.gmra.mxu0 %vm361_vm2, %v326_v29  ;;  %2446 = vmatmul.msk.f32.vlgmr.msrb.gmra.mxu2 %vm361_vm2, %v326_v29  ;;  %v329_v30 = vrot.slane %v326_v29, 2  ;;  %v330_v31 = vrot.slane %v326_v29, 4  ;;  %v331_v32 = vrot.slane %v326_v29, 6  ;;  %336 = vst.msk [vmem:[#allocation2] sm:$0x3] %vm335_vm3, %v326_v29 }
 0x140   :  { %2448 = vmatmul.msk.f32.vlgmr.msrb.gmra.mxu3 %vm361_vm2, %v326_v29 }
 0x141   :  { %337 = vst.msk [vmem:[#allocation2 + $0x2] sm:$0x3] %vm335_vm3, %v329_v30 }
 0x142   :  { %v323_v34 = vpop.f32.mrf.mxu1  ;;  %338 = vst.msk [vmem:[#allocation2 + $0x4] sm:$0x3] %vm335_vm3, %v330_v31 }
 0x143   :  { %v324_v35 = vadd.f32 %v323_v34, %v301_v33  ;;  %339 = vst.msk [vmem:[#allocation2 + $0x6] sm:$0x3] %vm335_vm3, %v331_v32 }
 0x145   :  { %v327_v36 = vmax.f32 %v324_v35, 0.0 }
 0x147   :  { %340 = vst.msk [vmem:[#allocation2 + $0x8] sm:$0x3] %vm335_vm3, %v327_v36  ;;  %2445 = vmatmul.msk.f32.gmra.mxu0 %vm361_vm2, %v327_v36  ;;  %2447 = vmatmul.msk.f32.gmra.mxu2 %vm361_vm2, %v327_v36 }
 0x148   :  { %2449 = vmatmul.msk.f32.gmra.mxu3 %vm361_vm2, %v327_v36 }
 0x14f   :  { %2450 = vmatmul.msk.f32.vlgmr.msra.gmra.mxu0 %vm361_vm2, %v326_v29 }
 0x157   :  { %2451 = vmatmul.msk.f32.gmra.mxu0 %vm361_vm2, %v327_v36 }
 0x1bc   :  { %v384_v37 = vpop.f32.mrf.mxu0 }
 0x1c2   :  { %v407_v38 = vpop.f32.mrf.mxu2 }
 0x1c3   :  { %v417_v39 = vrot.slane %v407_v38, 6  ;;  %v480_v52 = vpop.f32.mrf.mxu3 }
 0x1c4   :  { %v387_v41 = vpop.f32.mrf.mxu0 }
 0x1c5   :  { %v420_v42 = vsel %vm419_vm4, %v384_v37, %v417_v39  ;;  %v422_v43 = vsel %vm421_vm6, %v384_v37, %v417_v39  ;;  %v425_v44 = vsel %vm424_vm7, %v384_v37, %v417_v39  ;;  %v428_v45 = vsel %vm427_vm8, %v417_v39, %v384_v37 }
 0x1c6   :  { %v423_v46 = vrot.slane %v422_v43, 2  ;;  %v426_v47 = vrot.slane %v425_v44, 4  ;;  %v429_v48 = vrot.slane %v428_v45, 6  ;;  %438 = vst.msk [vmem:[#allocation3] sm:$0xf] %vm3193_vm9, %v420_v42 }
 0x1c8   :  { %439 = vst.msk [vmem:[#allocation3 + $0x4] sm:$0xf] %vm3193_vm9, %v423_v46 }
 0x1c9   :  { %440 = vst.msk [vmem:[#allocation3 + $0x8] sm:$0xf] %vm3193_vm9, %v426_v47 }
 0x1ca   :  { %441 = vst.msk [vmem:[#allocation3 + $0xc] sm:$0xf] %vm3193_vm9, %v429_v48  ;;  %v410_v49 = vpop.f32.mrf.mxu2 }
 0x1cb   :  { %v418_v50 = vrot.slane %v410_v49, 6  ;;  %v483_v6 = vpop.f32.mrf.mxu3 }
 0x1cc   :  { %v503_v51 = vpop.f32.mrf.mxu0 }
 0x1cd   :  { %v430_v53 = vsel %vm419_vm4, %v387_v41, %v418_v50  ;;  %v513_v54 = vrot.slane %v503_v51, 6  ;;  %v781_v43 = vld [vmem:[#allocation3] sm:$0xf] }
 0x1ce   :  { %442 = vst.msk [vmem:[#allocation3 + $0x10] sm:$0xf] %vm3193_vm9, %v430_v53 }
 0x1cf   :  { %v515_v56 = vsel %vm419_vm4, %v480_v52, %v513_v54  ;;  %v516_v57 = vsel %vm421_vm6, %v480_v52, %v513_v54  ;;  %v518_v58 = vsel %vm424_vm7, %v480_v52, %v513_v54  ;;  %v520_v59 = vsel %vm427_vm8, %v513_v54, %v480_v52  ;;  %v542_v10 = vld [vmem:[#allocation3 + $0x4] sm:$0xf] }
 0x1d0   :  { %v517_v62 = vrot.slane %v516_v57, 2  ;;  %v519_v63 = vrot.slane %v518_v58, 4  ;;  %528 = vst.msk [vmem:[#allocation4] sm:$0xf] %vm3193_vm9, %v515_v56  ;;  %v521_v0 = vrot.slane %v520_v59, 6 }
 0x1d1   :  { %v614_v15 = vld [vmem:[#allocation3 + $0x8] sm:$0xf]  ;;  %v670_v23 = vld [vmem:[#allocation3 + $0xc] sm:$0xf] }
 0x1d2   :  { %529 = vst.msk [vmem:[#allocation4 + $0x4] sm:$0xf] %vm3193_vm9, %v517_v62  ;;  %v836_v56 = vld [vmem:[#allocation3 + $0x8] sm:$0xf]  ;;  %v890_v3 = vld [vmem:[#allocation3 + $0xc] sm:$0xf] }
 0x1d3   :  { %530 = vst.msk [vmem:[#allocation4 + $0x8] sm:$0xf] %vm3193_vm9, %v519_v63 }
 0x1d4   :  { %v506_v2 = vpop.f32.mrf.mxu0  ;;  %531 = vst.msk [vmem:[#allocation4 + $0xc] sm:$0xf] %vm3193_vm9, %v521_v0 }
 0x1d5   :  { %v514_v5 = vrot.slane %v506_v2, 6  ;;  %v726_v31 = vld [vmem:[#allocation3 + $0x10] sm:$0xf] }
 0x1d7   :  { %v522_v9 = vsel %vm419_vm4, %v483_v6, %v514_v5  ;;  %v543_v11 = vld [vmem:[#allocation4] sm:$0xf] }
 0x1d8   :  { %v615_v13 = vld [vmem:[#allocation4] sm:$0xf]  ;;  %v544_v14 = vadd.f32 %v543_v11, %v542_v10  ;;  %532 = vst.msk [vmem:[#allocation4 + $0x10] sm:$0xf] %vm3193_vm9, %v522_v9 }
 0x1d9   :  { %v616_v17 = vadd.f32 %v615_v13, %v614_v15  ;;  %v671_v22 = vld [vmem:[#allocation4] sm:$0xf]  ;;  %v783_v38 = vld [vmem:[#allocation4 + $0x4] sm:$0xf]  ;;  %v944_v15 = vld [vmem:[#allocation3 + $0x10] sm:$0xf] }
 0x1da   :  { %v3237_v16 = vadd.f32 %v3232_v12, %v544_v14  ;;  %v672_v25 = vadd.f32 %v671_v22, %v670_v23  ;;  %v727_v28 = vld [vmem:[#allocation4] sm:$0xf]  ;;  %v784_v47 = vadd.f32 %v783_v38, %v781_v43  ;;  %v837_v51 = vld [vmem:[#allocation4 + $0x4] sm:$0xf] }
 0x1db   :  { %v3247_v21 = vadd.f32 %v616_v17, %v3232_v12  ;;  %v728_v33 = vadd.f32 %v727_v28, %v726_v31  ;;  %v838_v59 = vadd.f32 %v837_v51, %v836_v56  ;;  %v891_v62 = vld [vmem:[#allocation4 + $0x4] sm:$0xf] }
 0x1dc   :  { %v552_v19 = vmax.f32 %v3237_v16, 0.0  ;;  %v3254_v27 = vadd.f32 %v672_v25, %v3232_v12  ;;  %v3272_v50 = vadd.f32 %v784_v47, %v3232_v12  ;;  %v892_v6 = vadd.f32 %v891_v62, %v890_v3  ;;  %v945_v9 = vld [vmem:[#allocation4 + $0x4] sm:$0xf]  ;;  %v1053_v47 = vld [vmem:[#allocation3 + $0x4] sm:$0xf] }
 0x1dd   :  { %v618_v24 = vmax.f32 %v3247_v21, 0.0  ;;  %v3263_v37 = vadd.f32 %v728_v33, %v3232_v12  ;;  %v3281_v61 = vadd.f32 %v838_v59, %v3232_v12  ;;  %v946_v22 = vadd.f32 %v945_v9, %v944_v15  ;;  %v998_v33 = vld [vmem:[#allocation3] sm:$0xf]  ;;  %v1162_v3 = vld [vmem:[#allocation4 + $0x8] sm:$0xf] }
 0x1de   :  { %v559_v20 = vmul.f32 %v3240_v18, %v552_v19  ;;  %v674_v32 = vmax.f32 %v3254_v27, 0.0  ;;  %v786_v58 = vmax.f32 %v3272_v50, 0.0  ;;  %v3290_v8 = vadd.f32 %v892_v6, %v3232_v12 }
 0x1df   :  { %v619_v26 = vmul.f32 %v618_v24, %v3240_v18  ;;  %v730_v46 = vmax.f32 %v3263_v37, 0.0  ;;  %v840_v5 = vmax.f32 %v3281_v61, 0.0  ;;  %v3299_v25 = vadd.f32 %v946_v22, %v3232_v12  ;;  %v1217_v22 = vld [vmem:[#allocation4 + $0xc] sm:$0xf] }
 0x1e0   :  { %561 = vst [vmem:[#allocation1] ss:$4 sm:$0xff] %v559_v20  ;;  %v675_v36 = vmul.f32 %v674_v32, %v3240_v18  ;;  %v787_v60 = vmul.f32 %v786_v58, %v3240_v18  ;;  %v894_v20 = vmax.f32 %v3290_v8, 0.0 }
 0x1e1   :  { %v731_v49 = vmul.f32 %v730_v46, %v3240_v18  ;;  %v841_v7 = vmul.f32 %v840_v5, %v3240_v18 }
 0x1e2   :  { %v895_v23 = vmul.f32 %v894_v20, %v3240_v18 }
 0x1e7   :  { %v562_v29 = vld.sshfl [vmem:[#allocation1] sm:$0xff pattern:$0x73625140]  ;;  %v563_v30 = vld.sshfl [vmem:[#allocation1 + $0x8] sm:$0xff pattern:$0x73625140] }
 0x1e8   :  { %621 = vst [vmem:[#allocation1] ss:$4 sm:$0xff] %v619_v26  ;;  %v566_v34 = vsel %vm419_vm4, %v562_v29, 0.0  ;;  %v568_v35 = vsel %vm567_vm10, %v563_v30, 0.0  ;;  %v1000_v26 = vld [vmem:[#allocation4 + $0x8] sm:$0xf] }
 0x1e9   :  { %v569_v39 = vadd.f32 %v568_v35, %v566_v34  ;;  %v948_v35 = vmax.f32 %v3299_v25, 0.0 }
 0x1eb   :  { %570 = vadd.xlane.f32.xlu0 %v569_v39  ;;  %v949_v38 = vmul.f32 %v948_v35, %v3240_v18 }
 0x1ef   :  { %v622_v41 = vld.sshfl [vmem:[#allocation1] sm:$0xff pattern:$0x73625140]  ;;  %v623_v42 = vld.sshfl [vmem:[#allocation1 + $0x8] sm:$0xff pattern:$0x73625140] }
 0x1f0   :  { %677 = vst [vmem:[#allocation1] ss:$4 sm:$0xff] %v675_v36  ;;  %v626_v44 = vsel %vm419_vm4, %v622_v41, 0.0  ;;  %v627_v45 = vsel %vm567_vm10, %v623_v42, 0.0  ;;  %v1001_v36 = vadd.f32 %v1000_v26, %v998_v33  ;;  %v1054_v41 = vld [vmem:[#allocation4 + $0x8] sm:$0xf] }
 0x1f1   :  { %v628_v48 = vadd.f32 %v627_v45, %v626_v44  ;;  %v1055_v51 = vadd.f32 %v1054_v41, %v1053_v47  ;;  %v1271_v41 = vld [vmem:[#allocation4 + $0xc] sm:$0xf]  ;;  %v1270_v47 = vld [vmem:[#allocation3 + $0x4] sm:$0xf] }
 0x1f2   :  { %v3308_v39 = vadd.f32 %v1001_v36, %v3232_v12 }
 0x1f3   :  { %629 = vadd.xlane.f32.xlu0 %v628_v48 }
 0x1f7   :  { %v678_v52 = vld.sshfl [vmem:[#allocation1] sm:$0xff pattern:$0x73625140]  ;;  %v679_v53 = vld.sshfl [vmem:[#allocation1 + $0x8] sm:$0xff pattern:$0x73625140] }
 0x1f8   :  { %733 = vst [vmem:[#allocation1] ss:$4 sm:$0xff] %v731_v49  ;;  %v682_v54 = vsel %vm419_vm4, %v678_v52, 0.0  ;;  %v683_v55 = vsel %vm567_vm10, %v679_v53, 0.0  ;;  %v1003_v49 = vmax.f32 %v3308_v39, 0.0  ;;  %v3317_v53 = vadd.f32 %v1055_v51, %v3232_v12 }
 0x1f9   :  { %v684_v57 = vadd.f32 %v683_v55, %v682_v54  ;;  %v1108_v54 = vld [vmem:[#allocation4 + $0x8] sm:$0xf] }
 0x1fa   :  { %v1004_v52 = vmul.f32 %v1003_v49, %v3240_v18 }
 0x1fb   :  { %685 = vadd.xlane.f32.xlu1 %v684_v57 }
 0x1ff   :  { %v734_v63 = vld.sshfl [vmem:[#allocation1] sm:$0xff pattern:$0x73625140]  ;;  %v735_v0 = vld.sshfl [vmem:[#allocation1 + $0x8] sm:$0xff pattern:$0x73625140] }
 0x200   :  { %789 = vst [vmem:[#allocation1] ss:$4 sm:$0xff] %v787_v60  ;;  %v738_v1 = vsel %vm419_vm4, %v734_v63, 0.0  ;;  %v739_v2 = vsel %vm567_vm10, %v735_v0, 0.0  ;;  %v1107_v60 = vld [vmem:[#allocation3 + $0xc] sm:$0xf] }
 0x201   :  { %v740_v4 = vadd.f32 %v739_v2, %v738_v1  ;;  %v1057_v63 = vmax.f32 %v3317_v53, 0.0  ;;  %v1109_v0 = vadd.f32 %v1108_v54, %v1107_v60 }
 0x203   :  { %741 = vadd.xlane.f32.xlu1 %v740_v4  ;;  %v1058_v1 = vmul.f32 %v1057_v63, %v3240_v18  ;;  %v3326_v2 = vadd.f32 %v1109_v0, %v3232_v12  ;;  %v1324_v0 = vld [vmem:[#allocation3 + $0x8] sm:$0xf] }
 0x207   :  { %v790_v10 = vld.sshfl [vmem:[#allocation1] sm:$0xff pattern:$0x73625140]  ;;  %v791_v11 = vld.sshfl [vmem:[#allocation1 + $0x8] sm:$0xff pattern:$0x73625140] }
 0x208   :  { %843 = vst [vmem:[#allocation1] ss:$4 sm:$0xff] %v841_v7  ;;  %v794_v13 = vsel %vm419_vm4, %v790_v10, 0.0  ;;  %v795_v14 = vsel %vm567_vm10, %v791_v11, 0.0  ;;  %v1161_v10 = vld [vmem:[#allocation3 + $0x10] sm:$0xf] }
 0x209   :  { %v796_v17 = vadd.f32 %v795_v14, %v794_v13  ;;  %v1111_v13 = vmax.f32 %v3326_v2, 0.0  ;;  %v1163_v14 = vadd.f32 %v1162_v3, %v1161_v10 }
 0x20b   :  { %797 = vadd.xlane.f32.xlu2 %v796_v17  ;;  %v1112_v15 = vmul.f32 %v1111_v13, %v3240_v18  ;;  %v3335_v17 = vadd.f32 %v1163_v14, %v3232_v12 }
 0x20d   :  { %v1165_v33 = vmax.f32 %v3335_v17, 0.0 }
 0x20f   :  { %v844_v28 = vld.sshfl [vmem:[#allocation1] sm:$0xff pattern:$0x73625140]  ;;  %v845_v29 = vld.sshfl [vmem:[#allocation1 + $0x8] sm:$0xff pattern:$0x73625140]  ;;  %v1166_v36 = vmul.f32 %v1165_v33, %v3240_v18 }
 0x210   :  { %v848_v30 = vsel %vm419_vm4, %v844_v28, 0.0  ;;  %v849_v31 = vsel %vm567_vm10, %v845_v29, 0.0  ;;  %897 = vst [vmem:[#allocation1] ss:$4 sm:$0xff] %v895_v23 }
 0x211   :  { %v850_v34 = vadd.f32 %v849_v31, %v848_v30  ;;  %v1215_v30 = vld [vmem:[#allocation3] sm:$0xf] }
 0x213   :  { %851 = vadd.xlane.f32.xlu2 %v850_v34  ;;  %v1218_v34 = vadd.f32 %v1217_v22, %v1215_v30  ;;  %v1378_v22 = vld [vmem:[#allocation3 + $0x10] sm:$0xf] }
 0x217   :  { %v898_v42 = vld.sshfl [vmem:[#allocation1] sm:$0xff pattern:$0x73625140]  ;;  %v899_v43 = vld.sshfl [vmem:[#allocation1 + $0x8] sm:$0xff pattern:$0x73625140] }
 0x218   :  { %v902_v44 = vsel %vm419_vm4, %v898_v42, 0.0  ;;  %v903_v45 = vsel %vm567_vm10, %v899_v43, 0.0  ;;  %951 = vst [vmem:[#allocation1] ss:$4 sm:$0xff] %v949_v38  ;;  %v3344_v38 = vadd.f32 %v1218_v34, %v3232_v12 }
 0x219   :  { %v904_v48 = vadd.f32 %v903_v45, %v902_v44 }
 0x21a   :  { %v1220_v51 = vmax.f32 %v3344_v38, 0.0 }
 0x21b   :  { %905 = vadd.xlane.f32.xlu0 %v904_v48 }
 0x21c   :  { %v1221_v54 = vmul.f32 %v1220_v51, %v3240_v18 }
 0x21f   :  { %v952_v55 = vld.sshfl [vmem:[#allocation1] sm:$0xff pattern:$0x73625140]  ;;  %v953_v56 = vld.sshfl [vmem:[#allocation1 + $0x8] sm:$0xff pattern:$0x73625140] }
 0x220   :  { %v956_v57 = vsel %vm419_vm4, %v952_v55, 0.0  ;;  %v957_v59 = vsel %vm567_vm10, %v953_v56, 0.0  ;;  %1006 = vst [vmem:[#allocation1] ss:$4 sm:$0xff] %v1004_v52  ;;  %v1272_v52 = vadd.f32 %v1271_v41, %v1270_v47  ;;  %v1325_v56 = vld [vmem:[#allocation4 + $0xc] sm:$0xf] }
 0x221   :  { %v958_v62 = vadd.f32 %v957_v59, %v956_v57 }
 0x222   :  { %v3353_v55 = vadd.f32 %v1272_v52, %v3232_v12 }
 0x223   :  { %959 = vadd.xlane.f32.xlu1 %v958_v62 }
 0x224   :  { %v1274_v3 = vmax.f32 %v3353_v55, 0.0  ;;  %v1685_v55 = vld [vmem:[%s4348_s10 + $0xf8] sm:$0xff] }
 0x225   :  { %1771 = vmatpush.msra.mxu3 %v1685_v55  ;;  %v1691_v55 = vld [vmem:[%s4348_s10 + $0x128] sm:$0xff] }
 0x227   :  { %v1007_v4 = vld.sshfl [vmem:[#allocation1] sm:$0xff pattern:$0x73625140]  ;;  %v1008_v6 = vld.sshfl [vmem:[#allocation1 + $0x8] sm:$0xff pattern:$0x73625140] }
 0x228   :  { %v1011_v7 = vsel %vm419_vm4, %v1007_v4, 0.0  ;;  %v1012_v9 = vsel %vm567_vm10, %v1008_v6, 0.0  ;;  %1060 = vst [vmem:[#allocation1] ss:$4 sm:$0xff] %v1058_v1  ;;  %v1326_v4 = vadd.f32 %v1325_v56, %v1324_v0  ;;  %v1275_v6 = vmul.f32 %v1274_v3, %v3240_v18 }
 0x229   :  { %v1013_v11 = vadd.f32 %v1012_v9, %v1011_v7  ;;  %v1379_v9 = vld [vmem:[#allocation4 + $0xc] sm:$0xf] }
 0x22a   :  { %v3362_v7 = vadd.f32 %v1326_v4, %v3232_v12 }
 0x22b   :  { %1014 = vadd.xlane.f32.xlu2 %v1013_v11 }
 0x22f   :  { %v1061_v23 = vld.sshfl [vmem:[#allocation1] sm:$0xff pattern:$0x73625140]  ;;  %v1062_v26 = vld.sshfl [vmem:[#allocation1 + $0x8] sm:$0xff pattern:$0x73625140] }
 0x230   :  { %v1065_v28 = vsel %vm419_vm4, %v1061_v23, 0.0  ;;  %v1066_v29 = vsel %vm567_vm10, %v1062_v26, 0.0  ;;  %1114 = vst [vmem:[#allocation1] ss:$4 sm:$0xff] %v1112_v15  ;;  %v4361_v26 = vmax.f32 %v3362_v7, 0.0 }
 0x231   :  { %v1067_v31 = vadd.f32 %v1066_v29, %v1065_v28  ;;  %v1380_v28 = vadd.f32 %v1379_v9, %v1378_v22 }
 0x232   :  { %v1329_v29 = vmul.f32 %v4361_v26, %v3240_v18 }
 0x233   :  { %1068 = vadd.xlane.f32.xlu2 %v1067_v31  ;;  %v3371_v30 = vadd.f32 %v1380_v28, %v3232_v12  ;;  %v1434_v31 = vld [vmem:[#allocation4 + $0x10] sm:$0xf]  ;;  %v1541_v28 = vld [vmem:[#allocation3 + $0x8] sm:$0xf] }
 0x237   :  { %v1115_v42 = vld.sshfl [vmem:[#allocation1] sm:$0xff pattern:$0x73625140]  ;;  %v1116_v43 = vld.sshfl [vmem:[#allocation1 + $0x8] sm:$0xff pattern:$0x73625140] }
 0x238   :  { %v1119_v44 = vsel %vm419_vm4, %v1115_v42, 0.0  ;;  %v1120_v45 = vsel %vm567_vm10, %v1116_v43, 0.0  ;;  %1168 = vst [vmem:[#allocation1] ss:$4 sm:$0xff] %v1166_v36  ;;  %v1432_v43 = vld [vmem:[#allocation3] sm:$0xf] }
 0x239   :  { %v1121_v48 = vadd.f32 %v1120_v45, %v1119_v44  ;;  %v1382_v45 = vmax.f32 %v3371_v30, 0.0  ;;  %v1435_v47 = vadd.f32 %v1434_v31, %v1432_v43  ;;  %v1680_v30 = vld [vmem:[%s4348_s10 + $0xd0] sm:$0xff] }
 0x23b   :  { %1122 = vadd.xlane.f32.xlu0 %v1121_v48  ;;  %v1383_v48 = vmul.f32 %v1382_v45, %v3240_v18  ;;  %v3380_v52 = vadd.f32 %v1435_v47, %v3232_v12 }
 0x23f   :  { %v1169_v57 = vld.sshfl [vmem:[#allocation1] sm:$0xff pattern:$0x73625140]  ;;  %v1170_v59 = vld.sshfl [vmem:[#allocation1 + $0x8] sm:$0xff pattern:$0x73625140] }
 0x240   :  { %v1173_v60 = vsel %vm419_vm4, %v1169_v57, 0.0  ;;  %v1174_v62 = vsel %vm567_vm10, %v1170_v59, 0.0  ;;  %1223 = vst [vmem:[#allocation1] ss:$4 sm:$0xff] %v1221_v54  ;;  %v1488_v54 = vld [vmem:[#allocation4 + $0x10] sm:$0xf] }
 0x241   :  { %v1175_v1 = vadd.f32 %v1174_v62, %v1173_v60  ;;  %v1487_v62 = vld [vmem:[#allocation3 + $0x4] sm:$0xf] }
 0x242   :  { %v1489_v4 = vadd.f32 %v1488_v54, %v1487_v62 }
 0x243   :  { %1176 = vadd.xlane.f32.xlu1 %v1175_v1  ;;  %v1437_v1 = vmax.f32 %v3380_v52, 0.0 }
 0x244   :  { %v3389_v9 = vadd.f32 %v1489_v4, %v3232_v12 }
 0x246   :  { %v4360_v31 = vmax.f32 %v3389_v9, 0.0 }
 0x247   :  { %v1224_v10 = vld.sshfl [vmem:[#allocation1] sm:$0xff pattern:$0x73625140]  ;;  %v1225_v11 = vld.sshfl [vmem:[#allocation1 + $0x8] sm:$0xff pattern:$0x73625140] }
 0x248   :  { %v1228_v14 = vsel %vm419_vm4, %v1224_v10, 0.0  ;;  %v1229_v15 = vsel %vm567_vm10, %v1225_v11, 0.0  ;;  %1277 = vst [vmem:[#allocation1] ss:$4 sm:$0xff] %v1275_v6  ;;  %v1438_v6 = vmul.f32 %v1437_v1, %v3240_v18  ;;  %v1542_v10 = vld [vmem:[#allocation4 + $0x10] sm:$0xf] }
 0x249   :  { %v1230_v23 = vadd.f32 %v1229_v15, %v1228_v14  ;;  %v3391_v15 = vld [vmem:[#allocation6] ss:$0 sm:$0xff] }
 0x24b   :  { %1231 = vadd.xlane.f32.xlu0 %v1230_v23 }
 0x24f   :  { %v1278_v34 = vld.sshfl [vmem:[#allocation1] sm:$0xff pattern:$0x73625140]  ;;  %v1279_v36 = vld.sshfl [vmem:[#allocation1 + $0x8] sm:$0xff pattern:$0x73625140] }
 0x250   :  { %v1282_v41 = vsel %vm419_vm4, %v1278_v34, 0.0  ;;  %v1283_v42 = vsel %vm567_vm10, %v1279_v36, 0.0  ;;  %1331 = vst [vmem:[#allocation1] ss:$4 sm:$0xff] %v1329_v29  ;;  %v1543_v34 = vadd.f32 %v1542_v10, %v1541_v28 }
 0x251   :  { %v1284_v44 = vadd.f32 %v1283_v42, %v1282_v41  ;;  %v1492_v42 = vmul.f32 %v4360_v31, %v3240_v18 }
 0x252   :  { %v3401_v43 = vadd.f32 %v1543_v34, %v3232_v12 }
 0x253   :  { %1285 = vadd.xlane.f32.xlu2 %v1284_v44  ;;  %v1596_v44 = vld [vmem:[#allocation4 + $0x10] sm:$0xf] }
 0x257   :  { %v1332_v56 = vld.sshfl [vmem:[#allocation1] sm:$0xff pattern:$0x73625140]  ;;  %v1333_v57 = vld.sshfl [vmem:[#allocation1 + $0x8] sm:$0xff pattern:$0x73625140] }
 0x258   :  { %v1336_v59 = vsel %vm419_vm4, %v1332_v56, 0.0  ;;  %v1337_v60 = vsel %vm567_vm10, %v1333_v57, 0.0  ;;  %1385 = vst [vmem:[#allocation1] ss:$4 sm:$0xff] %v1383_v48 }
 0x259   :  { %v1338_v0 = vadd.f32 %v1337_v60, %v1336_v59  ;;  %v1595_v60 = vld [vmem:[#allocation3 + $0xc] sm:$0xf] }
 0x25a   :  { %v1597_v4 = vadd.f32 %v1596_v44, %v1595_v60 }
 0x25b   :  { %1339 = vadd.xlane.f32.xlu1 %v1338_v0  ;;  %v4359_v0 = vmax.f32 %v3401_v43, 0.0 }
 0x25e   :  { %v571_v36 = vpop.xlane.xlu0 %570 }
 0x25f   :  { %v1386_v11 = vld.sshfl [vmem:[#allocation1] sm:$0xff pattern:$0x73625140]  ;;  %v1387_v14 = vld.sshfl [vmem:[#allocation1 + $0x8] sm:$0xff pattern:$0x73625140]  ;;  %v575_v41 = vadd.f32 %v3391_v15, %v571_v36 }
 0x260   :  { %v1390_v22 = vsel %vm419_vm4, %v1386_v11, 0.0  ;;  %v1391_v23 = vsel %vm567_vm10, %v1387_v14, 0.0  ;;  %1440 = vst [vmem:[#allocation1] ss:$4 sm:$0xff] %v1438_v6  ;;  %v1546_v11 = vmul.f32 %v4359_v0, %v3240_v18  ;;  %v3411_v14 = vadd.f32 %v1597_v4, %v3232_v12 }
 0x261   :  { %v1392_v29 = vadd.f32 %v1391_v23, %v1390_v22  ;;  %v576_v47 = vsub.f32 0.0, %v575_v41 }
 0x263   :  { %1393 = vadd.xlane.f32.xlu1 %v1392_v29  ;;  %v577_v56 = vmul.f32 1.442695, %v576_v47 }
 0x265   :  { %2597 = vpow2.f32 %v577_v56  ;;  %v4358_v56 = vmax.f32 %v3411_v14, 0.0 }
 0x266   :  { %v630_v6 = vpop.xlane.xlu0 %629 }
 0x267   :  { %v1441_v48 = vld.sshfl [vmem:[#allocation1] sm:$0xff pattern:$0x73625140]  ;;  %v1442_v54 = vld.sshfl [vmem:[#allocation1 + $0x8] sm:$0xff pattern:$0x73625140]  ;;  %v631_v10 = vadd.f32 %v3391_v15, %v630_v6 }
 0x268   :  { %v1445_v57 = vsel %vm419_vm4, %v1441_v48, 0.0  ;;  %v1446_v59 = vsel %vm567_vm10, %v1442_v54, 0.0  ;;  %1494 = vst [vmem:[#allocation1] ss:$4 sm:$0xff] %v1492_v42 }
 0x269   :  { %v1447_v62 = vadd.f32 %v1446_v59, %v1445_v57  ;;  %v632_v22 = vsub.f32 0.0, %v631_v10  ;;  %v2703_v57 = vmov 0   ;;  %v1600_v59 = vmul.f32 %v4358_v56, %v3240_v18 }
 0x26a   :  { %2590 = vset.pattern.permute.xlu2 %v2703_v57  ;;  %2591 = vset.pattern.permute.xlu0 %v2703_v57 }
 0x26b   :  { %1448 = vadd.xlane.f32.xlu0 %v1447_v62  ;;  %v2598_v36 = vpop.eup %2597  ;;  %v633_v41 = vmul.f32 1.442695, %v632_v22  ;;  %2592 = vset.pattern.permute.xlu1 %v2703_v57 }
 0x26c   :  { %v579_v47 = vadd.f32 1.0, %v2598_v36 }
 0x26d   :  { %2599 = vpow2.f32 %v633_v41 }
 0x26e   :  { %v686_v23 = vpop.xlane.xlu1 %685  ;;  %2601 = vrcp.f32 %v579_v47  ;;  %vm585_vm12 = vweird.f32 %v579_v47 }
 0x26f   :  { %v687_v28 = vadd.f32 %v3391_v15, %v686_v23  ;;  %v1495_v29 = vld.sshfl [vmem:[#allocation1] sm:$0xff pattern:$0x73625140]  ;;  %v1496_v34 = vld.sshfl [vmem:[#allocation1 + $0x8] sm:$0xff pattern:$0x73625140] }
 0x270   :  { %v1499_v42 = vsel %vm419_vm4, %v1495_v29, 0.0  ;;  %v1500_v44 = vsel %vm567_vm10, %v1496_v34, 0.0  ;;  %1548 = vst [vmem:[#allocation1] ss:$4 sm:$0xff] %v1546_v11 }
 0x271   :  { %v688_v48 = vsub.f32 0.0, %v687_v28  ;;  %v1501_v54 = vadd.f32 %v1500_v44, %v1499_v42 }
 0x273   :  { %v689_v12 = vmul.f32 1.442695, %v688_v48  ;;  %1502 = vadd.xlane.f32.xlu2 %v1501_v54  ;;  %v2600_v10 = vpop.eup %2599 }
 0x274   :  { %v2602_v23 = vpop.eup %2601  ;;  %v635_v28 = vadd.f32 1.0, %v2600_v10  ;;  %v591_v10 = vand.u32 2147483648, %v579_v47 }
 0x275   :  { %2603 = vpow2.f32 %v689_v12  ;;  %v581_v36 = vmul.f32 %v2602_v23, %v579_v47  ;;  %v589_v12 = vand.u32 2147483647, %v579_v47  ;;  %vm586_vm11 = vweird.f32 %v2602_v23 }
 0x276   :  { %v742_v60 = vpop.xlane.xlu1 %741  ;;  %2605 = vrcp.f32 %v635_v28  ;;  %vm3429_vm13 = vmor %vm585_vm12, %vm586_vm11  ;;  %v647_v47 = vand.u32 2147483648, %v635_v28  ;;  %vm641_vm0 = vweird.f32 %v635_v28 }
 0x277   :  { %v743_v62 = vadd.f32 %v3391_v15, %v742_v60  ;;  %v1549_v4 = vld.sshfl [vmem:[#allocation1] sm:$0xff pattern:$0x73625140]  ;;  %v1550_v6 = vld.sshfl [vmem:[#allocation1 + $0x8] sm:$0xff pattern:$0x73625140] }
 0x278   :  { %v1553_v11 = vsel %vm419_vm4, %v1549_v4, 0.0  ;;  %v1554_v22 = vsel %vm567_vm10, %v1550_v6, 0.0  ;;  %1602 = vst [vmem:[#allocation1] ss:$4 sm:$0xff] %v1600_v59  ;;  %v582_v44 = vsub.f32 1.0, %v581_v36  ;;  %vm590_vm14 = vcmp.eq.f32.partialorder %v589_v12, 8.507059e+37 }
 0x279   :  { %v744_v29 = vsub.f32 0.0, %v743_v62  ;;  %v1555_v34 = vadd.f32 %v1554_v22, %v1553_v11 }
 0x27a   :  { %v583_v54 = vmul.f32 %v2602_v23, %v582_v44 }
 0x27b   :  { %v2604_v41 = vpop.eup %2603  ;;  %v745_v42 = vmul.f32 1.442695, %v744_v29  ;;  %1556 = vadd.xlane.f32.xlu0 %v1555_v34 }
 0x27c   :  { %v3423_v18 = vadd.f32 1.0, %v2604_v41  ;;  %v584_v6 = vadd.f32 %v2602_v23, %v583_v54  ;;  %v2606_v11 = vpop.eup %2605  ;;  %v592_v54 = vor.u32 1.1754944e-38, %v591_v10  ;;  %v648_v10 = vor.u32 1.1754944e-38, %v647_v47 }
 0x27d   :  { %2607 = vpow2.f32 %v745_v42  ;;  %v637_v36 = vmul.f32 %v2606_v11, %v635_v28  ;;  %vm642_vm15 = vweird.f32 %v2606_v11 }
 0x27e   :  { %2609 = vrcp.f32 %v3423_v18  ;;  %v798_v48 = vpop.xlane.xlu2 %797  ;;  %v588_v44 = vsel %vm3429_vm13, %v2602_v23, %v584_v6  ;;  %vm643_vm1 = vmor %vm641_vm0, %vm642_vm15  ;;  %vm697_vm11 = vweird.f32 %v3423_v18 }
 0x27f   :  { %v799_v57 = vadd.f32 %v3391_v15, %v798_v48  ;;  %v1603_v59 = vld.sshfl [vmem:[#allocation1] sm:$0xff pattern:$0x73625140]  ;;  %v1604_v60 = vld.sshfl [vmem:[#allocation1 + $0x8] sm:$0xff pattern:$0x73625140]  ;;  %v593_v56 = vsel %vm590_vm14, %v592_v54, %v588_v44 }
 0x280   :  { %v1607_v62 = vsel %vm419_vm4, %v1603_v59, 0.0  ;;  %v1608_v4 = vsel %vm567_vm10, %v1604_v60, 0.0  ;;  %v638_v60 = vsub.f32 1.0, %v637_v36  ;;  %v595_v12 = vadd.f32 1.0, %v593_v56 }
 0x281   :  { %v800_v22 = vsub.f32 0.0, %v799_v57  ;;  %v1609_v29 = vadd.f32 %v1608_v4, %v1607_v62  ;;  %v645_v57 = vand.u32 2147483647, %v635_v28 }
 0x283   :  { %v2608_v41 = vpop.eup %2607  ;;  %v801_v42 = vmul.f32 1.442695, %v800_v22  ;;  %1610 = vadd.xlane.f32.xlu1 %v1609_v29  ;;  %v639_v22 = vmul.f32 %v2606_v11, %v638_v60  ;;  %vm646_vm3 = vcmp.eq.f32.partialorder %v645_v57, 8.507059e+37  ;;  %v703_v57 = vand.u32 2147483648, %v3423_v18 }
 0x284   :  { %v3435_v48 = vpop.eup %2609  ;;  %v747_v59 = vadd.f32 1.0, %v2608_v41 }
 0x285   :  { %2611 = vpow2.f32 %v801_v42  ;;  %v693_v62 = vmul.f32 %v3435_v48, %v3423_v18  ;;  %v640_v23 = vadd.f32 %v2606_v11, %v639_v22  ;;  %vm698_vm5 = vweird.f32 %v3435_v48 }
 0x286   :  { %2613 = vrcp.f32 %v747_v59  ;;  %v852_v4 = vpop.xlane.xlu2 %851  ;;  %v759_v47 = vand.u32 2147483648, %v747_v59  ;;  %vm753_vm12 = vweird.f32 %v747_v59  ;;  %vm3447_vm13 = vmor %vm697_vm11, %vm698_vm5 }
 0x287   :  { %v853_v29 = vadd.f32 %v3391_v15, %v852_v4  ;;  %v694_v6 = vsub.f32 1.0, %v693_v62  ;;  %v644_v36 = vsel %vm643_vm1, %v2606_v11, %v640_v23 }
 0x288   :  { %v649_v0 = vsel %vm646_vm3, %v648_v10, %v644_v36 }
 0x289   :  { %v854_v34 = vsub.f32 0.0, %v853_v29  ;;  %v695_v44 = vmul.f32 %v3435_v48, %v694_v6  ;;  %v651_v54 = vadd.f32 1.0, %v649_v0  ;;  %v757_v29 = vand.u32 2147483647, %v747_v59 }
 0x28a   :  { %v701_v0 = vand.u32 2147483647, %v3423_v18 }
 0x28b   :  { %v2612_v41 = vpop.eup %2611  ;;  %v855_v42 = vmul.f32 1.442695, %v854_v34  ;;  %598 = vperm.xlu2 %2590, %v595_v12   ;;  %v696_v11 = vadd.f32 %v3435_v48, %v695_v44  ;;  %v704_v44 = vor.u32 1.1754944e-38, %v703_v57  ;;  %vm758_vm15 = vcmp.eq.f32.partialorder %v757_v29, 8.507059e+37 }
 0x28c   :  { %v2614_v31 = vpop.eup %2613  ;;  %v803_v26 = vadd.f32 1.0, %v2612_v41  ;;  %v760_v41 = vor.u32 1.1754944e-38, %v759_v47  ;;  %vm702_vm0 = vcmp.eq.f32.partialorder %v701_v0, 8.507059e+37 }
 0x28d   :  { %2615 = vpow2.f32 %v855_v42  ;;  %v749_v60 = vmul.f32 %v2614_v31, %v747_v59  ;;  %vm754_vm10 = vweird.f32 %v2614_v31  ;;  %v700_v42 = vsel %vm3447_vm13, %v3435_v48, %v696_v11 }
 0x28e   :  { %2617 = vrcp.f32 %v803_v26  ;;  %v906_v28 = vpop.xlane.xlu0 %905  ;;  %vm755_vm14 = vmor %vm753_vm12, %vm754_vm10  ;;  %v813_v48 = vand.u32 2147483647, %v803_v26  ;;  %vm809_vm3 = vweird.f32 %v803_v26 }
 0x28f   :  { %v907_v62 = vadd.f32 %v3391_v15, %v906_v28  ;;  %654 = vperm.xlu0 %2591, %v651_v54   ;;  %v750_v56 = vsub.f32 1.0, %v749_v60 }
 0x290   :  { %vm814_vm10 = vcmp.eq.f32.partialorder %v813_v48, 8.507059e+37 }
 0x291   :  { %v908_v4 = vsub.f32 0.0, %v907_v62  ;;  %v751_v22 = vmul.f32 %v2614_v31, %v750_v56  ;;  %v705_v56 = vsel %vm702_vm0, %v704_v44, %v700_v42 }
 0x292   :  { %v707_v11 = vadd.f32 1.0, %v705_v56 }
 0x293   :  { %v2616_v23 = vpop.eup %2615  ;;  %v909_v6 = vmul.f32 1.442695, %v908_v4  ;;  %v752_v34 = vadd.f32 %v2614_v31, %v751_v22  ;;  %v815_v22 = vand.u32 2147483648, %v803_v26 }
 0x294   :  { %v2618_v10 = vpop.eup %2617  ;;  %v857_v36 = vadd.f32 1.0, %v2616_v23 }
 0x295   :  { %2619 = vpow2.f32 %v909_v6  ;;  %v756_v54 = vsel %vm755_vm14, %v2614_v31, %v752_v34  ;;  %v805_v18 = vmul.f32 %v2618_v10, %v803_v26  ;;  %vm810_vm1 = vweird.f32 %v2618_v10 }
 0x296   :  { %2621 = vrcp.f32 %v857_v36  ;;  %v960_v60 = vpop.xlane.xlu1 %959  ;;  %v761_v59 = vsel %vm758_vm15, %v760_v41, %v756_v54  ;;  %vm811_vm5 = vmor %vm809_vm3, %vm810_vm1  ;;  %v816_v0 = vor.u32 1.1754944e-38, %v815_v22  ;;  %vm863_vm12 = vweird.f32 %v857_v36 }
 0x297   :  { %v961_v28 = vadd.f32 %v3391_v15, %v960_v60  ;;  %v763_v62 = vadd.f32 1.0, %v761_v59  ;;  %v806_v4 = vsub.f32 1.0, %v805_v18  ;;  %v869_v59 = vand.u32 2147483648, %v857_v36 }
 0x299   :  { %v962_v47 = vsub.f32 0.0, %v961_v28  ;;  %766 = vperm.xlu2 %2590, %v763_v62   ;;  %v807_v23 = vmul.f32 %v2618_v10, %v806_v4  ;;  %v867_v62 = vand.u32 2147483647, %v857_v36 }
 0x29b   :  { %v2620_v57 = vpop.eup %2619  ;;  %v963_v31 = vmul.f32 1.442695, %v962_v47  ;;  %v808_v29 = vadd.f32 %v2618_v10, %v807_v23  ;;  %v870_v23 = vor.u32 1.1754944e-38, %v869_v59  ;;  %vm868_vm14 = vcmp.eq.f32.partialorder %v867_v62, 8.507059e+37 }
 0x29c   :  { %v2622_v6 = vpop.eup %2621  ;;  %v911_v34 = vadd.f32 1.0, %v2620_v57  ;;  %710 = vperm.xlu1 %2592, %v707_v11  }
 0x29d   :  { %2623 = vpow2.f32 %v963_v31  ;;  %v812_v12 = vsel %vm811_vm5, %v2618_v10, %v808_v29  ;;  %v859_v41 = vmul.f32 %v2622_v6, %v857_v36  ;;  %vm864_vm11 = vweird.f32 %v2622_v6 }
 0x29e   :  { %2625 = vrcp.f32 %v911_v34  ;;  %v1015_v42 = vpop.xlane.xlu2 %1014  ;;  %v817_v44 = vsel %vm814_vm10, %v816_v0, %v812_v12  ;;  %vm865_vm13 = vmor %vm863_vm12, %vm864_vm11  ;;  %v921_v36 = vand.u32 2147483647, %v911_v34  ;;  %vm917_vm0 = vweird.f32 %v911_v34 }
 0x29f   :  { %v1016_v54 = vadd.f32 %v3391_v15, %v1015_v42  ;;  %v819_v18 = vadd.f32 1.0, %v817_v44  ;;  %v860_v60 = vsub.f32 1.0, %v859_v41  ;;  %v923_v41 = vand.u32 2147483648, %v911_v34 }
 0x2a0   :  { %vm922_vm3 = vcmp.eq.f32.partialorder %v921_v36, 8.507059e+37 }
 0x2a1   :  { %v1017_v28 = vsub.f32 0.0, %v1016_v54  ;;  %822 = vperm.xlu2 %2590, %v819_v18   ;;  %v861_v26 = vmul.f32 %v2622_v6, %v860_v60 }
 0x2a3   :  { %v2624_v56 = vpop.eup %2623  ;;  %v1018_v4 = vmul.f32 1.442695, %v1017_v28  ;;  %v862_v22 = vadd.f32 %v2622_v6, %v861_v26  ;;  %v924_v28 = vor.u32 1.1754944e-38, %v923_v41 }
 0x2a4   :  { %v2626_v10 = vpop.eup %2625  ;;  %v965_v47 = vadd.f32 1.0, %v2624_v56 }
 0x2a5   :  { %2627 = vpow2.f32 %v1018_v4  ;;  %v866_v48 = vsel %vm865_vm13, %v2622_v6, %v862_v22  ;;  %v913_v11 = vmul.f32 %v2626_v10, %v911_v34  ;;  %vm918_vm15 = vweird.f32 %v2626_v10 }
 0x2a6   :  { %2629 = vrcp.f32 %v965_v47  ;;  %v1069_v57 = vpop.xlane.xlu2 %1068  ;;  %v871_v31 = vsel %vm868_vm14, %v870_v23, %v866_v48  ;;  %vm919_vm1 = vmor %vm917_vm0, %vm918_vm15  ;;  %v975_v34 = vand.u32 2147483647, %v965_v47  ;;  %vm971_vm10 = vweird.f32 %v965_v47 }
 0x2a7   :  { %v1070_v29 = vadd.f32 %v3391_v15, %v1069_v57  ;;  %v873_v0 = vadd.f32 1.0, %v871_v31  ;;  %v914_v12 = vsub.f32 1.0, %v913_v11  ;;  %v977_v11 = vand.u32 2147483648, %v965_v47 }
 0x2a8   :  { %vm976_vm12 = vcmp.eq.f32.partialorder %v975_v34, 8.507059e+37 }
 0x2a9   :  { %v1071_v42 = vsub.f32 0.0, %v1070_v29  ;;  %876 = vperm.xlu1 %2592, %v873_v0   ;;  %v915_v44 = vmul.f32 %v2626_v10, %v914_v12 }
 0x2ab   :  { %v2628_v54 = vpop.eup %2627  ;;  %v1072_v18 = vmul.f32 1.442695, %v1071_v42  ;;  %v916_v60 = vadd.f32 %v2626_v10, %v915_v44  ;;  %v978_v42 = vor.u32 1.1754944e-38, %v977_v11 }
 0x2ac   :  { %v2630_v6 = vpop.eup %2629  ;;  %v1020_v59 = vadd.f32 1.0, %v2628_v54 }
 0x2ad   :  { %2631 = vpow2.f32 %v1072_v18  ;;  %v920_v26 = vsel %vm919_vm1, %v2626_v10, %v916_v60  ;;  %v967_v62 = vmul.f32 %v2630_v6, %v965_v47  ;;  %vm972_vm5 = vweird.f32 %v2630_v6 }
 0x2ae   :  { %2633 = vrcp.f32 %v1020_v59  ;;  %v1123_v56 = vpop.xlane.xlu0 %1122  ;;  %v925_v4 = vsel %vm922_vm3, %v924_v28, %v920_v26  ;;  %vm973_vm11 = vmor %vm971_vm10, %vm972_vm5  ;;  %v1030_v47 = vand.u32 2147483647, %v1020_v59  ;;  %vm1026_vm14 = vweird.f32 %v1020_v59 }
 0x2af   :  { %v1124_v22 = vadd.f32 %v3391_v15, %v1123_v56  ;;  %v927_v23 = vadd.f32 1.0, %v925_v4  ;;  %v968_v48 = vsub.f32 1.0, %v967_v62  ;;  %v1032_v62 = vand.u32 2147483648, %v1020_v59 }
 0x2b0   :  { %vm1031_vm0 = vcmp.eq.f32.partialorder %v1030_v47, 8.507059e+37 }
 0x2b1   :  { %v1125_v57 = vsub.f32 0.0, %v1124_v22  ;;  %930 = vperm.xlu2 %2590, %v927_v23   ;;  %v969_v31 = vmul.f32 %v2630_v6, %v968_v48 }
 0x2b3   :  { %v2632_v29 = vpop.eup %2631  ;;  %v1126_v0 = vmul.f32 1.442695, %v1125_v57  ;;  %v970_v12 = vadd.f32 %v2630_v6, %v969_v31  ;;  %v1033_v57 = vor.u32 1.1754944e-38, %v1032_v62 }
 0x2b4   :  { %v2634_v10 = vpop.eup %2633  ;;  %v1074_v41 = vadd.f32 1.0, %v2632_v29 }
 0x2b5   :  { %2635 = vpow2.f32 %v1126_v0  ;;  %v974_v44 = vsel %vm973_vm11, %v2630_v6, %v970_v12  ;;  %v1022_v36 = vmul.f32 %v2634_v10, %v1020_v59  ;;  %vm1027_vm13 = vweird.f32 %v2634_v10 }
 0x2b6   :  { %2637 = vrcp.f32 %v1074_v41  ;;  %v1177_v54 = vpop.xlane.xlu1 %1176  ;;  %v979_v18 = vsel %vm976_vm12, %v978_v42, %v974_v44  ;;  %vm1028_vm15 = vmor %vm1026_vm14, %vm1027_vm13  ;;  %v1084_v59 = vand.u32 2147483647, %v1074_v41  ;;  %vm1080_vm3 = vweird.f32 %v1074_v41 }
 0x2b7   :  { %v1178_v60 = vadd.f32 %v3391_v15, %v1177_v54  ;;  %v981_v28 = vadd.f32 1.0, %v979_v18  ;;  %v1023_v26 = vsub.f32 1.0, %v1022_v36  ;;  %v1086_v36 = vand.u32 2147483648, %v1074_v41 }
 0x2b8   :  { %vm1085_vm10 = vcmp.eq.f32.partialorder %v1084_v59, 8.507059e+37 }
 0x2b9   :  { %v1179_v56 = vsub.f32 0.0, %v1178_v60  ;;  %984 = vperm.xlu1 %2592, %v981_v28   ;;  %v1024_v4 = vmul.f32 %v2634_v10, %v1023_v26 }
 0x2bb   :  { %v2636_v22 = vpop.eup %2635  ;;  %v1180_v23 = vmul.f32 1.442695, %v1179_v56  ;;  %v1025_v48 = vadd.f32 %v2634_v10, %v1024_v4  ;;  %v1087_v56 = vor.u32 1.1754944e-38, %v1086_v36 }
 0x2bc   :  { %v2638_v6 = vpop.eup %2637  ;;  %v1128_v11 = vadd.f32 1.0, %v2636_v22 }
 0x2bd   :  { %2639 = vpow2.f32 %v1180_v23  ;;  %v1029_v31 = vsel %vm1028_vm15, %v2634_v10, %v1025_v48  ;;  %v1076_v34 = vmul.f32 %v2638_v6, %v1074_v41  ;;  %vm1081_vm1 = vweird.f32 %v2638_v6 }
 0x2be   :  { %2641 = vrcp.f32 %v1128_v11  ;;  %v1232_v29 = vpop.xlane.xlu0 %1231  ;;  %v1034_v0 = vsel %vm1031_vm0, %v1033_v57, %v1029_v31  ;;  %vm1082_vm5 = vmor %vm1080_vm3, %vm1081_vm1  ;;  %v1138_v41 = vand.u32 2147483647, %v1128_v11  ;;  %vm1134_vm12 = vweird.f32 %v1128_v11 }
 0x2bf   :  { %v1233_v12 = vadd.f32 %v3391_v15, %v1232_v29  ;;  %v1036_v42 = vadd.f32 1.0, %v1034_v0  ;;  %v1077_v44 = vsub.f32 1.0, %v1076_v34  ;;  %v1140_v34 = vand.u32 2147483648, %v1128_v11 }
 0x2c0   :  { %vm1139_vm14 = vcmp.eq.f32.partialorder %v1138_v41, 8.507059e+37 }
 0x2c1   :  { %v1234_v54 = vsub.f32 0.0, %v1233_v12  ;;  %1039 = vperm.xlu0 %2591, %v1036_v42   ;;  %v1078_v18 = vmul.f32 %v2638_v6, %v1077_v44 }
 0x2c3   :  { %v2640_v60 = vpop.eup %2639  ;;  %v1235_v28 = vmul.f32 1.442695, %v1234_v54  ;;  %v1079_v26 = vadd.f32 %v2638_v6, %v1078_v18  ;;  %v1141_v54 = vor.u32 1.1754944e-38, %v1140_v34 }
 0x2c4   :  { %v2642_v10 = vpop.eup %2641  ;;  %v1182_v62 = vadd.f32 1.0, %v2640_v60 }
 0x2c5   :  { %2643 = vpow2.f32 %v1235_v28  ;;  %v1083_v4 = vsel %vm1082_vm5, %v2638_v6, %v1079_v26  ;;  %v1130_v47 = vmul.f32 %v2642_v10, %v1128_v11  ;;  %vm1135_vm11 = vweird.f32 %v2642_v10 }
 0x2c6   :  { %2645 = vrcp.f32 %v1182_v62  ;;  %v1286_v22 = vpop.xlane.xlu2 %1285  ;;  %v1088_v23 = vsel %vm1085_vm10, %v1087_v56, %v1083_v4  ;;  %vm1136_vm13 = vmor %vm1134_vm12, %vm1135_vm11  ;;  %v1192_v11 = vand.u32 2147483647, %v1182_v62  ;;  %vm1188_vm0 = vweird.f32 %v1182_v62 }
 0x2c7   :  { %v1287_v48 = vadd.f32 %v3391_v15, %v1286_v22  ;;  %v1090_v57 = vadd.f32 1.0, %v1088_v23  ;;  %v1131_v31 = vsub.f32 1.0, %v1130_v47  ;;  %v1194_v47 = vand.u32 2147483648, %v1182_v62 }
 0x2c8   :  { %vm1193_vm3 = vcmp.eq.f32.partialorder %v1192_v11, 8.507059e+37 }
 0x2c9   :  { %v1288_v29 = vsub.f32 0.0, %v1287_v48  ;;  %1093 = vperm.xlu0 %2591, %v1090_v57   ;;  %v1132_v0 = vmul.f32 %v2642_v10, %v1131_v31 }
 0x2cb   :  { %v2644_v12 = vpop.eup %2643  ;;  %v1289_v42 = vmul.f32 1.442695, %v1288_v29  ;;  %v1133_v44 = vadd.f32 %v2642_v10, %v1132_v0  ;;  %v1195_v29 = vor.u32 1.1754944e-38, %v1194_v47 }
 0x2cc   :  { %v2646_v6 = vpop.eup %2645  ;;  %v1237_v36 = vadd.f32 1.0, %v2644_v12  ;;  %v2704_v12 = vmov 0.0  }
 0x2cd   :  { %2647 = vpow2.f32 %v1289_v42  ;;  %v1137_v18 = vsel %vm1136_vm13, %v2642_v10, %v1133_v44  ;;  %v1184_v59 = vmul.f32 %v2646_v6, %v1182_v62  ;;  %vm1189_vm15 = vweird.f32 %v2646_v6  ;;  %533 = vst.msk [vmem:[#allocation5] sm:$0xf] %vm3193_vm9, %v2704_v12 }
 0x2ce   :  { %2649 = vrcp.f32 %v1237_v36  ;;  %v1340_v60 = vpop.xlane.xlu1 %1339  ;;  %v1142_v28 = vsel %vm1139_vm14, %v1141_v54, %v1137_v18  ;;  %vm1190_vm1 = vmor %vm1188_vm0, %vm1189_vm15  ;;  %534 = vst.msk [vmem:[#allocation5 + $0x4] sm:$0xf] %vm3193_vm9, %v2704_v12  ;;  %vm1243_vm10 = vweird.f32 %v1237_v36 }
 0x2cf   :  { %v1341_v26 = vadd.f32 %v3391_v15, %v1340_v60  ;;  %v1144_v56 = vadd.f32 1.0, %v1142_v28  ;;  %v1185_v4 = vsub.f32 1.0, %v1184_v59  ;;  %535 = vst.msk [vmem:[#allocation5 + $0x8] sm:$0xf] %vm3193_vm9, %v2704_v12  ;;  %v1247_v28 = vand.u32 2147483647, %v1237_v36 }
 0x2d0   :  { %536 = vst.msk [vmem:[#allocation5 + $0xc] sm:$0xf] %vm3193_vm9, %v2704_v12 }
 0x2d1   :  { %v1342_v22 = vsub.f32 0.0, %v1341_v26  ;;  %1147 = vperm.xlu2 %2590, %v1144_v56   ;;  %v1186_v23 = vmul.f32 %v2646_v6, %v1185_v4  ;;  %537 = vst.msk [vmem:[#allocation5 + $0x10] sm:$0xf] %vm3193_vm9, %v2704_v12  ;;  %vm1248_vm12 = vcmp.eq.f32.partialorder %v1247_v28, 8.507059e+37 }
 0x2d3   :  { %v2648_v48 = vpop.eup %2647  ;;  %v1343_v57 = vmul.f32 1.442695, %v1342_v22  ;;  %v1187_v31 = vadd.f32 %v2646_v6, %v1186_v23 }
 0x2d4   :  { %v2650_v10 = vpop.eup %2649  ;;  %v1291_v34 = vadd.f32 1.0, %v2648_v48 }
 0x2d5   :  { %2651 = vpow2.f32 %v1343_v57  ;;  %v1191_v0 = vsel %vm1190_vm1, %v2646_v6, %v1187_v31  ;;  %v1239_v41 = vmul.f32 %v2650_v10, %v1237_v36  ;;  %v1249_v6 = vand.u32 2147483648, %v1237_v36 }
 0x2d6   :  { %2653 = vrcp.f32 %v1291_v34  ;;  %v1394_v42 = vpop.xlane.xlu1 %1393  ;;  %v1196_v44 = vsel %vm1193_vm3, %v1195_v29, %v1191_v0  ;;  %vm1244_vm5 = vweird.f32 %v2650_v10  ;;  %v1303_v12 = vand.u32 2147483648, %v1291_v34 }
 0x2d7   :  { %v1395_v62 = vadd.f32 %v3391_v15, %v1394_v42  ;;  %v1198_v54 = vadd.f32 1.0, %v1196_v44  ;;  %v1240_v18 = vsub.f32 1.0, %v1239_v41  ;;  %vm1245_vm11 = vmor %vm1243_vm10, %vm1244_vm5  ;;  %v1250_v23 = vor.u32 1.1754944e-38, %v1249_v6 }
 0x2d8   :  { %v1301_v44 = vand.u32 2147483647, %v1291_v34  ;;  %vm1297_vm14 = vweird.f32 %v1291_v34  ;;  %v1304_v6 = vor.u32 1.1754944e-38, %v1303_v12 }
 0x2d9   :  { %v1396_v59 = vsub.f32 0.0, %v1395_v62  ;;  %1201 = vperm.xlu1 %2592, %v1198_v54   ;;  %v1241_v60 = vmul.f32 %v2650_v10, %v1240_v18 }
 0x2da   :  { %vm1302_vm0 = vcmp.eq.f32.partialorder %v1301_v44, 8.507059e+37 }
 0x2db   :  { %v2652_v26 = vpop.eup %2651  ;;  %v1397_v56 = vmul.f32 1.442695, %v1396_v59  ;;  %v1242_v4 = vadd.f32 %v2650_v10, %v1241_v60 }
 0x2dc   :  { %v2654_v47 = vpop.eup %2653  ;;  %v3473_v22 = vadd.f32 1.0, %v2652_v26 }
 0x2dd   :  { %2655 = vpow2.f32 %v1397_v56  ;;  %v1246_v11 = vsel %vm1245_vm11, %v2650_v10, %v1242_v4  ;;  %v1293_v48 = vmul.f32 %v2654_v47, %v1291_v34  ;;  %vm1298_vm13 = vweird.f32 %v2654_v47 }
 0x2de   :  { %v1449_v57 = vpop.xlane.xlu0 %1448  ;;  %v1251_v31 = vsel %vm1248_vm12, %v1250_v23, %v1246_v11  ;;  %2657 = vrcp.f32 %v3473_v22  ;;  %vm1299_vm15 = vmor %vm1297_vm14, %vm1298_vm13  ;;  %v2705_v23 = vmov 269488144   ;;  %vm1351_vm5 = vweird.f32 %v3473_v22 }
 0x2df   :  { %v1450_v29 = vadd.f32 %v3391_v15, %v1449_v57  ;;  %v1253_v0 = vadd.f32 1.0, %v1251_v31  ;;  %v1294_v41 = vsub.f32 1.0, %v1293_v48  ;;  %v601_v11 = vunpack.c.l.s4 %v2705_v23 }
 0x2e1   :  { %v1451_v42 = vsub.f32 0.0, %v1450_v29  ;;  %1256 = vperm.xlu2 %2590, %v1253_v0   ;;  %v1295_v36 = vmul.f32 %v2654_v47, %v1294_v41  ;;  %v3482_v29 = vunpack.c.0.s8 %v601_v11 }
 0x2e3   :  { %v2656_v62 = vpop.eup %2655  ;;  %v1452_v54 = vmul.f32 1.442695, %v1451_v42  ;;  %v1296_v18 = vadd.f32 %v2654_v47, %v1295_v36 }
 0x2e4   :  { %v1399_v10 = vadd.f32 1.0, %v2656_v62  ;;  %v3477_v59 = vpop.eup %2657  ;;  %v610_v62 = vld [vmem:[#allocation5] sm:$0xf] }
 0x2e5   :  { %2659 = vpow2.f32 %v1452_v54  ;;  %v1300_v60 = vsel %vm1299_vm15, %v2654_v47, %v1296_v18  ;;  %v1347_v48 = vmul.f32 %v3477_v59, %v3473_v22  ;;  %vm1352_vm11 = vweird.f32 %v3477_v59 }
 0x2e6   :  { %2661 = vrcp.f32 %v1399_v10  ;;  %v1503_v28 = vpop.xlane.xlu2 %1502  ;;  %v1305_v26 = vsel %vm1302_vm0, %v1304_v6, %v1300_v60  ;;  %v607_v6 = vld [vmem:[#allocation5 + $0x4] sm:$0xf]  ;;  %v1409_v60 = vand.u32 2147483647, %v1399_v10  ;;  %vm1405_vm3 = vweird.f32 %v1399_v10  ;;  %vm3511_vm13 = vmor %vm1351_vm5, %vm1352_vm11 }
 0x2e7   :  { %v1504_v56 = vadd.f32 %v3391_v15, %v1503_v28  ;;  %v1307_v4 = vadd.f32 1.0, %v1305_v26  ;;  %v1348_v41 = vsub.f32 1.0, %v1347_v48  ;;  %v1411_v28 = vand.u32 2147483648, %v1399_v10 }
 0x2e8   :  { %vm1410_vm12 = vcmp.eq.f32.partialorder %v1409_v60, 8.507059e+37 }
 0x2e9   :  { %v1505_v34 = vsub.f32 0.0, %v1504_v56  ;;  %1310 = vperm.xlu0 %2591, %v1307_v4   ;;  %v1349_v26 = vmul.f32 %v3477_v59, %v1348_v41 }
 0x2eb   :  { %v2660_v57 = vpop.eup %2659  ;;  %v1506_v31 = vmul.f32 1.442695, %v1505_v34  ;;  %v1350_v41 = vadd.f32 %v3477_v59, %v1349_v26 }
 0x2ec   :  { %v2662_v0 = vpop.eup %2661  ;;  %v3484_v47 = vadd.f32 1.0, %v2660_v57 }
 0x2ed   :  { %2663 = vpow2.f32 %v1506_v31  ;;  %v1401_v12 = vmul.f32 %v2662_v0, %v1399_v10  ;;  %vm1406_vm1 = vweird.f32 %v2662_v0 }
 0x2ee   :  { %2665 = vrcp.f32 %v3484_v47  ;;  %v1557_v42 = vpop.xlane.xlu0 %1556  ;;  %v599_v36 = vpop.permute.xlu2 %598  ;;  %vm1407_vm10 = vmor %vm1405_vm3, %vm1406_vm1  ;;  %vm1460_vm0 = vweird.f32 %v3484_v47 }
 0x2ef   :  { %v1558_v44 = vadd.f32 %v3391_v15, %v1557_v42  ;;  %v603_v54 = vperm.slane %v599_v36, %v3482_v29  ;;  %v1402_v18 = vsub.f32 1.0, %v1401_v12  ;;  %v1412_v36 = vor.u32 1.1754944e-38, %v1411_v28 }
 0x2f1   :  { %v1559_v56 = vsub.f32 0.0, %v1558_v44  ;;  %v605_v4 = vmul.f32 %v603_v54, %v552_v19  ;;  %v1403_v23 = vmul.f32 %v2662_v0, %v1402_v18  ;;  %v1355_v54 = vand.u32 2147483647, %v3473_v22 }
 0x2f2   :  { %v1357_v18 = vand.u32 2147483648, %v3473_v22 }
 0x2f3   :  { %v2664_v11 = vpop.eup %2663  ;;  %v1560_v48 = vmul.f32 1.442695, %v1559_v56  ;;  %v608_v34 = vadd.f32 %v607_v6, %v605_v4  ;;  %v611_v57 = vadd.f32 %v610_v62, %v605_v4  ;;  %v1404_v31 = vadd.f32 %v2662_v0, %v1403_v23  ;;  %v775_v56 = vld [vmem:[#allocation5 + $0x10] sm:$0xf] }
 0x2f4   :  { %v2666_v12 = vpop.eup %2665  ;;  %v3493_v42 = vadd.f32 1.0, %v2664_v11  ;;  %v1464_v4 = vand.u32 2147483647, %v3484_v47  ;;  %v1466_v23 = vand.u32 2147483648, %v3484_v47  ;;  %v1354_v11 = vsel %vm3511_vm13, %v3477_v59, %v1350_v41 }
 0x2f5   :  { %2667 = vpow2.f32 %v1560_v48  ;;  %609 = vst.msk [vmem:[#allocation5 + $0x4] sm:$0xf] %vm3193_vm9, %v608_v34  ;;  %v1408_v16 = vsel %vm1407_vm10, %v2662_v0, %v1404_v31  ;;  %v1456_v19 = vmul.f32 %v2666_v12, %v3484_v47  ;;  %vm1461_vm14 = vweird.f32 %v2666_v12 }
 0x2f6   :  { %2669 = vrcp.f32 %v3493_v42  ;;  %612 = vst.msk [vmem:[#allocation5] sm:$0xf] %vm3193_vm9, %v611_v57  ;;  %v767_v10 = vpop.permute.xlu2 %766  ;;  %v1611_v44 = vpop.xlane.xlu1 %1610  ;;  %v1413_v62 = vsel %vm1410_vm12, %v1412_v36, %v1408_v16  ;;  %vm1356_vm15 = vcmp.eq.f32.partialorder %v1355_v54, 8.507059e+37  ;;  %v1358_v34 = vor.u32 1.1754944e-38, %v1357_v18  ;;  %vm1462_vm1 = vmor %vm1460_vm0, %vm1461_vm14 }
 0x2f7   :  { %v771_v6 = vperm.slane %v767_v10, %v3482_v29  ;;  %v1612_v28 = vadd.f32 %v3391_v15, %v1611_v44  ;;  %v1415_v0 = vadd.f32 1.0, %v1413_v62  ;;  %v1457_v60 = vsub.f32 1.0, %v1456_v19 }
 0x2f8   :  { %v1467_v59 = vor.u32 1.1754944e-38, %v1466_v23  ;;  %v1359_v37 = vsel %vm1356_vm15, %v1358_v34, %v1354_v11  ;;  %vm1465_vm3 = vcmp.eq.f32.partialorder %v1464_v4, 8.507059e+37  ;;  %v1518_v26 = vand.u32 2147483647, %v3493_v42 }
 0x2f9   :  { %v3522_v15 = vmul.f32 %v771_v6, %v730_v46  ;;  %v1613_v48 = vsub.f32 0.0, %v1612_v28  ;;  %1418 = vperm.xlu1 %2592, %v1415_v0   ;;  %v1458_v22 = vmul.f32 %v2666_v12, %v1457_v60  ;;  %v1361_v47 = vadd.f32 1.0, %v1359_v37 }
 0x2fa   :  { %v1520_v28 = vand.u32 2147483648, %v3493_v42  ;;  %vm1514_vm10 = vweird.f32 %v3493_v42  ;;  %vm1519_vm12 = vcmp.eq.f32.partialorder %v1518_v26, 8.507059e+37 }
 0x2fb   :  { %v2668_v57 = vpop.eup %2667  ;;  %v776_v31 = vadd.f32 %v775_v56, %v3522_v15  ;;  %v1614_v36 = vmul.f32 1.442695, %v1613_v48  ;;  %v1459_v16 = vadd.f32 %v2666_v12, %v1458_v22  ;;  %v663_v48 = vld [vmem:[#allocation5 + $0x8] sm:$0xf] }
 0x2fc   :  { %v2670_v19 = vpop.eup %2669  ;;  %v1562_v10 = vadd.f32 1.0, %v2668_v57  ;;  %v833_v56 = vld [vmem:[#allocation5 + $0x4] sm:$0xf]  ;;  %v1521_v57 = vor.u32 1.1754944e-38, %v1520_v28 }
 0x2fd   :  { %777 = vst.msk [vmem:[#allocation5 + $0x10] sm:$0xf] %vm3193_vm9, %v776_v31  ;;  %2671 = vpow2.f32 %v1614_v36  ;;  %v1463_v46 = vsel %vm1462_vm1, %v2666_v12, %v1459_v16  ;;  %v1510_v41 = vmul.f32 %v2670_v19, %v3493_v42  ;;  %vm1515_vm5 = vweird.f32 %v2670_v19  ;;  %v666_v31 = vld [vmem:[#allocation5] sm:$0xf] }
 0x2fe   :  { %2673 = vrcp.f32 %v1562_v10  ;;  %v823_v44 = vpop.permute.xlu2 %822  ;;  %v1468_v62 = vsel %vm1465_vm3, %v1467_v59, %v1463_v46  ;;  %vm1516_vm11 = vmor %vm1514_vm10, %vm1515_vm5  ;;  %v1574_v21 = vand.u32 2147483648, %v1562_v10  ;;  %vm1568_vm14 = vweird.f32 %v1562_v10 }
 0x2ff   :  { %v827_v54 = vperm.slane %v823_v44, %v3482_v29  ;;  %v1470_v18 = vadd.f32 1.0, %v1468_v62  ;;  %v1511_v6 = vsub.f32 1.0, %v1510_v41  ;;  %v1572_v44 = vand.u32 2147483647, %v1562_v10 }
 0x301   :  { %v3533_v0 = vmul.f32 %v827_v54, %v786_v58  ;;  %v655_v60 = vpop.permute.xlu0 %654  ;;  %1473 = vperm.xlu2 %2590, %v1470_v18   ;;  %1364 = vperm.xlu1 %2592, %v1361_v47   ;;  %v1512_v12 = vmul.f32 %v2670_v19, %v1511_v6  ;;  %v1575_v54 = vor.u32 1.1754944e-38, %v1574_v21  ;;  %vm1573_vm0 = vcmp.eq.f32.partialorder %v1572_v44, 8.507059e+37 }
 0x302   :  { %v659_v4 = vperm.slane %v655_v60, %v3482_v29 }
 0x303   :  { %v2672_v23 = vpop.eup %2671  ;;  %v834_v11 = vadd.f32 %v833_v56, %v3533_v0  ;;  %v1513_v22 = vadd.f32 %v2670_v19, %v1512_v12  ;;  %v719_v56 = vld [vmem:[#allocation5 + $0xc] sm:$0xf] }
 0x304   :  { %v2674_v50 = vpop.eup %2673  ;;  %v1616_v58 = vadd.f32 1.0, %v2672_v23  ;;  %v661_v34 = vmul.f32 %v659_v4, %v618_v24 }
 0x305   :  { %835 = vst.msk [vmem:[#allocation5 + $0x4] sm:$0xf] %vm3193_vm9, %v834_v11  ;;  %v1517_v36 = vsel %vm1516_vm11, %v2670_v19, %v1513_v22  ;;  %v1564_v16 = vmul.f32 %v2674_v50, %v1562_v10  ;;  %vm1569_vm13 = vweird.f32 %v2674_v50  ;;  %vm1720_vm11 = vcmask 261120  }
 0x306   :  { %2675 = vrcp.f32 %v1616_v58  ;;  %v664_v59 = vadd.f32 %v663_v48, %v661_v34  ;;  %v667_v37 = vadd.f32 %v666_v31, %v661_v34  ;;  %v1522_v46 = vsel %vm1519_vm12, %v1521_v57, %v1517_v36  ;;  %vm1570_vm15 = vmor %vm1568_vm14, %vm1569_vm13 }
 0x307   :  { %v1524_v41 = vadd.f32 1.0, %v1522_v46  ;;  %v1565_v42 = vsub.f32 1.0, %v1564_v16  ;;  %v1628_v4 = vand.u32 2147483648, %v1616_v58  ;;  %v1626_v10 = vand.u32 2147483647, %v1616_v58 }
 0x308   :  { %665 = vst.msk [vmem:[#allocation5 + $0x8] sm:$0xf] %vm3193_vm9, %v664_v59  ;;  %vm1622_vm3 = vweird.f32 %v1616_v58 }
 0x309   :  { %668 = vst.msk [vmem:[#allocation5] sm:$0xf] %vm3193_vm9, %v667_v37  ;;  %1527 = vperm.xlu0 %2591, %v1524_v41   ;;  %v1566_v24 = vmul.f32 %v2674_v50, %v1565_v42  ;;  %v1629_v31 = vor.u32 1.1754944e-38, %v1628_v4  ;;  %vm1627_vm10 = vcmp.eq.f32.partialorder %v1626_v10, 8.507059e+37 }
 0x30b   :  { %v1567_v19 = vadd.f32 %v2674_v50, %v1566_v24  ;;  %v931_v57 = vpop.permute.xlu2 %930 }
 0x30c   :  { %v2676_v62 = vpop.eup %2675 }
 0x30d   :  { %v1571_v18 = vsel %vm1570_vm15, %v2674_v50, %v1567_v19  ;;  %v1618_v47 = vmul.f32 %v2676_v62, %v1616_v58  ;;  %vm1623_vm1 = vweird.f32 %v2676_v62  ;;  %v887_v19 = vld [vmem:[#allocation5 + $0x4] sm:$0xf] }
 0x30e   :  { %v711_v6 = vpop.permute.xlu1 %710  ;;  %v1576_v28 = vsel %vm1573_vm0, %v1575_v54, %v1571_v18  ;;  %vm1624_vm5 = vmor %vm1622_vm3, %vm1623_vm1 }
 0x30f   :  { %v715_v60 = vperm.slane %v711_v6, %v3482_v29  ;;  %v1578_v12 = vadd.f32 1.0, %v1576_v28  ;;  %v1619_v26 = vsub.f32 1.0, %v1618_v47  ;;  %v884_v44 = vld [vmem:[#allocation5 + $0x8] sm:$0xf] }
 0x310   :  { %v722_v48 = vld [vmem:[#allocation5] sm:$0xf] }
 0x311   :  { %v717_v23 = vmul.f32 %v715_v60, %v674_v32  ;;  %1581 = vperm.xlu2 %2590, %v1578_v12   ;;  %v1620_v11 = vmul.f32 %v2676_v62, %v1619_v26  ;;  %v935_v32 = vperm.slane %v931_v57, %v3482_v29  ;;  %v992_v12 = vld [vmem:[#allocation5 + $0x10] sm:$0xf] }
 0x313   :  { %v720_v22 = vadd.f32 %v719_v56, %v717_v23  ;;  %v723_v50 = vadd.f32 %v722_v48, %v717_v23  ;;  %v1621_v34 = vadd.f32 %v2676_v62, %v1620_v11  ;;  %v937_v59 = vmul.f32 %v935_v32, %v894_v20 }
 0x315   :  { %721 = vst.msk [vmem:[#allocation5 + $0xc] sm:$0xf] %vm3193_vm9, %v720_v22  ;;  %v1625_v36 = vsel %vm1624_vm5, %v2676_v62, %v1621_v34 }
 0x316   :  { %724 = vst.msk [vmem:[#allocation5] sm:$0xf] %vm3193_vm9, %v723_v50  ;;  %v1630_v27 = vsel %vm1627_vm10, %v1629_v31, %v1625_v36 }
 0x317   :  { %v1632_v16 = vadd.f32 1.0, %v1630_v27 }
 0x319   :  { %1635 = vperm.xlu1 %2592, %v1632_v16  }
 0x31b   :  { %v877_v58 = vpop.permute.xlu1 %876 }
 0x31c   :  { %v938_v37 = vld [vmem:[#allocation5 + $0xc] sm:$0xf]  ;;  %v881_v46 = vperm.slane %v877_v58, %v3482_v29 }
 0x31d   :  { %v778_v41 = vld [vmem:[#allocation5] sm:$0xf]  ;;  %v939_v42 = vadd.f32 %v938_v37, %v937_v59 }
 0x31e   :  { %v779_v21 = vadd.f32 %v778_v41, %v3522_v15  ;;  %v883_v24 = vmul.f32 %v881_v46, %v840_v5 }
 0x31f   :  { %940 = vst.msk [vmem:[#allocation5 + $0xc] sm:$0xf] %vm3193_vm9, %v939_v42 }
 0x320   :  { %780 = vst.msk [vmem:[#allocation5] sm:$0xf] %vm3193_vm9, %v779_v21  ;;  %v885_v8 = vadd.f32 %v884_v44, %v883_v24  ;;  %v888_v20 = vadd.f32 %v887_v19, %v883_v24 }
 0x322   :  { %886 = vst.msk [vmem:[#allocation5 + $0x8] sm:$0xf] %vm3193_vm9, %v885_v8 }
 0x323   :  { %889 = vst.msk [vmem:[#allocation5 + $0x4] sm:$0xf] %vm3193_vm9, %v888_v20 }
 0x326   :  { %v1155_v60 = vld [vmem:[#allocation5 + $0xc] sm:$0xf] }
 0x327   :  { %v830_v15 = vld [vmem:[#allocation5] sm:$0xf] }
 0x328   :  { %v831_v61 = vadd.f32 %v830_v15, %v3533_v0 }
 0x32a   :  { %832 = vst.msk [vmem:[#allocation5] sm:$0xf] %vm3193_vm9, %v831_v61  ;;  %v941_v5 = vld [vmem:[#allocation5 + $0x4] sm:$0xf] }
 0x32b   :  { %v942_v62 = vadd.f32 %v941_v5, %v937_v59  ;;  %v1148_v54 = vpop.permute.xlu2 %1147  ;;  %v985_v18 = vpop.permute.xlu1 %984 }
 0x32c   :  { %v1152_v47 = vperm.slane %v1148_v54, %v3482_v29  ;;  %v989_v6 = vperm.slane %v985_v18, %v3482_v29 }
 0x32d   :  { %943 = vst.msk [vmem:[#allocation5 + $0x4] sm:$0xf] %vm3193_vm9, %v942_v62 }
 0x32e   :  { %v1154_v28 = vmul.f32 %v1152_v47, %v1111_v13  ;;  %v991_v0 = vmul.f32 %v989_v6, %v948_v35  ;;  %v1050_v35 = vld [vmem:[#allocation5 + $0x8] sm:$0xf]  ;;  %v1684_v6 = vld [vmem:[%s4348_s10 + $0xf0] sm:$0xff] }
 0x32f   :  { %1725 = vmatpush.msra.mxu2 %v1684_v6  ;;  %v1658_v6 = vld [vmem:[%s4348_s10 + $0x20] sm:$0xff] }
 0x330   :  { %v1156_v26 = vadd.f32 %v1155_v60, %v1154_v28  ;;  %v993_v56 = vadd.f32 %v992_v12, %v991_v0  ;;  %v1682_v60 = vld [vmem:[%s4348_s10 + $0xe0] sm:$0xff] }
 0x331   :  { %v1047_v25 = vld [vmem:[#allocation5] sm:$0xf]  ;;  %1726 = vmatpush.msra.mxu2 %v1682_v60  ;;  %v1656_v60 = vld [vmem:[%s4348_s10 + $0x10] sm:$0xff] }
 0x332   :  { %1157 = vst.msk [vmem:[#allocation5 + $0xc] sm:$0xf] %vm3193_vm9, %v1156_v26  ;;  %v1679_v26 = vld [vmem:[%s4348_s10 + $0xc8] sm:$0xff] }
 0x333   :  { %994 = vst.msk [vmem:[#allocation5 + $0x10] sm:$0xf] %vm3193_vm9, %v993_v56  ;;  %v1040_v4 = vpop.permute.xlu0 %1039  ;;  %1727 = vmatpush.msra.mxu2 %v1680_v30  ;;  %v2466_v30 = vld [vmem:[%s4350_s12 + $0x90] sm:$0xff] }
 0x334   :  { %v995_v23 = vld [vmem:[#allocation5 + $0x4] sm:$0xf]  ;;  %v1044_v11 = vperm.slane %v1040_v4, %v3482_v29 }
 0x335   :  { %v996_v10 = vadd.f32 %v995_v23, %v991_v0  ;;  %v1678_v4 = vld [vmem:[%s4348_s10 + $0xc0] sm:$0xff]  ;;  %v1675_v23 = vld [vmem:[%s4348_s10 + $0xa8] sm:$0xff] }
 0x336   :  { %v1046_v2 = vmul.f32 %v1044_v11, %v1003_v49  ;;  %v1676_v11 = vld [vmem:[%s4348_s10 + $0xb0] sm:$0xff]  ;;  %1728 = vmatpush.msra.mxu2 %v1678_v4  ;;  %v2465_v4 = vld [vmem:[%s4350_s12 + $0x88] sm:$0xff] }
 0x337   :  { %997 = vst.msk [vmem:[#allocation5 + $0x4] sm:$0xf] %vm3193_vm9, %v996_v10 }
 0x338   :  { %v1048_v13 = vadd.f32 %v1047_v25, %v1046_v2  ;;  %v1051_v48 = vadd.f32 %v1050_v35, %v1046_v2  ;;  %1729 = vmatpush.msra.mxu2 %v1676_v11  ;;  %v1673_v25 = vld [vmem:[%s4348_s10 + $0x98] sm:$0xff]  ;;  %v4374_v35 = vmax.f32 %v3362_v7, 0.0  ;;  %v1672_v7 = vld [vmem:[%s4348_s10 + $0x90] sm:$0xff] }
 0x339   :  { %v1267_v36 = vld [vmem:[#allocation5 + $0xc] sm:$0xf] }
 0x33a   :  { %1049 = vst.msk [vmem:[#allocation5] sm:$0xf] %vm3193_vm9, %v1048_v13  ;;  %v1209_v41 = vld [vmem:[#allocation5 + $0x10] sm:$0xf] }
 0x33b   :  { %1052 = vst.msk [vmem:[#allocation5 + $0x8] sm:$0xf] %vm3193_vm9, %v1051_v48  ;;  %v1094_v22 = vpop.permute.xlu0 %1093  ;;  %v1257_v50 = vpop.permute.xlu2 %1256  ;;  %v1674_v48 = vld [vmem:[%s4348_s10 + $0xa0] sm:$0xff] }
 0x33c   :  { %v1098_v34 = vperm.slane %v1094_v22, %v3482_v29  ;;  %v1261_v39 = vperm.slane %v1257_v50, %v3482_v29  ;;  %1730 = vmatpush.msra.mxu2 %v1674_v48 }
 0x33e   :  { %v1100_v49 = vmul.f32 %v1098_v34, %v1057_v63  ;;  %v1263_v57 = vmul.f32 %v1261_v39, %v1220_v51  ;;  %v1101_v31 = vld [vmem:[#allocation5 + $0x4] sm:$0xf]  ;;  %v1671_v34 = vld [vmem:[%s4348_s10 + $0x88] sm:$0xff]  ;;  %1731 = vmatpush.msra.mxu2 %v1672_v7 }
 0x340   :  { %v1102_v27 = vadd.f32 %v1101_v31, %v1100_v49  ;;  %v1268_v32 = vadd.f32 %v1267_v36, %v1263_v57  ;;  %v1669_v36 = vld [vmem:[%s4348_s10 + $0x78] sm:$0xff] }
 0x341   :  { %v1264_v16 = vld [vmem:[#allocation5] sm:$0xf] }
 0x342   :  { %1103 = vst.msk [vmem:[#allocation5 + $0x4] sm:$0xf] %vm3193_vm9, %v1102_v27  ;;  %v1104_v59 = vld [vmem:[#allocation5 + $0x8] sm:$0xf]  ;;  %v1265_v58 = vadd.f32 %v1264_v16, %v1263_v57 }
 0x343   :  { %v1105_v37 = vadd.f32 %v1104_v59, %v1100_v49  ;;  %1269 = vst.msk [vmem:[#allocation5 + $0xc] sm:$0xf] %vm3193_vm9, %v1268_v32  ;;  %v1670_v32 = vld [vmem:[%s4348_s10 + $0x80] sm:$0xff]  ;;  %v1667_v59 = vld [vmem:[%s4348_s10 + $0x68] sm:$0xff] }
 0x344   :  { %1266 = vst.msk [vmem:[#allocation5] sm:$0xf] %vm3193_vm9, %v1265_v58  ;;  %1732 = vmatpush.msra.mxu2 %v1670_v32  ;;  %v1668_v58 = vld [vmem:[%s4348_s10 + $0x70] sm:$0xff] }
 0x345   :  { %1106 = vst.msk [vmem:[#allocation5 + $0x8] sm:$0xf] %vm3193_vm9, %v1105_v37  ;;  %v1692_v37 = vld [vmem:[%s4348_s10 + $0x130] sm:$0xff] }
 0x346   :  { %1760 = vmatpush.msrb.mxu1 %v1692_v37  ;;  %1733 = vmatpush.msra.mxu2 %v1668_v58  ;;  %v1854_v58 = vld [vmem:[%s4350_s12 + $0x40] sm:$0xff]  ;;  %v1853_v37 = vld [vmem:[%s4350_s12 + $0x38] sm:$0xff] }
 0x349   :  { %v1318_v15 = vld [vmem:[#allocation5 + $0x4] sm:$0xf] }
 0x34a   :  { %v1321_v61 = vld [vmem:[#allocation5 + $0xc] sm:$0xf] }
 0x34b   :  { %v1202_v53 = vpop.permute.xlu1 %1201  ;;  %v1481_v5 = vld [vmem:[#allocation5] sm:$0xf] }
 0x34c   :  { %v1158_v63 = vld [vmem:[#allocation5 + $0x8] sm:$0xf]  ;;  %v1206_v38 = vperm.slane %v1202_v53, %v3482_v29 }
 0x34d   :  { %v1159_v51 = vadd.f32 %v1158_v63, %v1154_v28  ;;  %v1681_v28 = vld [vmem:[%s4348_s10 + $0xd8] sm:$0xff] }
 0x34e   :  { %v1208_v46 = vmul.f32 %v1206_v38, %v1165_v33  ;;  %v1665_v38 = vld [vmem:[%s4348_s10 + $0x58] sm:$0xff] }
 0x34f   :  { %1160 = vst.msk [vmem:[#allocation5 + $0x8] sm:$0xf] %vm3193_vm9, %v1159_v51  ;;  %v1666_v51 = vld [vmem:[%s4348_s10 + $0x60] sm:$0xff] }
 0x350   :  { %v1210_v42 = vadd.f32 %v1209_v41, %v1208_v46  ;;  %v1690_v41 = vld [vmem:[%s4348_s10 + $0x120] sm:$0xff]  ;;  %1734 = vmatpush.msra.mxu2 %v1666_v51 }
 0x351   :  { %1761 = vmatpush.msrb.mxu1 %v1690_v41  ;;  %v1849_v41 = vld [vmem:[%s4350_s12 + $0x18] sm:$0xff] }
 0x352   :  { %1211 = vst.msk [vmem:[#allocation5 + $0x10] sm:$0xf] %vm3193_vm9, %v1210_v42  ;;  %v4375_v42 = vmax.f32 %v3389_v9, 0.0  ;;  %v1686_v9 = vld [vmem:[%s4348_s10 + $0x100] sm:$0xff] }
 0x356   :  { %v1212_v21 = vld [vmem:[#allocation5 + $0x8] sm:$0xf] }
 0x357   :  { %v1213_v24 = vadd.f32 %v1212_v21, %v1208_v46  ;;  %v1663_v46 = vld [vmem:[%s4348_s10 + $0x48] sm:$0xff] }
 0x359   :  { %1214 = vst.msk [vmem:[#allocation5 + $0x8] sm:$0xf] %vm3193_vm9, %v1213_v24  ;;  %v1426_v12 = vld [vmem:[#allocation5 + $0x10] sm:$0xf]  ;;  %v1664_v24 = vld [vmem:[%s4348_s10 + $0x50] sm:$0xff] }
 0x35a   :  { %1735 = vmatpush.msra.mxu2 %v1664_v24  ;;  %v1948_v24 = vld [vmem:[#allocation2 + $0x2] sm:$0x3] }
 0x35b   :  { %v1311_v44 = vpop.permute.xlu0 %1310  ;;  %v1474_v19 = vpop.permute.xlu2 %1473 }
 0x35c   :  { %v1315_v8 = vperm.slane %v1311_v44, %v3482_v29  ;;  %v1478_v17 = vperm.slane %v1474_v19, %v3482_v29  ;;  %v1688_v44 = vld [vmem:[%s4348_s10 + $0x110] sm:$0xff] }
 0x35d   :  { %1762 = vmatpush.msrb.mxu1 %v1688_v44  ;;  %v1846_v44 = vld [vmem:[%s4350_s12] sm:$0xff] }
 0x35e   :  { %v1317_v33 = vmul.f32 %v1315_v8, %v1274_v3  ;;  %v1480_v20 = vmul.f32 %v1478_v17, %v1437_v1  ;;  %v1683_v1 = vld [vmem:[%s4348_s10 + $0xe8] sm:$0xff]  ;;  %v1661_v8 = vld [vmem:[%s4348_s10 + $0x38] sm:$0xff]  ;;  %v4376_v17 = vmax.f32 %v3401_v43, 0.0 }
 0x35f   :  { %1772 = vmatpush.msra.mxu3 %v1683_v1  ;;  %1763 = vmatpush.msrb.mxu1 %v1686_v9  ;;  %v1657_v1 = vld [vmem:[%s4348_s10 + $0x18] sm:$0xff] }
 0x360   :  { %v1319_v62 = vadd.f32 %v1318_v15, %v1317_v33  ;;  %v1322_v54 = vadd.f32 %v1321_v61, %v1317_v33  ;;  %v1482_v18 = vadd.f32 %v1481_v5, %v1480_v20  ;;  %v1372_v22 = vld [vmem:[#allocation5 + $0x8] sm:$0xf]  ;;  %v1693_v61 = vld [vmem:[%s4348_s10 + $0x138] sm:$0xff] }
 0x361   :  { %1773 = vmatpush.msra.mxu3 %v1681_v28  ;;  %v1662_v15 = vld [vmem:[%s4348_s10 + $0x40] sm:$0xff]  ;;  %1806 = vmatpush.msra.mxu1 %v1693_v61  ;;  %v1689_v28 = vld [vmem:[%s4348_s10 + $0x118] sm:$0xff]  ;;  %v1845_v61 = vld [vmem:[#allocation2] sm:$0x3] }
 0x362   :  { %1320 = vst.msk [vmem:[#allocation5 + $0x4] sm:$0xf] %vm3193_vm9, %v1319_v62  ;;  %v1659_v62 = vld [vmem:[%s4348_s10 + $0x28] sm:$0xff]  ;;  %1736 = vmatpush.msra.mxu2 %v1662_v15  ;;  %v2497_v9 = vld [vmem:[%s4350_s12 + $0xd8] sm:$0xff] }
 0x363   :  { %1323 = vst.msk [vmem:[#allocation5 + $0xc] sm:$0xf] %vm3193_vm9, %v1322_v54  ;;  %1774 = vmatpush.msra.mxu3 %v1679_v26  ;;  %1807 = vmatpush.msra.mxu1 %v1691_v55  ;;  %v1687_v26 = vld [vmem:[%s4348_s10 + $0x108] sm:$0xff]  ;;  %v2493_v15 = vld [vmem:[%s4350_s12 + $0xb8] sm:$0xff] }
 0x364   :  { %1483 = vst.msk [vmem:[#allocation5] sm:$0xf] %vm3193_vm9, %v1482_v18  ;;  %v1660_v18 = vld [vmem:[%s4348_s10 + $0x30] sm:$0xff]  ;;  %v1876_v55 = vld [vmem:[%s4351_s13 + $0x98] sm:$0xff] }
 0x365   :  { %1737 = vmatpush.msra.mxu2 %v1660_v18  ;;  %1808 = vmatpush.msra.mxu1 %v1689_v28  ;;  %v1872_v18 = vld [vmem:[%s4351_s13 + $0x78] sm:$0xff]  ;;  %v1873_v28 = vld [vmem:[%s4351_s13 + $0x80] sm:$0xff] }
 0x366   :  { %1884 = vmatpush.msrb.mxu0 %v1872_v18  ;;  %v2544_v18 = vld [vmem:[%s4351_s13 + $0x238] sm:$0xff] }
 0x367   :  { %1738 = vmatpush.msra.mxu2 %v1658_v6  ;;  %1809 = vmatpush.msra.mxu1 %v1687_v26  ;;  %v1869_v6 = vld [vmem:[%s4351_s13 + $0x60] sm:$0xff]  ;;  %v1867_v26 = vld [vmem:[%s4351_s13 + $0x50] sm:$0xff] }
 0x369   :  { %v1535_v19 = vld [vmem:[#allocation5 + $0x4] sm:$0xf]  ;;  %1739 = vmatpush.msra.mxu2 %v1656_v60 }
 0x36a   :  { %v1375_v50 = vld [vmem:[#allocation5 + $0xc] sm:$0xf]  ;;  %v1868_v60 = vld [vmem:[%s4351_s13 + $0x58] sm:$0xff] }
 0x36b   :  { %v1649_v3 = vld [vmem:[#allocation5] sm:$0xf]  ;;  %v1419_v52 = vpop.permute.xlu1 %1418  ;;  %v1582_v57 = vpop.permute.xlu2 %1581 }
 0x36c   :  { %1705 = vst [vmem:[#allocation1] ss:$4 sm:$0xff] %v1649_v3  ;;  %v1423_v47 = vperm.slane %v1419_v52, %v3482_v29  ;;  %v1586_v53 = vperm.slane %v1582_v57, %v3482_v29 }
 0x36e   :  { %v3643_v0 = vmul.f32 %v1423_v47, %v1382_v45  ;;  %v1677_v45 = vld [vmem:[%s4348_s10 + $0xb8] sm:$0xff]  ;;  %v1588_v33 = vmul.f32 %v1586_v53, %v4376_v17  ;;  %v1852_v53 = vld [vmem:[%s4350_s12 + $0x30] sm:$0xff] }
 0x36f   :  { %1775 = vmatpush.msra.mxu3 %v1677_v45  ;;  %v2496_v17 = vld [vmem:[%s4350_s12 + $0xd0] sm:$0xff] }
 0x370   :  { %v1427_v56 = vadd.f32 %v1426_v12, %v3643_v0  ;;  %v2467_v12 = vld [vmem:[%s4350_s12 + $0x98] sm:$0xff] }
 0x371   :  { %1776 = vmatpush.msra.mxu3 %v1675_v23 }
 0x372   :  { %1428 = vst.msk [vmem:[#allocation5 + $0x10] sm:$0xf] %vm3193_vm9, %v1427_v56  ;;  %v1654_v56 = vld [vmem:[%s4348_s10] sm:$0xff] }
 0x373   :  { %v1365_v10 = vpop.permute.xlu1 %1364  ;;  %1777 = vmatpush.msra.mxu3 %v1673_v25  ;;  %1740 = vmatpush.msra.mxu2 %v1654_v56  ;;  %v2482_v56 = vld [vmem:[%s4351_s13 + $0x108] sm:$0xff] }
 0x374   :  { %v1369_v2 = vperm.slane %v1365_v10, %v3482_v29 }
 0x375   :  { %1778 = vmatpush.msra.mxu3 %v1671_v34  ;;  %v2462_v34 = vld [vmem:[%s4350_s12 + $0x70] sm:$0xff]  ;;  %1916 = vmatpush.msrb.mxu2 %v1876_v55 }
 0x376   :  { %v1371_v13 = vmul.f32 %v1369_v2, %v4374_v35  ;;  %v2464_v2 = vld [vmem:[%s4350_s12 + $0x80] sm:$0xff] }
 0x377   :  { %1779 = vmatpush.msra.mxu3 %v1669_v36 }
 0x378   :  { %v1373_v39 = vadd.f32 %v1372_v22, %v1371_v13  ;;  %v1376_v49 = vadd.f32 %v1375_v50, %v1371_v13  ;;  %v4377_v13 = vmax.f32 %v3411_v14, 0.0  ;;  %v2463_v22 = vld [vmem:[%s4350_s12 + $0x78] sm:$0xff]  ;;  %v2461_v14 = vld [vmem:[%s4350_s12 + $0x68] sm:$0xff] }
 0x379   :  { %v1484_v31 = vld [vmem:[#allocation5 + $0x10] sm:$0xf]  ;;  %1780 = vmatpush.msra.mxu3 %v1667_v59 }
 0x37a   :  { %v1485_v27 = vadd.f32 %v1484_v31, %v1480_v20  ;;  %1374 = vst.msk [vmem:[#allocation5 + $0x8] sm:$0xf] %vm3193_vm9, %v1373_v39  ;;  %v2460_v39 = vld [vmem:[%s4350_s12 + $0x60] sm:$0xff]  ;;  %v2458_v31 = vld [vmem:[%s4350_s12 + $0x50] sm:$0xff] }
 0x37b   :  { %1377 = vst.msk [vmem:[#allocation5 + $0xc] sm:$0xf] %vm3193_vm9, %v1376_v49  ;;  %v1528_v16 = vpop.permute.xlu0 %1527  ;;  %1781 = vmatpush.msra.mxu3 %v1665_v38  ;;  %v2459_v49 = vld [vmem:[%s4350_s12 + $0x58] sm:$0xff] }
 0x37c   :  { %1486 = vst.msk [vmem:[#allocation5 + $0x10] sm:$0xf] %vm3193_vm9, %v1485_v27  ;;  %v1532_v63 = vperm.slane %v1528_v16, %v3482_v29  ;;  %v1855_v27 = vld [vmem:[%s4350_s12 + $0x48] sm:$0xff] }
 0x37d   :  { %1782 = vmatpush.msra.mxu3 %v1663_v46  ;;  %v1850_v46 = vld [vmem:[%s4350_s12 + $0x20] sm:$0xff] }
 0x37e   :  { %v1534_v21 = vmul.f32 %v1532_v63, %v4375_v42  ;;  %v1851_v63 = vld [vmem:[%s4350_s12 + $0x28] sm:$0xff]  ;;  %v1848_v42 = vld [vmem:[%s4350_s12 + $0x10] sm:$0xff] }
 0x37f   :  { %1783 = vmatpush.msra.mxu3 %v1661_v8  ;;  %v2498_v8 = vld [vmem:[%s4350_s12 + $0xe0] sm:$0xff] }
 0x380   :  { %v1536_v20 = vadd.f32 %v1535_v19, %v1534_v21  ;;  %v2499_v19 = vld [vmem:[%s4350_s12 + $0xe8] sm:$0xff] }
 0x381   :  { %v1589_v5 = vld [vmem:[#allocation5 + $0x8] sm:$0xf]  ;;  %1784 = vmatpush.msra.mxu3 %v1659_v62  ;;  %v2491_v62 = vld [vmem:[%s4350_s12 + $0xa8] sm:$0xff] }
 0x382   :  { %v1429_v54 = vld [vmem:[#allocation5 + $0xc] sm:$0xf]  ;;  %v1590_v43 = vadd.f32 %v1589_v5, %v1588_v33  ;;  %1537 = vst.msk [vmem:[#allocation5 + $0x4] sm:$0xf] %vm3193_vm9, %v1536_v20  ;;  %v2492_v5 = vld [vmem:[%s4350_s12 + $0xb0] sm:$0xff] }
 0x383   :  { %v1430_v3 = vadd.f32 %v1429_v54, %v3643_v0  ;;  %v1538_v52 = vld [vmem:[#allocation5 + $0x10] sm:$0xf]  ;;  %1785 = vmatpush.msra.mxu3 %v1657_v1  ;;  %v2494_v20 = vld [vmem:[%s4350_s12 + $0xc0] sm:$0xff] }
 0x384   :  { %1591 = vst.msk [vmem:[#allocation5 + $0x8] sm:$0xf] %vm3193_vm9, %v1590_v43  ;;  %v1539_v47 = vadd.f32 %v1538_v52, %v1534_v21  ;;  %v1655_v0 = vld [vmem:[%s4348_s10 + $0x8] sm:$0xff]  ;;  %v2490_v54 = vld [vmem:[%s4350_s12 + $0xa0] sm:$0xff]  ;;  %v1875_v52 = vld [vmem:[%s4351_s13 + $0x90] sm:$0xff] }
 0x385   :  { %1431 = vst.msk [vmem:[#allocation5 + $0xc] sm:$0xf] %vm3193_vm9, %v1430_v3  ;;  %1786 = vmatpush.msra.mxu3 %v1655_v0  ;;  %v1847_v21 = vld [vmem:[%s4350_s12 + $0x8] sm:$0xff]  ;;  %v1871_v3 = vld [vmem:[%s4351_s13 + $0x70] sm:$0xff]  ;;  %1917 = vmatpush.msrb.mxu2 %v1875_v52  ;;  %v2484_v0 = vld [vmem:[%s4351_s13 + $0x118] sm:$0xff] }
 0x386   :  { %1540 = vst.msk [vmem:[#allocation5 + $0x10] sm:$0xf] %vm3193_vm9, %v1539_v47  ;;  %v2055_v43 = vld [vmem:[#allocation2 + $0x4] sm:$0x3]  ;;  %1885 = vmatpush.msrb.mxu0 %v1871_v3  ;;  %v2507_v52 = vld [vmem:[%s4351_s13 + $0x170] sm:$0xff] }
 0x387   :  { %1969 = vmatpush.msrb.mxu3 %v2467_v12  ;;  %v1870_v1 = vld [vmem:[%s4351_s13 + $0x68] sm:$0xff]  ;;  %v2483_v12 = vld [vmem:[%s4351_s13 + $0x110] sm:$0xff] }
 0x388   :  { %v1874_v47 = vld [vmem:[%s4351_s13 + $0x88] sm:$0xff]  ;;  %1886 = vmatpush.msrb.mxu0 %v1870_v1 }
 0x389   :  { %v1650_v45 = vld [vmem:[#allocation5 + $0x4] sm:$0xf]  ;;  %1970 = vmatpush.msrb.mxu3 %v2466_v30  ;;  %1918 = vmatpush.msrb.mxu2 %v1874_v47  ;;  %v1866_v30 = vld [vmem:[%s4351_s13 + $0x48] sm:$0xff]  ;;  %v2543_v47 = vld [vmem:[%s4351_s13 + $0x230] sm:$0xff] }
 0x38a   :  { %1707 = vst [vmem:[#allocation1 + $0x1] ss:$4 sm:$0xff] %v1650_v45  ;;  %1887 = vmatpush.msrb.mxu0 %v1869_v6  ;;  %v2481_v45 = vld [vmem:[%s4351_s13 + $0x100] sm:$0xff] }
 0x38b   :  { %v1651_v23 = vld [vmem:[#allocation5 + $0x8] sm:$0xf]  ;;  %v1636_v11 = vpop.permute.xlu1 %1635  ;;  %1971 = vmatpush.msrb.mxu3 %v2465_v4  ;;  %1919 = vmatpush.msrb.mxu2 %v1873_v28 }
 0x38c   :  { %1709 = vst [vmem:[#allocation1 + $0x2] ss:$4 sm:$0xff] %v1651_v23  ;;  %v1640_v10 = vperm.slane %v1636_v11, %v3482_v29  ;;  %v1643_v50 = vld [vmem:[#allocation5 + $0xc] sm:$0xf]  ;;  %1888 = vmatpush.msrb.mxu0 %v1868_v60  ;;  %v2480_v23 = vld [vmem:[%s4351_s13 + $0xf8] sm:$0xff] }
 0x38d   :  { %v1592_v25 = vld [vmem:[#allocation5 + $0x10] sm:$0xf]  ;;  %1972 = vmatpush.msrb.mxu3 %v2464_v2  ;;  %v1865_v4 = vld [vmem:[%s4351_s13 + $0x40] sm:$0xff]  ;;  %v1864_v11 = vld [vmem:[%s4351_s13 + $0x38] sm:$0xff] }
 0x38e   :  { %v1593_v35 = vadd.f32 %v1592_v25, %v1588_v33  ;;  %v1642_v48 = vmul.f32 %v1640_v10, %v4377_v13  ;;  %v2495_v33 = vld [vmem:[%s4350_s12 + $0xc8] sm:$0xff]  ;;  %1889 = vmatpush.msrb.mxu0 %v1867_v26  ;;  %v2479_v10 = vld [vmem:[%s4351_s13 + $0xf0] sm:$0xff] }
 0x38f   :  { %1973 = vmatpush.msrb.mxu3 %v2463_v22  ;;  %v1863_v2 = vld [vmem:[%s4351_s13 + $0x30] sm:$0xff]  ;;  %v2478_v25 = vld [vmem:[%s4351_s13 + $0xe8] sm:$0xff]  ;;  %v1861_v22 = vld [vmem:[%s4351_s13 + $0x20] sm:$0xff] }
 0x390   :  { %1594 = vst.msk [vmem:[#allocation5 + $0x10] sm:$0xf] %vm3193_vm9, %v1593_v35  ;;  %v1644_v29 = vadd.f32 %v1643_v50, %v1642_v48  ;;  %1890 = vmatpush.msrb.mxu0 %v1866_v30  ;;  %v1862_v35 = vld [vmem:[%s4351_s13 + $0x28] sm:$0xff]  ;;  %v2516_v50 = vld [vmem:[%s4351_s13 + $0x1b8] sm:$0xff]  ;;  %v2505_v30 = vld [vmem:[%s4351_s13 + $0x160] sm:$0xff] }
 0x391   :  { %1974 = vmatpush.msrb.mxu3 %v2462_v34  ;;  %v1860_v34 = vld [vmem:[%s4351_s13 + $0x18] sm:$0xff]  ;;  %v2542_v60 = vld [vmem:[%s4351_s13 + $0x228] sm:$0xff] }
 0x392   :  { %1645 = vst.msk [vmem:[#allocation5 + $0xc] sm:$0xf] %vm3193_vm9, %v1644_v29  ;;  %1891 = vmatpush.msrb.mxu0 %v1865_v4  ;;  %v2476_v29 = vld [vmem:[%s4351_s13 + $0xd8] sm:$0xff]  ;;  %v2541_v4 = vld [vmem:[%s4351_s13 + $0x220] sm:$0xff] }
 0x393   :  { %1975 = vmatpush.msrb.mxu3 %v2461_v14  ;;  %v2515_v14 = vld [vmem:[%s4351_s13 + $0x1b0] sm:$0xff] }
 0x394   :  { %1892 = vmatpush.msrb.mxu0 %v1864_v11 }
 0x395   :  { %1976 = vmatpush.msrb.mxu3 %v2460_v39  ;;  %v2475_v39 = vld [vmem:[%s4351_s13 + $0xd0] sm:$0xff] }
 0x396   :  { %1893 = vmatpush.msrb.mxu0 %v1863_v2 }
 0x397   :  { %v1646_v7 = vld [vmem:[#allocation5 + $0x10] sm:$0xf]  ;;  %1977 = vmatpush.msrb.mxu3 %v2459_v49  ;;  %v1859_v49 = vld [vmem:[%s4351_s13 + $0x10] sm:$0xff] }
 0x398   :  { %v1647_v57 = vadd.f32 %v1646_v7, %v1642_v48  ;;  %1894 = vmatpush.msrb.mxu0 %v1862_v35  ;;  %v2477_v48 = vld [vmem:[%s4351_s13 + $0xe0] sm:$0xff]  ;;  %v2514_v7 = vld [vmem:[%s4351_s13 + $0x1a8] sm:$0xff] }
 0x399   :  { %v1652_v36 = vld [vmem:[#allocation5 + $0xc] sm:$0xf]  ;;  %1978 = vmatpush.msrb.mxu3 %v2458_v31 }
 0x39a   :  { %1648 = vst.msk [vmem:[#allocation5 + $0x10] sm:$0xf] %vm3193_vm9, %v1647_v57  ;;  %1895 = vmatpush.msrb.mxu0 %v1861_v22  ;;  %v3984_v57 = vld [vmem:[%s4349_s11] sm:$0x3]  ;;  %v2474_v31 = vld [vmem:[%s4351_s13 + $0xc8] sm:$0xff] }
 0x39b   :  { %1711 = vst [vmem:[#allocation1 + $0x3] ss:$4 sm:$0xff] %v1652_v36  ;;  %v1858_v36 = vld [vmem:[%s4351_s13 + $0x8] sm:$0xff] }
 0x39c   :  { %1896 = vmatpush.msrb.mxu0 %v1860_v34 }
 0x39e   :  { %1897 = vmatpush.msrb.mxu0 %v1859_v49 }
 0x3a0   :  { %1898 = vmatpush.msrb.mxu0 %v1858_v36 }
 0x3a1   :  { %v1653_v32 = vld [vmem:[#allocation5 + $0x10] sm:$0xf] }
 0x3a2   :  { %v1714_v16 = vld.sshfl [vmem:[#allocation1] sm:$0xff pattern:$0x73625140]  ;;  %v1715_v59 = vld.sshfl [vmem:[#allocation1 + $0x8] sm:$0xff pattern:$0x73625140] }
 0x3a3   :  { %1741 = vmatmul.f32.vlgmr.msra.gmra.mxu2 %v1714_v16  ;;  %2452 = vmatmul.msk.f32.vlgmr.msrb.gmra.mxu1 %vm1720_vm11, %v1715_v59  ;;  %1713 = vst [vmem:[#allocation1 + $0x20] ss:$4 sm:$0xff] %v1653_v32 }
 0x3a4   :  { %1787 = vmatmul.f32.vlgmr.msra.gmra.mxu3 %v1714_v16  ;;  %1933 = vmatpush.msrb.mxu1 %v1855_v27  ;;  %v2513_v27 = vld [vmem:[%s4351_s13 + $0x1a0] sm:$0xff] }
 0x3a5   :  { %2013 = vmatpush.msra.mxu2 %v2484_v0  ;;  %2120 = vmatpush.msra.mxu3 %v2516_v50  ;;  %v2506_v0 = vld [vmem:[%s4351_s13 + $0x168] sm:$0xff]  ;;  %v2540_v50 = vld [vmem:[%s4351_s13 + $0x218] sm:$0xff] }
 0x3a6   :  { %1934 = vmatpush.msrb.mxu1 %v1854_v58  ;;  %v1857_v58 = vld [vmem:[%s4351_s13] sm:$0xff] }
 0x3a7   :  { %2014 = vmatpush.msra.mxu2 %v2483_v12  ;;  %2121 = vmatpush.msra.mxu3 %v2515_v14  ;;  %v2503_v14 = vld [vmem:[%s4351_s13 + $0x150] sm:$0xff] }
 0x3a8   :  { %1935 = vmatpush.msrb.mxu1 %v1853_v37  ;;  %v2512_v37 = vld [vmem:[%s4351_s13 + $0x198] sm:$0xff]  ;;  %1899 = vmatpush.msrb.mxu0 %v1857_v58 }
 0x3a9   :  { %2015 = vmatpush.msra.mxu2 %v2482_v56  ;;  %2122 = vmatpush.msra.mxu3 %v2514_v7  ;;  %v2502_v7 = vld [vmem:[%s4351_s13 + $0x148] sm:$0xff]  ;;  %v2536_v58 = vld [vmem:[%s4351_s13 + $0x1f8] sm:$0xff] }
 0x3aa   :  { %v1716_v38 = vld.sshfl [vmem:[#allocation1 + $0x20] sm:$0xff pattern:$0x73625140]  ;;  %v1717_v51 = vld.sshfl [vmem:[#allocation1 + $0x28] sm:$0xff pattern:$0x73625140]  ;;  %1936 = vmatpush.msrb.mxu1 %v1852_v53 }
 0x3ab   :  { %1744 = vmatmul.f32.gmra.mxu2 %v1716_v38  ;;  %2453 = vmatmul.msk.f32.gmra.mxu1 %vm1720_vm11, %v1717_v51  ;;  %v1696_v53 = vperm.slane %v3984_v57, 0 }
 0x3ac   :  { %1790 = vmatmul.f32.gmra.mxu3 %v1716_v38  ;;  %1937 = vmatpush.msrb.mxu1 %v1851_v63  ;;  %v2548_v38 = vld [vmem:[%s4351_s13 + $0x258] sm:$0xff] }
 0x3ad   :  { %2016 = vmatpush.msra.mxu2 %v2481_v45  ;;  %2123 = vmatpush.msra.mxu3 %v2513_v27  ;;  %v2501_v27 = vld [vmem:[%s4351_s13 + $0x140] sm:$0xff] }
 0x3ae   :  { %1938 = vmatpush.msrb.mxu1 %v1850_v46  ;;  %v2488_v46 = vld [vmem:[%s4351_s13 + $0x138] sm:$0xff] }
 0x3af   :  { %2017 = vmatpush.msra.mxu2 %v2480_v23  ;;  %2124 = vmatpush.msra.mxu3 %v2512_v37  ;;  %v2584_v37 = vld [vmem:[%s4351_s13 + $0x318] sm:$0xff] }
 0x3b0   :  { %1939 = vmatpush.msrb.mxu1 %v1849_v41  ;;  %v2511_v41 = vld [vmem:[%s4351_s13 + $0x190] sm:$0xff]  ;;  %2045 = vmatpush.msra.mxu0 %v2488_v46  ;;  %v2552_v46 = vld [vmem:[%s4351_s13 + $0x278] sm:$0xff] }
 0x3b1   :  { %2018 = vmatpush.msra.mxu2 %v2479_v10  ;;  %2125 = vmatpush.msra.mxu3 %v2511_v41  ;;  %v2533_v41 = vld [vmem:[%s4351_s13 + $0x1e0] sm:$0xff] }
 0x3b2   :  { %1940 = vmatpush.msrb.mxu1 %v1848_v42  ;;  %v2547_v42 = vld [vmem:[%s4351_s13 + $0x250] sm:$0xff] }
 0x3b3   :  { %2454 = vmatmul.msk.f32.vlgmr.msra.gmra.mxu1 %vm1720_vm11, %v1715_v59  ;;  %2019 = vmatpush.msra.mxu2 %v2478_v25  ;;  %v2473_v59 = vld [vmem:[%s4351_s13 + $0xc0] sm:$0xff]  ;;  %v2504_v25 = vld [vmem:[%s4351_s13 + $0x158] sm:$0xff] }
 0x3b4   :  { %2468 = vmatmul.msk.f32.vlgmr.msrb.gmra.mxu3 %vm361_vm2, %v1948_v24  ;;  %1941 = vmatpush.msrb.mxu1 %v1847_v21  ;;  %v2471_v21 = vld [vmem:[%s4351_s13 + $0xb0] sm:$0xff]  ;;  %v1697_v24 = vperm.slane %v3984_v57, 1  ;;  %v2538_v57 = vld [vmem:[%s4351_s13 + $0x208] sm:$0xff] }
 0x3b5   :  { %2020 = vmatpush.msra.mxu2 %v2477_v48 }
 0x3b6   :  { %1942 = vmatpush.msrb.mxu1 %v1846_v44  ;;  %v2487_v44 = vld [vmem:[%s4351_s13 + $0x130] sm:$0xff] }
 0x3b7   :  { %2021 = vmatpush.msra.mxu2 %v2476_v29  ;;  %2046 = vmatpush.msra.mxu0 %v2487_v44  ;;  %v2551_v44 = vld [vmem:[%s4351_s13 + $0x270] sm:$0xff] }
 0x3b8   :  { %2076 = vmatpush.msra.mxu1 %v2499_v19  ;;  %v2510_v19 = vld [vmem:[%s4351_s13 + $0x188] sm:$0xff] }
 0x3b9   :  { %2022 = vmatpush.msra.mxu2 %v2475_v39  ;;  %2126 = vmatpush.msra.mxu3 %v2510_v19  ;;  %v2539_v39 = vld [vmem:[%s4351_s13 + $0x210] sm:$0xff]  ;;  %v2582_v19 = vld [vmem:[%s4351_s13 + $0x308] sm:$0xff] }
 0x3ba   :  { %2077 = vmatpush.msra.mxu1 %v2498_v8  ;;  %v2546_v8 = vld [vmem:[%s4351_s13 + $0x248] sm:$0xff] }
 0x3bb   :  { %2455 = vmatmul.msk.f32.gmra.mxu1 %vm1720_vm11, %v1717_v51  ;;  %2023 = vmatpush.msra.mxu2 %v2474_v31  ;;  %v2472_v51 = vld [vmem:[%s4351_s13 + $0xb8] sm:$0xff] }
 0x3bc   :  { %2078 = vmatpush.msra.mxu1 %v2497_v9  ;;  %v2470_v9 = vld [vmem:[%s4351_s13 + $0xa8] sm:$0xff] }
 0x3bd   :  { %2024 = vmatpush.msra.mxu2 %v2473_v59 }
 0x3be   :  { %2079 = vmatpush.msra.mxu1 %v2496_v17 }
 0x3bf   :  { %2025 = vmatpush.msra.mxu2 %v2472_v51 }
 0x3c0   :  { %2080 = vmatpush.msra.mxu1 %v2495_v33  ;;  %v2486_v33 = vld [vmem:[%s4351_s13 + $0x128] sm:$0xff] }
 0x3c1   :  { %2026 = vmatpush.msra.mxu2 %v2471_v21  ;;  %2047 = vmatpush.msra.mxu0 %v2486_v33  ;;  %v2517_v33 = vld [vmem:[%s4351_s13 + $0x1c0] sm:$0xff] }
 0x3c2   :  { %2081 = vmatpush.msra.mxu1 %v2494_v20  ;;  %v2509_v20 = vld [vmem:[%s4351_s13 + $0x180] sm:$0xff] }
 0x3c3   :  { %2457 = vmatmul.msk.f32.vlgmr.msrb.gmra.mxu1 %vm361_vm2, %v1845_v61  ;;  %v2469_v61 = vld [vmem:[%s4351_s13 + $0xa0] sm:$0xff]  ;;  %2027 = vmatpush.msra.mxu2 %v2470_v9  ;;  %v2518_v9 = vld [vmem:[%s4351_s13 + $0x1c8] sm:$0xff] }
 0x3c4   :  { %2082 = vmatpush.msra.mxu1 %v2493_v15  ;;  %v2545_v15 = vld [vmem:[%s4351_s13 + $0x240] sm:$0xff]  ;;  %2127 = vmatpush.msra.mxu3 %v2509_v20 }
 0x3c5   :  { %2028 = vmatpush.msra.mxu2 %v2469_v61  ;;  %v2549_v20 = vld [vmem:[%s4351_s13 + $0x260] sm:$0xff]  ;;  %v2531_v61 = vld [vmem:[%s4350_s12 + $0x138] sm:$0xff] }
 0x3c6   :  { %2083 = vmatpush.msra.mxu1 %v2492_v5 }
 0x3c8   :  { %2084 = vmatpush.msra.mxu1 %v2491_v62  ;;  %v2485_v62 = vld [vmem:[%s4351_s13 + $0x120] sm:$0xff] }
 0x3c9   :  { %2048 = vmatpush.msra.mxu0 %v2485_v62 }
 0x3ca   :  { %2085 = vmatpush.msra.mxu1 %v2490_v54  ;;  %v2508_v54 = vld [vmem:[%s4351_s13 + $0x178] sm:$0xff] }
 0x3cb   :  { %2500 = vmatmul.msk.f32.vlgmr.msra.gmra.mxu1 %vm361_vm2, %v2055_v43  ;;  %2128 = vmatpush.msra.mxu3 %v2508_v54 }
 0x3cc   :  { %2227 = vmatpush.msrb.mxu1 %v2548_v38  ;;  %v2583_v38 = vld [vmem:[%s4351_s13 + $0x310] sm:$0xff] }
 0x3cd   :  { %2129 = vmatpush.msra.mxu3 %v2507_v52  ;;  %v2528_v52 = vld [vmem:[%s4350_s12 + $0x120] sm:$0xff] }
 0x3ce   :  { %2228 = vmatpush.msrb.mxu1 %v2547_v42 }
 0x3cf   :  { %2130 = vmatpush.msra.mxu3 %v2506_v0 }
 0x3d0   :  { %2229 = vmatpush.msrb.mxu1 %v2546_v8  ;;  %v2581_v8 = vld [vmem:[%s4351_s13 + $0x300] sm:$0xff] }
 0x3d1   :  { %2131 = vmatpush.msra.mxu3 %v2505_v30  ;;  %v2574_v30 = vld [vmem:[%s4351_s13 + $0x2c8] sm:$0xff] }
 0x3d2   :  { %2230 = vmatpush.msrb.mxu1 %v2545_v15 }
 0x3d3   :  { %2132 = vmatpush.msra.mxu3 %v2504_v25 }
 0x3d4   :  { %2231 = vmatpush.msrb.mxu1 %v2544_v18  ;;  %v2579_v18 = vld [vmem:[%s4351_s13 + $0x2f0] sm:$0xff] }
 0x3d5   :  { %2133 = vmatpush.msra.mxu3 %v2503_v14  ;;  %v2561_v14 = vld [vmem:[%s4350_s12 + $0x178] sm:$0xff] }
 0x3d6   :  { %2232 = vmatpush.msrb.mxu1 %v2543_v47 }
 0x3d7   :  { %2134 = vmatpush.msra.mxu3 %v2502_v7  ;;  %v2560_v7 = vld [vmem:[%s4350_s12 + $0x170] sm:$0xff] }
 0x3d8   :  { %2233 = vmatpush.msrb.mxu1 %v2542_v60 }
 0x3d9   :  { %2135 = vmatpush.msra.mxu3 %v2501_v27  ;;  %v2558_v27 = vld [vmem:[%s4350_s12 + $0x160] sm:$0xff] }
 0x3da   :  { %2234 = vmatpush.msrb.mxu1 %v2541_v4  ;;  %v2573_v4 = vld [vmem:[%s4351_s13 + $0x2c0] sm:$0xff] }
 0x3db   :  { %2366 = vmatpush.msrb.mxu3 %v2584_v37  ;;  %v2555_v37 = vld [vmem:[%s4350_s12 + $0x148] sm:$0xff] }
 0x3dc   :  { %2235 = vmatpush.msrb.mxu1 %v2540_v50  ;;  %v2162_v50 = vld [vmem:[#allocation2 + $0x6] sm:$0x3] }
 0x3dd   :  { %2367 = vmatpush.msrb.mxu3 %v2583_v38  ;;  %v2395_v38 = vld [vmem:[%s4353_s15 + $0x70] sm:$0xff] }
 0x3de   :  { %2236 = vmatpush.msrb.mxu1 %v2539_v39  ;;  %v2568_v39 = vld [vmem:[%s4351_s13 + $0x298] sm:$0xff] }
 0x3df   :  { %2368 = vmatpush.msrb.mxu3 %v2582_v19  ;;  %v2387_v19 = vld [vmem:[%s4353_s15 + $0x30] sm:$0xff] }
 0x3e0   :  { %2237 = vmatpush.msrb.mxu1 %v2538_v57  ;;  %v2567_v57 = vld [vmem:[%s4351_s13 + $0x290] sm:$0xff] }
 0x3e1   :  { %2369 = vmatpush.msrb.mxu3 %v2581_v8  ;;  %v2386_v8 = vld [vmem:[%s4353_s15 + $0x28] sm:$0xff] }
 0x420   :  { %v3952_v13 = vpop.f32.mrf.mxu1 }
 0x426   :  { %v1742_v32 = vpop.f32.mrf.mxu2 }
 0x427   :  { %v1788_v63 = vpop.f32.mrf.mxu3  ;;  %v1743_v17 = vadd.f32 %v1742_v32, %v1696_v53  ;;  %v2537_v32 = vld [vmem:[%s4351_s13 + $0x200] sm:$0xff] }
 0x428   :  { %v3995_v16 = vpop.f32.mrf.mxu1  ;;  %v1789_v5 = vadd.f32 %v1788_v63, %v1697_v24  ;;  %2238 = vmatpush.msrb.mxu1 %v2537_v32  ;;  %v2534_v63 = vld [vmem:[%s4351_s13 + $0x1e8] sm:$0xff]  ;;  %v2565_v32 = vld [vmem:[%s4351_s13 + $0x280] sm:$0xff] }
 0x429   :  { %v1766_v55 = vadd.f32 %v3952_v13, %v1743_v17  ;;  %v2550_v17 = vld [vmem:[%s4351_s13 + $0x268] sm:$0xff] }
 0x42a   :  { %2239 = vmatpush.msrb.mxu1 %v2536_v58  ;;  %v2556_v58 = vld [vmem:[%s4350_s12 + $0x150] sm:$0xff] }
 0x42b   :  { %v1817_v12 = vmax.f32 %v1766_v55, 0.0  ;;  %v2529_v55 = vld [vmem:[%s4350_s12 + $0x128] sm:$0xff] }
 0x42e   :  { %v1745_v1 = vpop.f32.mrf.mxu2 }
 0x42f   :  { %v1791_v6 = vpop.f32.mrf.mxu3  ;;  %v1746_v26 = vadd.f32 %v1745_v1, %v1696_v53  ;;  %v2535_v53 = vld [vmem:[%s4351_s13 + $0x1f0] sm:$0xff]  ;;  %v2577_v1 = vld [vmem:[%s4351_s13 + $0x2e0] sm:$0xff] }
 0x430   :  { %v1811_v43 = vpop.f32.mrf.mxu1  ;;  %v1792_v45 = vadd.f32 %v1791_v6, %v1697_v24  ;;  %2240 = vmatpush.msrb.mxu1 %v2535_v53  ;;  %v2519_v24 = vld [vmem:[%s4351_s13 + $0x1d0] sm:$0xff]  ;;  %v2527_v6 = vld [vmem:[%s4350_s12 + $0x118] sm:$0xff]  ;;  %v2554_v53 = vld [vmem:[%s4350_s12 + $0x140] sm:$0xff] }
 0x431   :  { %v1812_v3 = vadd.f32 %v1811_v43, %v1789_v5  ;;  %v1769_v29 = vadd.f32 %v3995_v16, %v1746_v26  ;;  %v2580_v5 = vld [vmem:[%s4351_s13 + $0x2f8] sm:$0xff]  ;;  %v2530_v43 = vld [vmem:[%s4350_s12 + $0x130] sm:$0xff] }
 0x432   :  { %2241 = vmatpush.msrb.mxu1 %v2534_v63  ;;  %v2575_v26 = vld [vmem:[%s4351_s13 + $0x2d0] sm:$0xff] }
 0x433   :  { %v1818_v28 = vmax.f32 %v1812_v3, 0.0  ;;  %v1819_v31 = vmax.f32 %v1769_v29, 0.0  ;;  %v2578_v3 = vld [vmem:[%s4351_s13 + $0x2e8] sm:$0xff]  ;;  %v2562_v29 = vld [vmem:[%s4350_s12 + $0x180] sm:$0xff]  ;;  %v2269_v63 = vld [vmem:[#allocation2 + $0x8] sm:$0x3] }
 0x434   :  { %2242 = vmatpush.msrb.mxu1 %v2533_v41  ;;  %v2392_v41 = vld [vmem:[%s4353_s15 + $0x58] sm:$0xff] }
 0x435   :  { %v1825_v56 = vrot.slane %v1818_v28, 6  ;;  %v2576_v28 = vld [vmem:[%s4351_s13 + $0x2d8] sm:$0xff] }
 0x437   :  { %v1827_v23 = vsel %vm419_vm4, %v1817_v12, %v1825_v56  ;;  %v1828_v11 = vsel %vm421_vm6, %v1817_v12, %v1825_v56  ;;  %v1830_v10 = vsel %vm424_vm7, %v1817_v12, %v1825_v56  ;;  %v1832_v2 = vsel %vm427_vm8, %v1825_v56, %v1817_v12  ;;  %v2526_v12 = vld [vmem:[%s4350_s12 + $0x110] sm:$0xff]  ;;  %v2525_v56 = vld [vmem:[%s4350_s12 + $0x108] sm:$0xff] }
 0x438   :  { %v1829_v35 = vrot.slane %v1828_v11, 2  ;;  %v1831_v13 = vrot.slane %v1830_v10, 4  ;;  %v1833_v48 = vrot.slane %v1832_v2, 6  ;;  %1840 = vst.msk [vmem:[#allocation5] sm:$0xf] %vm3193_vm9, %v1827_v23  ;;  %v1814_v22 = vpop.f32.mrf.mxu1  ;;  %v2523_v11 = vld [vmem:[%s4350_s12 + $0xf8] sm:$0xff] }
 0x439   :  { %v1815_v34 = vadd.f32 %v1814_v22, %v1792_v45  ;;  %v2524_v45 = vld [vmem:[%s4350_s12 + $0x100] sm:$0xff]  ;;  %v2572_v10 = vld [vmem:[%s4351_s13 + $0x2b8] sm:$0xff]  ;;  %v2570_v22 = vld [vmem:[%s4351_s13 + $0x2a8] sm:$0xff] }
 0x43a   :  { %1841 = vst.msk [vmem:[#allocation5 + $0x4] sm:$0xf] %vm3193_vm9, %v1829_v35  ;;  %v2522_v35 = vld [vmem:[%s4350_s12 + $0xf0] sm:$0xff] }
 0x43b   :  { %1842 = vst.msk [vmem:[#allocation5 + $0x8] sm:$0xf] %vm3193_vm9, %v1831_v13  ;;  %v1820_v49 = vmax.f32 %v1815_v34, 0.0  ;;  %v2571_v13 = vld [vmem:[%s4351_s13 + $0x2b0] sm:$0xff]  ;;  %v2569_v34 = vld [vmem:[%s4351_s13 + $0x2a0] sm:$0xff] }
 0x43c   :  { %1843 = vst.msk [vmem:[#allocation5 + $0xc] sm:$0xf] %vm3193_vm9, %v1833_v48  ;;  %v2563_v48 = vld [vmem:[%s4350_s12 + $0x188] sm:$0xff] }
 0x43d   :  { %v1826_v36 = vrot.slane %v1820_v49, 6 }
 0x43f   :  { %v1856_v16 = vld [vmem:[#allocation5] sm:$0xf]  ;;  %v1834_v59 = vsel %vm419_vm4, %v1819_v31, %v1826_v36  ;;  %v2559_v31 = vld [vmem:[%s4350_s12 + $0x168] sm:$0xff] }
 0x440   :  { %1878 = vst [vmem:[#allocation1] ss:$4 sm:$0xff] %v1856_v16  ;;  %v2566_v36 = vld [vmem:[%s4351_s13 + $0x288] sm:$0xff]  ;;  %v2557_v16 = vld [vmem:[%s4350_s12 + $0x158] sm:$0xff] }
 0x441   :  { %1844 = vst.msk [vmem:[#allocation5 + $0x10] sm:$0xf] %vm3193_vm9, %v1834_v59  ;;  %v1984_v51 = vld [vmem:[#allocation5 + $0x4] sm:$0xf] }
 0x442   :  { %v2091_v15 = vld [vmem:[#allocation5 + $0x8] sm:$0xf] }
 0x443   :  { %v2198_v47 = vld [vmem:[#allocation5 + $0xc] sm:$0xf] }
 0x447   :  { %v1879_v42 = vld.sshfl [vmem:[#allocation1] sm:$0xff pattern:$0x73625140]  ;;  %v1880_v21 = vld.sshfl [vmem:[#allocation1 + $0x8] sm:$0xff pattern:$0x73625140] }
 0x448   :  { %1900 = vmatmul.f32.vlgmr.msrb.gmra.mxu0 %v1879_v42  ;;  %2456 = vmatmul.msk.f32.vlgmr.msrb.gmra.mxu2 %vm1720_vm11, %v1880_v21  ;;  %2007 = vst [vmem:[#allocation1] ss:$4 sm:$0xff] %v1984_v51  ;;  %v2305_v23 = vld [vmem:[#allocation5 + $0x10] sm:$0xf]  ;;  %v2391_v42 = vld [vmem:[%s4353_s15 + $0x50] sm:$0xff] }
 0x449   :  { %2152 = vmatpush.msrb.mxu0 %v2520_v40  ;;  %2259 = vmatpush.msrb.mxu2 %v2552_v46  ;;  %v2396_v40 = vld [vmem:[%s4353_s15 + $0x78] sm:$0xff]  ;;  %v2394_v51 = vld [vmem:[%s4353_s15 + $0x68] sm:$0xff]  ;;  %v2393_v46 = vld [vmem:[%s4353_s15 + $0x60] sm:$0xff] }
 0x44a   :  { %v2390_v21 = vld [vmem:[%s4353_s15 + $0x48] sm:$0xff] }
 0x44b   :  { %2153 = vmatpush.msrb.mxu0 %v2519_v24  ;;  %2260 = vmatpush.msrb.mxu2 %v2551_v44  ;;  %v2389_v24 = vld [vmem:[%s4353_s15 + $0x40] sm:$0xff]  ;;  %v2388_v44 = vld [vmem:[%s4353_s15 + $0x38] sm:$0xff] }
 0x44d   :  { %2154 = vmatpush.msrb.mxu0 %v2518_v9  ;;  %2261 = vmatpush.msrb.mxu2 %v2550_v17 }
 0x44f   :  { %2155 = vmatpush.msrb.mxu0 %v2517_v33  ;;  %2262 = vmatpush.msrb.mxu2 %v2549_v20  ;;  %v2008_v62 = vld.sshfl [vmem:[#allocation1] sm:$0xff pattern:$0x73625140]  ;;  %v2009_v54 = vld.sshfl [vmem:[#allocation1 + $0x8] sm:$0xff pattern:$0x73625140] }
 0x450   :  { %2029 = vmatmul.f32.vlgmr.msra.gmra.mxu2 %v2008_v62  ;;  %2489 = vmatmul.msk.f32.vlgmr.msra.gmra.mxu0 %vm1720_vm11, %v2009_v54  ;;  %2114 = vst [vmem:[#allocation1] ss:$4 sm:$0xff] %v2091_v15  ;;  %v2385_v20 = vld [vmem:[%s4353_s15 + $0x20] sm:$0xff]  ;;  %v2384_v15 = vld [vmem:[%s4353_s15 + $0x18] sm:$0xff]  ;;  %v1980_v54 = vpop.f32.mrf.mxu3 }
 0x451   :  { %2183 = vmatpush.msra.mxu0 %v2531_v61  ;;  %2334 = vmatpush.msra.mxu2 %v2580_v5  ;;  %v1944_v61 = vpop.f32.mrf.mxu1  ;;  %v2383_v5 = vld [vmem:[%s4353_s15 + $0x10] sm:$0xff] }
 0x453   :  { %2184 = vmatpush.msra.mxu0 %v2530_v43  ;;  %2335 = vmatpush.msra.mxu2 %v2579_v18  ;;  %v2382_v43 = vld [vmem:[%s4353_s15 + $0x8] sm:$0xff] }
 0x455   :  { %2185 = vmatpush.msra.mxu0 %v2529_v55  ;;  %2336 = vmatpush.msra.mxu2 %v2578_v3  ;;  %v2381_v55 = vld [vmem:[%s4353_s15] sm:$0xff] }
 0x457   :  { %2186 = vmatpush.msra.mxu0 %v2528_v52  ;;  %2337 = vmatpush.msra.mxu2 %v2577_v1  ;;  %v2115_v0 = vld.sshfl [vmem:[#allocation1] sm:$0xff pattern:$0x73625140]  ;;  %v2116_v60 = vld.sshfl [vmem:[#allocation1 + $0x8] sm:$0xff pattern:$0x73625140] }
 0x458   :  { %2136 = vmatmul.f32.vlgmr.msra.gmra.mxu3 %v2115_v0  ;;  %2521 = vmatmul.msk.f32.vlgmr.msrb.gmra.mxu0 %vm1720_vm11, %v2116_v60  ;;  %2221 = vst [vmem:[#allocation1] ss:$4 sm:$0xff] %v2198_v47 }
 0x459   :  { %2187 = vmatpush.msra.mxu0 %v2527_v6  ;;  %2338 = vmatpush.msra.mxu2 %v2576_v28  ;;  %v2087_v6 = vpop.f32.mrf.mxu1 }
 0x45a   :  { %2401 = vmatpush.msra.mxu3 %v2396_v40 }
 0x45b   :  { %2188 = vmatpush.msra.mxu0 %v2526_v12  ;;  %2339 = vmatpush.msra.mxu2 %v2575_v26 }
 0x45c   :  { %2402 = vmatpush.msra.mxu3 %v2395_v38 }
 0x45d   :  { %2189 = vmatpush.msra.mxu0 %v2525_v56  ;;  %2340 = vmatpush.msra.mxu2 %v2574_v30 }
 0x45e   :  { %2403 = vmatpush.msra.mxu3 %v2394_v51 }
 0x45f   :  { %2190 = vmatpush.msra.mxu0 %v2524_v45  ;;  %2341 = vmatpush.msra.mxu2 %v2573_v4  ;;  %v2222_v2 = vld.sshfl [vmem:[#allocation1] sm:$0xff pattern:$0x73625140]  ;;  %v2223_v25 = vld.sshfl [vmem:[#allocation1 + $0x8] sm:$0xff pattern:$0x73625140] }
 0x460   :  { %2243 = vmatmul.f32.vlgmr.msrb.gmra.mxu1 %v2222_v2  ;;  %2553 = vmatmul.msk.f32.vlgmr.msrb.gmra.mxu2 %vm1720_vm11, %v2223_v25  ;;  %2328 = vst [vmem:[#allocation1] ss:$4 sm:$0xff] %v2305_v23 }
 0x461   :  { %2191 = vmatpush.msra.mxu0 %v2523_v11  ;;  %2342 = vmatpush.msra.mxu2 %v2572_v10 }
 0x462   :  { %2404 = vmatpush.msra.mxu3 %v2393_v46 }
 0x463   :  { %2192 = vmatpush.msra.mxu0 %v2522_v35  ;;  %2343 = vmatpush.msra.mxu2 %v2571_v13 }
 0x464   :  { %2532 = vmatmul.msk.f32.vlgmr.msra.gmra.mxu0 %vm361_vm2, %v2162_v50  ;;  %2405 = vmatpush.msra.mxu3 %v2392_v41 }
 0x465   :  { %2290 = vmatpush.msrb.mxu0 %v2563_v48  ;;  %2344 = vmatpush.msra.mxu2 %v2570_v22  ;;  %v2595_v48 = vld [vmem:[%s4352_s14] ss:$0 sm:$0xff] }
 0x466   :  { %2406 = vmatpush.msra.mxu3 %v2391_v42 }
 0x467   :  { %2291 = vmatpush.msrb.mxu0 %v2562_v29  ;;  %2345 = vmatpush.msra.mxu2 %v2569_v34  ;;  %v2330_v49 = vld.sshfl [vmem:[#allocation1 + $0x8] sm:$0xff pattern:$0x73625140]  ;;  %v2329_v59 = vld.sshfl [vmem:[#allocation1] sm:$0xff pattern:$0x73625140] }
 0x468   :  { %2585 = vmatmul.msk.f32.vlgmr.msrb.gmra.mxu3 %vm1720_vm11, %v2330_v49  ;;  %v2596_v34 = vld [vmem:[%s4354_s16] ss:$0 sm:$0xff] }
 0x469   :  { %2292 = vmatpush.msrb.mxu0 %v2561_v14  ;;  %2346 = vmatpush.msra.mxu2 %v2568_v39 }
 0x46a   :  { %2407 = vmatpush.msra.mxu3 %v2390_v21 }
 0x46b   :  { %2293 = vmatpush.msrb.mxu0 %v2560_v7  ;;  %2347 = vmatpush.msra.mxu2 %v2567_v57 }
 0x46c   :  { %2408 = vmatpush.msra.mxu3 %v2389_v24 }
 0x46d   :  { %2294 = vmatpush.msrb.mxu0 %v2559_v31  ;;  %2348 = vmatpush.msra.mxu2 %v2566_v36 }
 0x46e   :  { %2409 = vmatpush.msra.mxu3 %v2388_v44 }
 0x46f   :  { %2295 = vmatpush.msrb.mxu0 %v2558_v27  ;;  %2349 = vmatpush.msra.mxu2 %v2565_v32 }
 0x470   :  { %2350 = vmatmul.f32.vlgmr.msra.gmra.mxu2 %v2329_v59  ;;  %2410 = vmatpush.msra.mxu3 %v2387_v19 }
 0x471   :  { %2296 = vmatpush.msrb.mxu0 %v2557_v16 }
 0x472   :  { %2411 = vmatpush.msra.mxu3 %v2386_v8 }
 0x473   :  { %2297 = vmatpush.msrb.mxu0 %v2556_v58 }
 0x474   :  { %2412 = vmatpush.msra.mxu3 %v2385_v20 }
 0x475   :  { %2298 = vmatpush.msrb.mxu0 %v2555_v37 }
 0x476   :  { %2413 = vmatpush.msra.mxu3 %v2384_v15 }
 0x477   :  { %2299 = vmatpush.msrb.mxu0 %v2554_v53 }
 0x478   :  { %2564 = vmatmul.msk.f32.vlgmr.msrb.gmra.mxu0 %vm361_vm2, %v2269_v63  ;;  %2414 = vmatpush.msra.mxu3 %v2383_v5 }
 0x47a   :  { %2415 = vmatpush.msra.mxu3 %v2382_v43 }
 0x47c   :  { %2416 = vmatpush.msra.mxu3 %v2381_v55 }
 0x4c5   :  { %v1901_v9 = vpop.f32.mrf.mxu0 }
 0x4cb   :  { %v1921_v17 = vpop.f32.mrf.mxu2 }
 0x4cc   :  { %v1922_v62 = vadd.f32 %v1921_v17, %v1901_v9 }
 0x4cd   :  { %v2050_v33 = vpop.f32.mrf.mxu0 }
 0x4ce   :  { %v1945_v3 = vadd.f32 %v1944_v61, %v1922_v62 }
 0x4d0   :  { %v1983_v47 = vadd.f32 %v1980_v54, %v1945_v3 }
 0x4d3   :  { %v2030_v18 = vpop.f32.mrf.mxu2 }
 0x4d4   :  { %v2051_v52 = vadd.f32 %v2050_v33, %v2030_v18 }
 0x4d5   :  { %v2157_v1 = vpop.f32.mrf.mxu0 }
 0x4d6   :  { %v2053_v0 = vadd.f32 %v2051_v52, %v1983_v47 }
 0x4d8   :  { %v2090_v26 = vadd.f32 %v2087_v6, %v2053_v0 }
 0x4db   :  { %v2137_v28 = vpop.f32.mrf.mxu3 }
 0x4dc   :  { %v2158_v60 = vadd.f32 %v2157_v1, %v2137_v28 }
 0x4dd   :  { %v2244_v45 = vpop.f32.mrf.mxu1 }
 0x4de   :  { %v2160_v30 = vadd.f32 %v2158_v60, %v2090_v26 }
 0x4e1   :  { %v2194_v56 = vpop.f32.mrf.mxu0 }
 0x4e2   :  { %v2197_v23 = vadd.f32 %v2194_v56, %v2160_v30 }
 0x4e3   :  { %v2264_v12 = vpop.f32.mrf.mxu2 }
 0x4e4   :  { %v2265_v4 = vadd.f32 %v2264_v12, %v2244_v45 }
 0x4e6   :  { %v2267_v25 = vadd.f32 %v2265_v4, %v2197_v23 }
 0x4eb   :  { %v2371_v11 = vpop.f32.mrf.mxu3 }
 0x4f3   :  { %v2351_v10 = vpop.f32.mrf.mxu2 }
 0x4f4   :  { %v2372_v2 = vadd.f32 %v2371_v11, %v2351_v10 }
 0x4f5   :  { %v2301_v35 = vpop.f32.mrf.mxu0 }
 0x4f6   :  { %v2304_v13 = vadd.f32 %v2301_v35, %v2267_v25 }
 0x4f8   :  { %v2374_v22 = vadd.f32 %v2372_v2, %v2304_v13 }
 0x4fa   :  { %v2379_v50 = vadd.f32 %v2595_v48, %v2374_v22 }
 0x4fc   :  { %v2380_v29 = vmax.f32 %v2379_v50, 0.0 }
 0x4fe   :  { %2417 = vmatmul.f32.vlgmr.msra.gmra.mxu3 %v2380_v29 }
 0x581   :  { %v2418_v14 = vpop.f32.mrf.mxu3 }
 0x582   :  { %v2419_v39 = vadd.f32 %v2596_v34, %v2418_v14 }
 0x584   :  { %2421 = vst [vmem:[#allocation7] sm:$0x3] %v2419_v39 }
 0x585   :  { %2432 = dma.vmem_to_hbm [thread:$0]  %s2428_s7, 32, %s2430_s22, [#allocation8]  }
 0x586   :  { %2701 = dma.done.wait [#allocation8], 32  }
 0x587   :  { %2702 = vsyncadd [#allocation8], 4294967264 }
 0x588   :  { %2437 = vsyncpa [#allocation8], 1 }

</bundles_post_ra>
